<compile_context>
chip_gen: v7x
topology: tpu7x:2x2x1
jax: 0.10.0
libtpu: 0.0.40
codegen_flags: <defaults>
</compile_context>

<pallas_src>
import functools

import jax
import jax.numpy as jnp
from jax import lax
from jax.experimental import pallas as pl
from jax.experimental.pallas import tpu as pltpu


# ----------------------------------------------------------------------------
# Small helpers
# ----------------------------------------------------------------------------
def _round_up(v, m):
    return (v + m - 1) // m * m


def _pad_cols(w, n_pad):
    n = w.shape[1]
    if n_pad == n:
        return w
    return jnp.pad(w, ((0, 0), (0, n_pad - n)))


def _choose_tm(m, cap=1024):
    """~ceil(M/2) rounded up to 8, capped: >=2 grid steps (v7x dual-TC) but few
    steps overall; never degrades to tiny tiles for awkward M."""
    return min(cap, max(8, _round_up((m + 1) // 2, 8)))


# ----------------------------------------------------------------------------
# Pallas kernels: fused bf16 matmul + bias + optional ReLU (+ folded residual)
# ----------------------------------------------------------------------------
def _mm_kernel(a_ref, w_ref, b_ref, o_ref, *, relu):
    acc = jnp.dot(a_ref[...], w_ref[...], preferred_element_type=jnp.float32)
    acc = acc + b_ref[...]
    if relu:
        acc = jnp.maximum(acc, 0.0)
    o_ref[...] = acc.astype(o_ref.dtype)


def _mm_res_kernel(a_ref, w_ref, r_ref, wr_ref, b_ref, o_ref, *, relu):
    # conv matmul + 1x1-downsample residual branch + bias + ReLU, one pass.
    acc = jnp.dot(a_ref[...], w_ref[...], preferred_element_type=jnp.float32)
    acc = acc + jnp.dot(r_ref[...], wr_ref[...], preferred_element_type=jnp.float32)
    acc = acc + b_ref[...]
    if relu:
        acc = jnp.maximum(acc, 0.0)
    o_ref[...] = acc.astype(o_ref.dtype)


def pallas_matmul(x, w, b, *, relu=False, extra=None, extra_w=None,
                  out_dtype=jnp.bfloat16, tm_cap=1024):
    """y = relu?(x @ w [+ extra @ extra_w] + b).  x:(M,K) w:(K,N) b:(N,).

    bf16 operands, f32 MXU accumulation.  Output N is padded to a multiple of
    128 (lane-dense stores); M is padded to a multiple of tm.  K is never
    padded: the activation/weight blocks cover the full K dim.
    """
    M, K = x.shape
    N = w.shape[1]
    Np = _round_up(max(N, 128), 128)          # lane-dense output stores
    tm = _choose_tm(M, tm_cap)
    Mp = _round_up(M, tm)
    grid = (Mp // tm,)

    xb = x.astype(jnp.bfloat16)
    if Mp != M:
        xb = jnp.pad(xb, ((0, Mp - M), (0, 0)))
    wb = _pad_cols(w, Np).astype(jnp.bfloat16)
    bb = _pad_cols(b.reshape(1, -1), Np).astype(jnp.float32)

    if extra is None:
        kernel = functools.partial(_mm_kernel, relu=relu)
        in_specs = [
            pl.BlockSpec((tm, K), lambda i: (i, 0)),
            pl.BlockSpec((K, Np), lambda i: (0, 0)),   # weight VMEM-resident
            pl.BlockSpec((1, Np), lambda i: (0, 0)),
        ]
        args = (xb, wb, bb)
    else:
        Ke = extra.shape[1]
        eb = extra.astype(jnp.bfloat16)
        if Mp != M:
            eb = jnp.pad(eb, ((0, Mp - M), (0, 0)))
        ewb = _pad_cols(extra_w, Np).astype(jnp.bfloat16)
        kernel = functools.partial(_mm_res_kernel, relu=relu)
        in_specs = [
            pl.BlockSpec((tm, K), lambda i: (i, 0)),
            pl.BlockSpec((K, Np), lambda i: (0, 0)),
            pl.BlockSpec((tm, Ke), lambda i: (i, 0)),
            pl.BlockSpec((Ke, Np), lambda i: (0, 0)),
            pl.BlockSpec((1, Np), lambda i: (0, 0)),
        ]
        args = (xb, wb, eb, ewb, bb)

    # TODO(synk): for real ResNet-50 widths add a trailing "arbitrary" K grid
    #             axis with an f32 VMEM accumulator (pl.when init/finalize) and
    #             size blocks for v7x's 64 MiB VMEM (tk=512, tm=256, tn<=512).
    out = pl.pallas_call(
        kernel,
        out_shape=jax.ShapeDtypeStruct((Mp, Np), out_dtype),
        grid=grid,
        in_specs=in_specs,
        out_specs=pl.BlockSpec((tm, Np), lambda i: (i, 0)),
        compiler_params=pltpu.CompilerParams(dimension_semantics=("parallel",)),
    )(*args)
    if Mp != M or Np != N:
        out = out[:M, :N]
    return out


# ----------------------------------------------------------------------------
# Conv glue: single fused patch-extraction op + fused Pallas matmul
# ----------------------------------------------------------------------------
def conv2d(x, w, b, kh, kw, *, stride, padding, relu,
           extra=None, extra_w=None, extra_b=None):
    """Conv as patches + one fused Pallas matmul.  Optionally folds a 1x1
    downsample branch (`extra`, `extra_w`, `extra_b`) plus the residual add and
    ReLU into the same kernel (second in-kernel dot, no K concat)."""
    B = x.shape[0]
    # TODO(synk): replace with a fully in-kernel tap loop (kh*kw "arbitrary"
    #             grid axis + VMEM accumulator) to avoid the kh*kw activation
    #             duplication in HBM; patches-op is the sanctioned interim step.
    patches = lax.conv_general_dilated_patches(
        x, (kh, kw), (stride, stride),
        [(padding, padding), (padding, padding)],
        dimension_numbers=("NHWC", "HWIO", "NHWC"))
    _, Ho, Wo, K = patches.shape
    cols = patches.reshape(B * Ho * Wo, K)
    if extra is not None:
        e2 = extra.reshape(B * Ho * Wo, extra.shape[-1])
        y = pallas_matmul(cols, w, b + extra_b, relu=relu, extra=e2, extra_w=extra_w)
    else:
        y = pallas_matmul(cols, w, b, relu=relu)
    return y.reshape(B, Ho, Wo, -1)


def maxpool_3x3_s2(x):
    # TODO(synk): fuse into the stem kernel epilogue (needs row-halo tiles).
    return lax.reduce_window(
        x, jnp.asarray(-jnp.inf, x.dtype), lax.max,
        window_dimensions=(1, 3, 3, 1),
        window_strides=(1, 2, 2, 1),
        padding=((0, 0), (1, 1), (1, 1), (0, 0)),
    )


# ----------------------------------------------------------------------------
# Fused SMPL head kernel: GAP + n_iter x (fc1, fc2, decoder), 3 dots / iter
# ----------------------------------------------------------------------------
_NPOSE = 24 * 6        # 144
_POSE_SEG = 256        # lanes [0, 256): pose (144 used)
_BETA_SEG = 128        # lanes [256, 384): betas (10 used)
_CAM_SEG = 128         # lanes [384, 512): cam (3 used)
_CARRY = _POSE_SEG + _BETA_SEG + _CAM_SEG   # 512
_BETA_OFF = _POSE_SEG
_CAM_OFF = _POSE_SEG + _BETA_SEG


def _smpl_head_kernel(f_ref, wf_ref, wc_ref, b1_ref, w2_ref, b2_ref,
                      wd_ref, bd_ref, c0_ref, carries_ref, *, n_iter):
    # Fused global-average-pool: (B, HW, C) -> (B, C)
    feat = jnp.mean(f_ref[...].astype(jnp.float32), axis=1)
    # Iteration-invariant feature contribution to fc1, hoisted out of the loop.
    hf = jnp.dot(feat.astype(jnp.bfloat16), wf_ref[...],
                 preferred_element_type=jnp.float32) + b1_ref[...]
    carry = c0_ref[...]                                  # (B, 512) f32
    for it in range(n_iter):                             # 3 dots per iteration
        h = jnp.maximum(
            hf + jnp.dot(carry.astype(jnp.bfloat16), wc_ref[...],
                         preferred_element_type=jnp.float32), 0.0)
        h = jnp.maximum(
            jnp.dot(h.astype(jnp.bfloat16), w2_ref[...],
                    preferred_element_type=jnp.float32) + b2_ref[...], 0.0)
        carry = carry + jnp.dot(h.astype(jnp.bfloat16), wd_ref[...],
                                preferred_element_type=jnp.float32) + bd_ref[...]
        carries_ref[it] = carry


def rot6d_to_rotmat(x6):
    """x6: (B, J, 6) -> (B, J, 3, 3)."""
    a1 = x6[..., 0:3]
    a2 = x6[..., 3:6]
    b1 = a1 / jnp.maximum(jnp.linalg.norm(a1, axis=-1, keepdims=True), 1e-8)
    b2 = a2 - jnp.sum(b1 * a2, axis=-1, keepdims=True) * b1
    b2 = b2 / jnp.maximum(jnp.linalg.norm(b2, axis=-1, keepdims=True), 1e-8)
    b3 = jnp.cross(b1, b2)
    return jnp.stack([b1, b2, b3], axis=-1)


def smpl_head(p, feats, n_iter=3):
    """Fused HMR iterative regressor: one pallas_call does GAP + the full
    3-iteration loop with all weights resident in VMEM."""
    B, H, W, C = feats.shape
    f = feats.reshape(B, H * W, C).astype(jnp.bfloat16)
    f32, bf16 = jnp.float32, jnp.bfloat16

    fc1 = p["fc1_w"]                       # (C + 144 + 10 + 3, 256)
    wf = fc1[:C].astype(bf16)
    wc = jnp.zeros((_CARRY, 256), f32)
    wc = wc.at[0:_NPOSE].set(fc1[C:C + _NPOSE])
    wc = wc.at[_BETA_OFF:_BETA_OFF + 10].set(fc1[C + _NPOSE:C + _NPOSE + 10])
    wc = wc.at[_CAM_OFF:_CAM_OFF + 3].set(fc1[C + _NPOSE + 10:])
    wc = wc.astype(bf16)
    b1 = p["fc1_b"].reshape(1, -1).astype(f32)
    w2 = p["fc2_w"].astype(bf16)
    b2 = p["fc2_b"].reshape(1, -1).astype(f32)

    wd = jnp.zeros((256, _CARRY), f32)
    wd = wd.at[:, 0:_NPOSE].set(p["decpose_w"])
    wd = wd.at[:, _BETA_OFF:_BETA_OFF + 10].set(p["decshape_w"])
    wd = wd.at[:, _CAM_OFF:_CAM_OFF + 3].set(p["deccam_w"])
    wd = wd.astype(bf16)
    bd = jnp.zeros((1, _CARRY), f32)
    bd = bd.at[0, 0:_NPOSE].set(p["decpose_b"])
    bd = bd.at[0, _BETA_OFF:_BETA_OFF + 10].set(p["decshape_b"])
    bd = bd.at[0, _CAM_OFF:_CAM_OFF + 3].set(p["deccam_b"])

    c0 = jnp.zeros((B, _CARRY), f32)
    c0 = c0.at[:, 0:_NPOSE].set(jnp.tile(p["init_pose"][None], (B, 1)))
    c0 = c0.at[:, _BETA_OFF:_BETA_OFF + 10].set(jnp.tile(p["init_betas"][None], (B, 1)))
    c0 = c0.at[:, _CAM_OFF:_CAM_OFF + 3].set(jnp.tile(p["init_cam"][None], (B, 1)))

    carries = pl.pallas_call(
        functools.partial(_smpl_head_kernel, n_iter=n_iter),
        out_shape=jax.ShapeDtypeStruct((n_iter, B, _CARRY), f32),
    )(f, wf, wc, b1, w2, b2, wd, bd, c0)

    pred_cam = carries[n_iter - 1, :, _CAM_OFF:_CAM_OFF + 3]
    params_list = []
    for it in range(n_iter):
        rotmat = rot6d_to_rotmat(carries[it, :, :_NPOSE].reshape(B, 24, 6))
        params_list.append({
            "global_orient": rotmat[:, :1],
            "body_pose": rotmat[:, 1:],
            "betas": carries[it, :, _BETA_OFF:_BETA_OFF + 10],
        })
    return params_list[-1], pred_cam, params_list


# ----------------------------------------------------------------------------
# Parameter construction (deterministic, synthetic)
# ----------------------------------------------------------------------------
def _init(key, shape, scale=0.05):
    return scale * jax.random.normal(key, shape, dtype=jnp.float32)


def make_params(key):
    p = {}
    keys = iter(jax.random.split(key, 64))

    def conv_w(kh, kw, cin, cout):
        return _init(next(keys), (kh * kw * cin, cout))

    # --- backbone (simplified ResNet) ---
    p["stem_w"] = conv_w(7, 7, 3, 32)
    p["stem_b"] = jnp.zeros((32,), jnp.float32)

    # stage 1: basic block 32 -> 64, stride 2
    p["s1_c1_w"] = conv_w(3, 3, 32, 64)
    p["s1_c1_b"] = jnp.zeros((64,), jnp.float32)
    p["s1_c2_w"] = conv_w(3, 3, 64, 64)
    p["s1_c2_b"] = jnp.zeros((64,), jnp.float32)
    p["s1_ds_w"] = conv_w(1, 1, 32, 64)
    p["s1_ds_b"] = jnp.zeros((64,), jnp.float32)

    # stage 2: basic block 64 -> 128, stride 2
    p["s2_c1_w"] = conv_w(3, 3, 64, 128)
    p["s2_c1_b"] = jnp.zeros((128,), jnp.float32)
    p["s2_c2_w"] = conv_w(3, 3, 128, 128)
    p["s2_c2_b"] = jnp.zeros((128,), jnp.float32)
    p["s2_ds_w"] = conv_w(1, 1, 64, 128)
    p["s2_ds_b"] = jnp.zeros((128,), jnp.float32)

    # --- SMPL head (HMR iterative regressor) ---
    feat_dim, npose = 128, _NPOSE
    in_dim = feat_dim + npose + 10 + 3
    p["fc1_w"] = _init(next(keys), (in_dim, 256))
    p["fc1_b"] = jnp.zeros((256,), jnp.float32)
    p["fc2_w"] = _init(next(keys), (256, 256))
    p["fc2_b"] = jnp.zeros((256,), jnp.float32)
    p["decpose_w"] = _init(next(keys), (256, npose), scale=0.01)
    p["decpose_b"] = jnp.zeros((npose,), jnp.float32)
    p["decshape_w"] = _init(next(keys), (256, 10), scale=0.01)
    p["decshape_b"] = jnp.zeros((10,), jnp.float32)
    p["deccam_w"] = _init(next(keys), (256, 3), scale=0.01)
    p["deccam_b"] = jnp.zeros((3,), jnp.float32)

    # mean parameters (identity-ish 6D rotation, zero betas, default cam)
    p["init_pose"] = jnp.tile(jnp.array([1., 0., 0., 0., 1., 0.], jnp.float32), (24,))
    p["init_betas"] = jnp.zeros((10,), jnp.float32)
    p["init_cam"] = jnp.array([0.9, 0., 0.], jnp.float32)
    return p


# ----------------------------------------------------------------------------
# Model pieces
# ----------------------------------------------------------------------------
def backbone(p, x_nhwc):
    # stem: 7x7/2 conv, M = B*32*32 = 2048 -> tm=1024, 2 parallel grid steps
    x = conv2d(x_nhwc, p["stem_w"], p["stem_b"], 7, 7,
               stride=2, padding=3, relu=True)            # (B, 32, 32, 32)
    x = maxpool_3x3_s2(x)                                 # (B, 16, 16, 32)

    # stage 1 (32 -> 64, stride 2): the 1x1 downsample branch, residual add and
    # ReLU are folded into the second conv's kernel (second in-kernel dot).
    y = conv2d(x, p["s1_c1_w"], p["s1_c1_b"], 3, 3,
               stride=2, padding=1, relu=True)            # (B, 8, 8, 64)
    ds = x[:, ::2, ::2, :]                                # (B, 8, 8, 32)
    x = conv2d(y, p["s1_c2_w"], p["s1_c2_b"], 3, 3,
               stride=1, padding=1, relu=True,
               extra=ds, extra_w=p["s1_ds_w"], extra_b=p["s1_ds_b"])

    # stage 2 (64 -> 128, stride 2)
    y = conv2d(x, p["s2_c1_w"], p["s2_c1_b"], 3, 3,
               stride=2, padding=1, relu=True)            # (B, 4, 4, 128)
    ds = x[:, ::2, ::2, :]                                # (B, 4, 4, 64)
    x = conv2d(y, p["s2_c2_w"], p["s2_c2_b"], 3, 3,
               stride=1, padding=1, relu=True,
               extra=ds, extra_w=p["s2_ds_w"], extra_b=p["s2_ds_b"])
    return x  # (B, 4, 4, 128)


def base_model_forward(p, x_nchw):
    """Matches BaseModel.forward(x, compute_loss=False).

    x_nchw: PyTorch-style (B, 3, H, W) image.
    Returns (pred_smpl_params, pred_cam, pred_smpl_params_list).
    """
    x_nhwc = jnp.transpose(x_nchw, (0, 2, 3, 1)).astype(jnp.bfloat16)
    feats = backbone(p, x_nhwc)
    return smpl_head(p, feats)
    # TODO(synk): compute_loss=True branch (SMPL LBS, perspective projection,
    #             keypoint losses) requires the SMPL body model assets and is
    #             not part of the kernel hot path; not implemented here.


# ----------------------------------------------------------------------------
if __name__ == "__main__":
    key = jax.random.PRNGKey(0)
    k_params, k_x = jax.random.split(key)
    params = make_params(k_params)

    # small synthetic "image" batch, NCHW like PyTorch
    x = jax.random.normal(k_x, (2, 3, 64, 64), dtype=jnp.float32)

    fwd = jax.jit(functools.partial(base_model_forward, params))
    pred_smpl_params, pred_cam, pred_list = fwd(x)

    jax.block_until_ready(pred_cam)
    jax.block_until_ready(pred_smpl_params["body_pose"])

    assert pred_smpl_params["global_orient"].shape == (2, 1, 3, 3)
    assert pred_smpl_params["body_pose"].shape == (2, 23, 3, 3)
    assert pred_smpl_params["betas"].shape == (2, 10)
    assert pred_cam.shape == (2, 3)
    assert len(pred_list) == 3

    print("KERNEL_OK")
</pallas_src>

<mosaic_0001>
module attributes {stable_mosaic.version = 11 : i64} {
  func.func @_mm_kernel(%arg0: i32, %arg1: memref<1024x147xbf16, #tpu.memory_space<vmem>>, %arg2: memref<147x128xbf16, #tpu.memory_space<vmem>>, %arg3: memref<1x128xf32, #tpu.memory_space<vmem>>, %arg4: memref<1024x128xbf16, #tpu.memory_space<vmem>>) attributes {dimension_semantics = [#tpu.dimension_semantics<parallel>], iteration_bounds = array<i64: 2>, scalar_prefetch = 0 : i64, scratch_operands = 0 : i64, tpu.core_type = #tpu.core_type<tc>, window_params = [{transform_indices = @transform_0, window_bounds = array<i64: 1024, 147>}, {pipeline_mode = #tpu.pipeline_mode<synchronous>, transform_indices = @transform_1, window_bounds = array<i64: 147, 128>}, {pipeline_mode = #tpu.pipeline_mode<synchronous>, transform_indices = @transform_2, window_bounds = array<i64: 1, 128>}, {transform_indices = @transform_3, window_bounds = array<i64: 1024, 128>}]} {
    %c0 = arith.constant 0 : index
    %c0_0 = arith.constant 0 : index
    %0 = vector.load %arg1[%c0, %c0_0] : memref<1024x147xbf16, #tpu.memory_space<vmem>>, vector<1024x147xbf16>
    %c0_1 = arith.constant 0 : index
    %c0_2 = arith.constant 0 : index
    %1 = vector.load %arg2[%c0_1, %c0_2] : memref<147x128xbf16, #tpu.memory_space<vmem>>, vector<147x128xbf16>
    %cst = arith.constant dense<0.000000e+00> : vector<1024x128xf32>
    %2 = tpu.matmul %0, %1, %cst {dimension_numbers = #tpu.dot_dimension_numbers<[1], [0], [0], [1], [0, 0, 1, 1], [], []>} : vector<1024x147xbf16>, vector<147x128xbf16>, vector<1024x128xf32> -> vector<1024x128xf32>
    %c0_3 = arith.constant 0 : index
    %c0_4 = arith.constant 0 : index
    %3 = vector.load %arg3[%c0_3, %c0_4] : memref<1x128xf32, #tpu.memory_space<vmem>>, vector<1x128xf32>
    %4 = vector.broadcast %3 : vector<1x128xf32> to vector<1024x128xf32>
    %5 = arith.addf %2, %4 : vector<1024x128xf32>
    %cst_5 = arith.constant 0.000000e+00 : f32
    %6 = vector.broadcast %cst_5 : f32 to vector<1024x128xf32>
    %7 = arith.maximumf %5, %6 : vector<1024x128xf32>
    %8 = arith.truncf %7 : vector<1024x128xf32> to vector<1024x128xbf16>
    %c0_6 = arith.constant 0 : index
    %c0_7 = arith.constant 0 : index
    %9 = vector.load %arg4[%c0_6, %c0_7] : memref<1024x128xbf16, #tpu.memory_space<vmem>>, vector<1024x128xbf16>
    tpu.vector_store %arg4[%c0_6, %c0_7], %8 {strides = array<i32>} : memref<1024x128xbf16, #tpu.memory_space<vmem>>, vector<1024x128xbf16>,
    return
  }
  func.func @transform_0(%arg0: i32) -> (i32, i32) {
    %c0_i32 = arith.constant 0 : i32
    %c0_i32_0 = arith.constant 0 : i32
    return %arg0, %c0_i32 : i32, i32
  }
  func.func @transform_1(%arg0: i32) -> (i32, i32) {
    %c0_i32 = arith.constant 0 : i32
    %c0_i32_0 = arith.constant 0 : i32
    %c0_i32_1 = arith.constant 0 : i32
    return %c0_i32, %c0_i32_0 : i32, i32
  }
  func.func @transform_2(%arg0: i32) -> (i32, i32) {
    %c0_i32 = arith.constant 0 : i32
    %c0_i32_0 = arith.constant 0 : i32
    %c0_i32_1 = arith.constant 0 : i32
    return %c0_i32, %c0_i32_0 : i32, i32
  }
  func.func @transform_3(%arg0: i32) -> (i32, i32) {
    %c0_i32 = arith.constant 0 : i32
    %c0_i32_0 = arith.constant 0 : i32
    return %arg0, %c0_i32 : i32, i32
  }
}

module attributes {stable_mosaic.version = 11 : i64} {
  func.func @_mm_kernel(%arg0: i32, %arg1: memref<64x288xbf16, #tpu.memory_space<vmem>>, %arg2: memref<288x128xbf16, #tpu.memory_space<vmem>>, %arg3: memref<1x128xf32, #tpu.memory_space<vmem>>, %arg4: memref<64x128xbf16, #tpu.memory_space<vmem>>) attributes {dimension_semantics = [#tpu.dimension_semantics<parallel>], iteration_bounds = array<i64: 2>, scalar_prefetch = 0 : i64, scratch_operands = 0 : i64, tpu.core_type = #tpu.core_type<tc>, window_params = [{transform_indices = @transform_0, window_bounds = array<i64: 64, 288>}, {pipeline_mode = #tpu.pipeline_mode<synchronous>, transform_indices = @transform_1, window_bounds = array<i64: 288, 128>}, {pipeline_mode = #tpu.pipeline_mode<synchronous>, transform_indices = @transform_2, window_bounds = array<i64: 1, 128>}, {transform_indices = @transform_3, window_bounds = array<i64: 64, 128>}]} {
    %c0 = arith.constant 0 : index
    %c0_0 = arith.constant 0 : index
    %0 = vector.load %arg1[%c0, %c0_0] : memref<64x288xbf16, #tpu.memory_space<vmem>>, vector<64x288xbf16>
    %c0_1 = arith.constant 0 : index
    %c0_2 = arith.constant 0 : index
    %1 = vector.load %arg2[%c0_1, %c0_2] : memref<288x128xbf16, #tpu.memory_space<vmem>>, vector<288x128xbf16>
    %cst = arith.constant dense<0.000000e+00> : vector<64x128xf32>
    %2 = tpu.matmul %0, %1, %cst {dimension_numbers = #tpu.dot_dimension_numbers<[1], [0], [0], [1], [0, 0, 1, 1], [], []>} : vector<64x288xbf16>, vector<288x128xbf16>, vector<64x128xf32> -> vector<64x128xf32>
    %c0_3 = arith.constant 0 : index
    %c0_4 = arith.constant 0 : index
    %3 = vector.load %arg3[%c0_3, %c0_4] : memref<1x128xf32, #tpu.memory_space<vmem>>, vector<1x128xf32>
    %4 = vector.broadcast %3 : vector<1x128xf32> to vector<64x128xf32>
    %5 = arith.addf %2, %4 : vector<64x128xf32>
    %cst_5 = arith.constant 0.000000e+00 : f32
    %6 = vector.broadcast %cst_5 : f32 to vector<64x128xf32>
    %7 = arith.maximumf %5, %6 : vector<64x128xf32>
    %8 = arith.truncf %7 : vector<64x128xf32> to vector<64x128xbf16>
    %c0_6 = arith.constant 0 : index
    %c0_7 = arith.constant 0 : index
    %9 = vector.load %arg4[%c0_6, %c0_7] : memref<64x128xbf16, #tpu.memory_space<vmem>>, vector<64x128xbf16>
    tpu.vector_store %arg4[%c0_6, %c0_7], %8 {strides = array<i32>} : memref<64x128xbf16, #tpu.memory_space<vmem>>, vector<64x128xbf16>,
    return
  }
  func.func @transform_0(%arg0: i32) -> (i32, i32) {
    %c0_i32 = arith.constant 0 : i32
    %c0_i32_0 = arith.constant 0 : i32
    return %arg0, %c0_i32 : i32, i32
  }
  func.func @transform_1(%arg0: i32) -> (i32, i32) {
    %c0_i32 = arith.constant 0 : i32
    %c0_i32_0 = arith.constant 0 : i32
    %c0_i32_1 = arith.constant 0 : i32
    return %c0_i32, %c0_i32_0 : i32, i32
  }
  func.func @transform_2(%arg0: i32) -> (i32, i32) {
    %c0_i32 = arith.constant 0 : i32
    %c0_i32_0 = arith.constant 0 : i32
    %c0_i32_1 = arith.constant 0 : i32
    return %c0_i32, %c0_i32_0 : i32, i32
  }
  func.func @transform_3(%arg0: i32) -> (i32, i32) {
    %c0_i32 = arith.constant 0 : i32
    %c0_i32_0 = arith.constant 0 : i32
    return %arg0, %c0_i32 : i32, i32
  }
}

module attributes {stable_mosaic.version = 11 : i64} {
  func.func @_mm_res_kernel(%arg0: i32, %arg1: memref<64x576xbf16, #tpu.memory_space<vmem>>, %arg2: memref<576x128xbf16, #tpu.memory_space<vmem>>, %arg3: memref<64x32xbf16, #tpu.memory_space<vmem>>, %arg4: memref<32x128xbf16, #tpu.memory_space<vmem>>, %arg5: memref<1x128xf32, #tpu.memory_space<vmem>>, %arg6: memref<64x128xbf16, #tpu.memory_space<vmem>>) attributes {dimension_semantics = [#tpu.dimension_semantics<parallel>], iteration_bounds = array<i64: 2>, scalar_prefetch = 0 : i64, scratch_operands = 0 : i64, tpu.core_type = #tpu.core_type<tc>, window_params = [{transform_indices = @transform_0, window_bounds = array<i64: 64, 576>}, {pipeline_mode = #tpu.pipeline_mode<synchronous>, transform_indices = @transform_1, window_bounds = array<i64: 576, 128>}, {transform_indices = @transform_2, window_bounds = array<i64: 64, 32>}, {pipeline_mode = #tpu.pipeline_mode<synchronous>, transform_indices = @transform_3, window_bounds = array<i64: 32, 128>}, {pipeline_mode = #tpu.pipeline_mode<synchronous>, transform_indices = @transform_4, window_bounds = array<i64: 1, 128>}, {transform_indices = @transform_5, window_bounds = array<i64: 64, 128>}]} {
    %c0 = arith.constant 0 : index
    %c0_0 = arith.constant 0 : index
    %0 = vector.load %arg1[%c0, %c0_0] : memref<64x576xbf16, #tpu.memory_space<vmem>>, vector<64x576xbf16>
    %c0_1 = arith.constant 0 : index
    %c0_2 = arith.constant 0 : index
    %1 = vector.load %arg2[%c0_1, %c0_2] : memref<576x128xbf16, #tpu.memory_space<vmem>>, vector<576x128xbf16>
    %cst = arith.constant dense<0.000000e+00> : vector<64x128xf32>
    %2 = tpu.matmul %0, %1, %cst {dimension_numbers = #tpu.dot_dimension_numbers<[1], [0], [0], [1], [0, 0, 1, 1], [], []>} : vector<64x576xbf16>, vector<576x128xbf16>, vector<64x128xf32> -> vector<64x128xf32>
    %c0_3 = arith.constant 0 : index
    %c0_4 = arith.constant 0 : index
    %3 = vector.load %arg3[%c0_3, %c0_4] : memref<64x32xbf16, #tpu.memory_space<vmem>>, vector<64x32xbf16>
    %c0_5 = arith.constant 0 : index
    %c0_6 = arith.constant 0 : index
    %4 = vector.load %arg4[%c0_5, %c0_6] : memref<32x128xbf16, #tpu.memory_space<vmem>>, vector<32x128xbf16>
    %cst_7 = arith.constant dense<0.000000e+00> : vector<64x128xf32>
    %5 = tpu.matmul %3, %4, %cst_7 {dimension_numbers = #tpu.dot_dimension_numbers<[1], [0], [0], [1], [0, 0, 1, 1], [], []>} : vector<64x32xbf16>, vector<32x128xbf16>, vector<64x128xf32> -> vector<64x128xf32>
    %6 = arith.addf %2, %5 : vector<64x128xf32>
    %c0_8 = arith.constant 0 : index
    %c0_9 = arith.constant 0 : index
    %7 = vector.load %arg5[%c0_8, %c0_9] : memref<1x128xf32, #tpu.memory_space<vmem>>, vector<1x128xf32>
    %8 = vector.broadcast %7 : vector<1x128xf32> to vector<64x128xf32>
    %9 = arith.addf %6, %8 : vector<64x128xf32>
    %cst_10 = arith.constant 0.000000e+00 : f32
    %10 = vector.broadcast %cst_10 : f32 to vector<64x128xf32>
    %11 = arith.maximumf %9, %10 : vector<64x128xf32>
    %12 = arith.truncf %11 : vector<64x128xf32> to vector<64x128xbf16>
    %c0_11 = arith.constant 0 : index
    %c0_12 = arith.constant 0 : index
    %13 = vector.load %arg6[%c0_11, %c0_12] : memref<64x128xbf16, #tpu.memory_space<vmem>>, vector<64x128xbf16>
    tpu.vector_store %arg6[%c0_11, %c0_12], %12 {strides = array<i32>} : memref<64x128xbf16, #tpu.memory_space<vmem>>, vector<64x128xbf16>,
    return
  }
  func.func @transform_0(%arg0: i32) -> (i32, i32) {
    %c0_i32 = arith.constant 0 : i32
    %c0_i32_0 = arith.constant 0 : i32
    return %arg0, %c0_i32 : i32, i32
  }
  func.func @transform_1(%arg0: i32) -> (i32, i32) {
    %c0_i32 = arith.constant 0 : i32
    %c0_i32_0 = arith.constant 0 : i32
    %c0_i32_1 = arith.constant 0 : i32
    return %c0_i32, %c0_i32_0 : i32, i32
  }
  func.func @transform_2(%arg0: i32) -> (i32, i32) {
    %c0_i32 = arith.constant 0 : i32
    %c0_i32_0 = arith.constant 0 : i32
    return %arg0, %c0_i32 : i32, i32
  }
  func.func @transform_3(%arg0: i32) -> (i32, i32) {
    %c0_i32 = arith.constant 0 : i32
    %c0_i32_0 = arith.constant 0 : i32
    %c0_i32_1 = arith.constant 0 : i32
    return %c0_i32, %c0_i32_0 : i32, i32
  }
  func.func @transform_4(%arg0: i32) -> (i32, i32) {
    %c0_i32 = arith.constant 0 : i32
    %c0_i32_0 = arith.constant 0 : i32
    %c0_i32_1 = arith.constant 0 : i32
    return %c0_i32, %c0_i32_0 : i32, i32
  }
  func.func @transform_5(%arg0: i32) -> (i32, i32) {
    %c0_i32 = arith.constant 0 : i32
    %c0_i32_0 = arith.constant 0 : i32
    return %arg0, %c0_i32 : i32, i32
  }
}

module attributes {stable_mosaic.version = 11 : i64} {
  func.func @_mm_kernel(%arg0: i32, %arg1: memref<16x576xbf16, #tpu.memory_space<vmem>>, %arg2: memref<576x128xbf16, #tpu.memory_space<vmem>>, %arg3: memref<1x128xf32, #tpu.memory_space<vmem>>, %arg4: memref<16x128xbf16, #tpu.memory_space<vmem>>) attributes {dimension_semantics = [#tpu.dimension_semantics<parallel>], iteration_bounds = array<i64: 2>, scalar_prefetch = 0 : i64, scratch_operands = 0 : i64, tpu.core_type = #tpu.core_type<tc>, window_params = [{transform_indices = @transform_0, window_bounds = array<i64: 16, 576>}, {pipeline_mode = #tpu.pipeline_mode<synchronous>, transform_indices = @transform_1, window_bounds = array<i64: 576, 128>}, {pipeline_mode = #tpu.pipeline_mode<synchronous>, transform_indices = @transform_2, window_bounds = array<i64: 1, 128>}, {transform_indices = @transform_3, window_bounds = array<i64: 16, 128>}]} {
    %c0 = arith.constant 0 : index
    %c0_0 = arith.constant 0 : index
    %0 = vector.load %arg1[%c0, %c0_0] : memref<16x576xbf16, #tpu.memory_space<vmem>>, vector<16x576xbf16>
    %c0_1 = arith.constant 0 : index
    %c0_2 = arith.constant 0 : index
    %1 = vector.load %arg2[%c0_1, %c0_2] : memref<576x128xbf16, #tpu.memory_space<vmem>>, vector<576x128xbf16>
    %cst = arith.constant dense<0.000000e+00> : vector<16x128xf32>
    %2 = tpu.matmul %0, %1, %cst {dimension_numbers = #tpu.dot_dimension_numbers<[1], [0], [0], [1], [0, 0, 1, 1], [], []>} : vector<16x576xbf16>, vector<576x128xbf16>, vector<16x128xf32> -> vector<16x128xf32>
    %c0_3 = arith.constant 0 : index
    %c0_4 = arith.constant 0 : index
    %3 = vector.load %arg3[%c0_3, %c0_4] : memref<1x128xf32, #tpu.memory_space<vmem>>, vector<1x128xf32>
    %4 = vector.broadcast %3 : vector<1x128xf32> to vector<16x128xf32>
    %5 = arith.addf %2, %4 : vector<16x128xf32>
    %cst_5 = arith.constant 0.000000e+00 : f32
    %6 = vector.broadcast %cst_5 : f32 to vector<16x128xf32>
    %7 = arith.maximumf %5, %6 : vector<16x128xf32>
    %8 = arith.truncf %7 : vector<16x128xf32> to vector<16x128xbf16>
    %c0_6 = arith.constant 0 : index
    %c0_7 = arith.constant 0 : index
    %9 = vector.load %arg4[%c0_6, %c0_7] : memref<16x128xbf16, #tpu.memory_space<vmem>>, vector<16x128xbf16>
    tpu.vector_store %arg4[%c0_6, %c0_7], %8 {strides = array<i32>} : memref<16x128xbf16, #tpu.memory_space<vmem>>, vector<16x128xbf16>,
    return
  }
  func.func @transform_0(%arg0: i32) -> (i32, i32) {
    %c0_i32 = arith.constant 0 : i32
    %c0_i32_0 = arith.constant 0 : i32
    return %arg0, %c0_i32 : i32, i32
  }
  func.func @transform_1(%arg0: i32) -> (i32, i32) {
    %c0_i32 = arith.constant 0 : i32
    %c0_i32_0 = arith.constant 0 : i32
    %c0_i32_1 = arith.constant 0 : i32
    return %c0_i32, %c0_i32_0 : i32, i32
  }
  func.func @transform_2(%arg0: i32) -> (i32, i32) {
    %c0_i32 = arith.constant 0 : i32
    %c0_i32_0 = arith.constant 0 : i32
    %c0_i32_1 = arith.constant 0 : i32
    return %c0_i32, %c0_i32_0 : i32, i32
  }
  func.func @transform_3(%arg0: i32) -> (i32, i32) {
    %c0_i32 = arith.constant 0 : i32
    %c0_i32_0 = arith.constant 0 : i32
    return %arg0, %c0_i32 : i32, i32
  }
}

module attributes {stable_mosaic.version = 11 : i64} {
  func.func @_mm_res_kernel(%arg0: i32, %arg1: memref<16x1152xbf16, #tpu.memory_space<vmem>>, %arg2: memref<1152x128xbf16, #tpu.memory_space<vmem>>, %arg3: memref<16x64xbf16, #tpu.memory_space<vmem>>, %arg4: memref<64x128xbf16, #tpu.memory_space<vmem>>, %arg5: memref<1x128xf32, #tpu.memory_space<vmem>>, %arg6: memref<16x128xbf16, #tpu.memory_space<vmem>>) attributes {dimension_semantics = [#tpu.dimension_semantics<parallel>], iteration_bounds = array<i64: 2>, scalar_prefetch = 0 : i64, scratch_operands = 0 : i64, tpu.core_type = #tpu.core_type<tc>, window_params = [{transform_indices = @transform_0, window_bounds = array<i64: 16, 1152>}, {pipeline_mode = #tpu.pipeline_mode<synchronous>, transform_indices = @transform_1, window_bounds = array<i64: 1152, 128>}, {transform_indices = @transform_2, window_bounds = array<i64: 16, 64>}, {pipeline_mode = #tpu.pipeline_mode<synchronous>, transform_indices = @transform_3, window_bounds = array<i64: 64, 128>}, {pipeline_mode = #tpu.pipeline_mode<synchronous>, transform_indices = @transform_4, window_bounds = array<i64: 1, 128>}, {transform_indices = @transform_5, window_bounds = array<i64: 16, 128>}]} {
    %c0 = arith.constant 0 : index
    %c0_0 = arith.constant 0 : index
    %0 = vector.load %arg1[%c0, %c0_0] : memref<16x1152xbf16, #tpu.memory_space<vmem>>, vector<16x1152xbf16>
    %c0_1 = arith.constant 0 : index
    %c0_2 = arith.constant 0 : index
    %1 = vector.load %arg2[%c0_1, %c0_2] : memref<1152x128xbf16, #tpu.memory_space<vmem>>, vector<1152x128xbf16>
    %cst = arith.constant dense<0.000000e+00> : vector<16x128xf32>
    %2 = tpu.matmul %0, %1, %cst {dimension_numbers = #tpu.dot_dimension_numbers<[1], [0], [0], [1], [0, 0, 1, 1], [], []>} : vector<16x1152xbf16>, vector<1152x128xbf16>, vector<16x128xf32> -> vector<16x128xf32>
    %c0_3 = arith.constant 0 : index
    %c0_4 = arith.constant 0 : index
    %3 = vector.load %arg3[%c0_3, %c0_4] : memref<16x64xbf16, #tpu.memory_space<vmem>>, vector<16x64xbf16>
    %c0_5 = arith.constant 0 : index
    %c0_6 = arith.constant 0 : index
    %4 = vector.load %arg4[%c0_5, %c0_6] : memref<64x128xbf16, #tpu.memory_space<vmem>>, vector<64x128xbf16>
    %cst_7 = arith.constant dense<0.000000e+00> : vector<16x128xf32>
    %5 = tpu.matmul %3, %4, %cst_7 {dimension_numbers = #tpu.dot_dimension_numbers<[1], [0], [0], [1], [0, 0, 1, 1], [], []>} : vector<16x64xbf16>, vector<64x128xbf16>, vector<16x128xf32> -> vector<16x128xf32>
    %6 = arith.addf %2, %5 : vector<16x128xf32>
    %c0_8 = arith.constant 0 : index
    %c0_9 = arith.constant 0 : index
    %7 = vector.load %arg5[%c0_8, %c0_9] : memref<1x128xf32, #tpu.memory_space<vmem>>, vector<1x128xf32>
    %8 = vector.broadcast %7 : vector<1x128xf32> to vector<16x128xf32>
    %9 = arith.addf %6, %8 : vector<16x128xf32>
    %cst_10 = arith.constant 0.000000e+00 : f32
    %10 = vector.broadcast %cst_10 : f32 to vector<16x128xf32>
    %11 = arith.maximumf %9, %10 : vector<16x128xf32>
    %12 = arith.truncf %11 : vector<16x128xf32> to vector<16x128xbf16>
    %c0_11 = arith.constant 0 : index
    %c0_12 = arith.constant 0 : index
    %13 = vector.load %arg6[%c0_11, %c0_12] : memref<16x128xbf16, #tpu.memory_space<vmem>>, vector<16x128xbf16>
    tpu.vector_store %arg6[%c0_11, %c0_12], %12 {strides = array<i32>} : memref<16x128xbf16, #tpu.memory_space<vmem>>, vector<16x128xbf16>,
    return
  }
  func.func @transform_0(%arg0: i32) -> (i32, i32) {
    %c0_i32 = arith.constant 0 : i32
    %c0_i32_0 = arith.constant 0 : i32
    return %arg0, %c0_i32 : i32, i32
  }
  func.func @transform_1(%arg0: i32) -> (i32, i32) {
    %c0_i32 = arith.constant 0 : i32
    %c0_i32_0 = arith.constant 0 : i32
    %c0_i32_1 = arith.constant 0 : i32
    return %c0_i32, %c0_i32_0 : i32, i32
  }
  func.func @transform_2(%arg0: i32) -> (i32, i32) {
    %c0_i32 = arith.constant 0 : i32
    %c0_i32_0 = arith.constant 0 : i32
    return %arg0, %c0_i32 : i32, i32
  }
  func.func @transform_3(%arg0: i32) -> (i32, i32) {
    %c0_i32 = arith.constant 0 : i32
    %c0_i32_0 = arith.constant 0 : i32
    %c0_i32_1 = arith.constant 0 : i32
    return %c0_i32, %c0_i32_0 : i32, i32
  }
  func.func @transform_4(%arg0: i32) -> (i32, i32) {
    %c0_i32 = arith.constant 0 : i32
    %c0_i32_0 = arith.constant 0 : i32
    %c0_i32_1 = arith.constant 0 : i32
    return %c0_i32, %c0_i32_0 : i32, i32
  }
  func.func @transform_5(%arg0: i32) -> (i32, i32) {
    %c0_i32 = arith.constant 0 : i32
    %c0_i32_0 = arith.constant 0 : i32
    return %arg0, %c0_i32 : i32, i32
  }
}

module attributes {stable_mosaic.version = 11 : i64} {
  func.func @_smpl_head_kernel(%arg0: memref<2x16x128xbf16, #tpu.memory_space<vmem>>, %arg1: memref<128x256xbf16, #tpu.memory_space<vmem>>, %arg2: memref<512x256xbf16, #tpu.memory_space<vmem>>, %arg3: memref<1x256xf32, #tpu.memory_space<vmem>>, %arg4: memref<256x256xbf16, #tpu.memory_space<vmem>>, %arg5: memref<1x256xf32, #tpu.memory_space<vmem>>, %arg6: memref<256x512xbf16, #tpu.memory_space<vmem>>, %arg7: memref<1x512xf32, #tpu.memory_space<vmem>>, %arg8: memref<2x512xf32, #tpu.memory_space<vmem>>, %arg9: memref<3x2x512xf32, #tpu.memory_space<vmem>>) attributes {dimension_semantics = [], scalar_prefetch = 0 : i64, scratch_operands = 0 : i64, tpu.core_type = #tpu.core_type<tc>} {
    %c0 = arith.constant 0 : index
    %c0_0 = arith.constant 0 : index
    %c0_1 = arith.constant 0 : index
    %0 = vector.load %arg0[%c0, %c0_0, %c0_1] : memref<2x16x128xbf16, #tpu.memory_space<vmem>>, vector<2x16x128xbf16>
    %1 = arith.extf %0 : vector<2x16x128xbf16> to vector<2x16x128xf32>
    %cst = arith.constant dense<0.000000e+00> : vector<2x128xf32>
    %2 = vector.multi_reduction <add>, %1, %cst [1] : vector<2x16x128xf32> to vector<2x128xf32>
    %cst_2 = arith.constant 1.600000e+01 : f32
    %3 = vector.broadcast %cst_2 : f32 to vector<2x128xf32>
    %4 = arith.divf %2, %3 : vector<2x128xf32>
    %5 = arith.truncf %4 : vector<2x128xf32> to vector<2x128xbf16>
    %c0_3 = arith.constant 0 : index
    %c0_4 = arith.constant 0 : index
    %6 = vector.load %arg1[%c0_3, %c0_4] : memref<128x256xbf16, #tpu.memory_space<vmem>>, vector<128x256xbf16>
    %cst_5 = arith.constant dense<0.000000e+00> : vector<2x256xf32>
    %7 = tpu.matmul %5, %6, %cst_5 {dimension_numbers = #tpu.dot_dimension_numbers<[1], [0], [0], [1], [0, 0, 1, 1], [], []>} : vector<2x128xbf16>, vector<128x256xbf16>, vector<2x256xf32> -> vector<2x256xf32>
    %c0_6 = arith.constant 0 : index
    %c0_7 = arith.constant 0 : index
    %8 = vector.load %arg3[%c0_6, %c0_7] : memref<1x256xf32, #tpu.memory_space<vmem>>, vector<1x256xf32>
    %9 = vector.broadcast %8 : vector<1x256xf32> to vector<2x256xf32>
    %10 = arith.addf %7, %9 : vector<2x256xf32>
    %c0_8 = arith.constant 0 : index
    %c0_9 = arith.constant 0 : index
    %11 = vector.load %arg8[%c0_8, %c0_9] : memref<2x512xf32, #tpu.memory_space<vmem>>, vector<2x512xf32>
    %12 = arith.truncf %11 : vector<2x512xf32> to vector<2x512xbf16>
    %c0_10 = arith.constant 0 : index
    %c0_11 = arith.constant 0 : index
    %13 = vector.load %arg2[%c0_10, %c0_11] : memref<512x256xbf16, #tpu.memory_space<vmem>>, vector<512x256xbf16>
    %cst_12 = arith.constant dense<0.000000e+00> : vector<2x256xf32>
    %14 = tpu.matmul %12, %13, %cst_12 {dimension_numbers = #tpu.dot_dimension_numbers<[1], [0], [0], [1], [0, 0, 1, 1], [], []>} : vector<2x512xbf16>, vector<512x256xbf16>, vector<2x256xf32> -> vector<2x256xf32>
    %15 = arith.addf %10, %14 : vector<2x256xf32>
    %cst_13 = arith.constant 0.000000e+00 : f32
    %16 = vector.broadcast %cst_13 : f32 to vector<2x256xf32>
    %17 = arith.maximumf %15, %16 : vector<2x256xf32>
    %18 = arith.truncf %17 : vector<2x256xf32> to vector<2x256xbf16>
    %c0_14 = arith.constant 0 : index
    %c0_15 = arith.constant 0 : index
    %19 = vector.load %arg4[%c0_14, %c0_15] : memref<256x256xbf16, #tpu.memory_space<vmem>>, vector<256x256xbf16>
    %cst_16 = arith.constant dense<0.000000e+00> : vector<2x256xf32>
    %20 = tpu.matmul %18, %19, %cst_16 {dimension_numbers = #tpu.dot_dimension_numbers<[1], [0], [0], [1], [0, 0, 1, 1], [], []>} : vector<2x256xbf16>, vector<256x256xbf16>, vector<2x256xf32> -> vector<2x256xf32>
    %c0_17 = arith.constant 0 : index
    %c0_18 = arith.constant 0 : index
    %21 = vector.load %arg5[%c0_17, %c0_18] : memref<1x256xf32, #tpu.memory_space<vmem>>, vector<1x256xf32>
    %22 = vector.broadcast %21 : vector<1x256xf32> to vector<2x256xf32>
    %23 = arith.addf %20, %22 : vector<2x256xf32>
    %cst_19 = arith.constant 0.000000e+00 : f32
    %24 = vector.broadcast %cst_19 : f32 to vector<2x256xf32>
    %25 = arith.maximumf %23, %24 : vector<2x256xf32>
    %26 = arith.truncf %25 : vector<2x256xf32> to vector<2x256xbf16>
    %c0_20 = arith.constant 0 : index
    %c0_21 = arith.constant 0 : index
    %27 = vector.load %arg6[%c0_20, %c0_21] : memref<256x512xbf16, #tpu.memory_space<vmem>>, vector<256x512xbf16>
    %cst_22 = arith.constant dense<0.000000e+00> : vector<2x512xf32>
    %28 = tpu.matmul %26, %27, %cst_22 {dimension_numbers = #tpu.dot_dimension_numbers<[1], [0], [0], [1], [0, 0, 1, 1], [], []>} : vector<2x256xbf16>, vector<256x512xbf16>, vector<2x512xf32> -> vector<2x512xf32>
    %29 = arith.addf %11, %28 : vector<2x512xf32>
    %c0_23 = arith.constant 0 : index
    %c0_24 = arith.constant 0 : index
    %30 = vector.load %arg7[%c0_23, %c0_24] : memref<1x512xf32, #tpu.memory_space<vmem>>, vector<1x512xf32>
    %31 = vector.broadcast %30 : vector<1x512xf32> to vector<2x512xf32>
    %32 = arith.addf %29, %31 : vector<2x512xf32>
    %c0_25 = arith.constant 0 : index
    %c0_26 = arith.constant 0 : index
    %c0_27 = arith.constant 0 : index
    %33 = vector.load %arg9[%c0_25, %c0_26, %c0_27] : memref<3x2x512xf32, #tpu.memory_space<vmem>>, vector<1x2x512xf32>
    %34 = vector.shape_cast %33 : vector<1x2x512xf32> to vector<2x512xf32>
    %35 = vector.shape_cast %32 : vector<2x512xf32> to vector<1x2x512xf32>
    tpu.vector_store %arg9[%c0_25, %c0_26, %c0_27], %35 {strides = array<i32>} : memref<3x2x512xf32, #tpu.memory_space<vmem>>, vector<1x2x512xf32>,
    %36 = arith.truncf %32 : vector<2x512xf32> to vector<2x512xbf16>
    %c0_28 = arith.constant 0 : index
    %c0_29 = arith.constant 0 : index
    %37 = vector.load %arg2[%c0_28, %c0_29] : memref<512x256xbf16, #tpu.memory_space<vmem>>, vector<512x256xbf16>
    %cst_30 = arith.constant dense<0.000000e+00> : vector<2x256xf32>
    %38 = tpu.matmul %36, %37, %cst_30 {dimension_numbers = #tpu.dot_dimension_numbers<[1], [0], [0], [1], [0, 0, 1, 1], [], []>} : vector<2x512xbf16>, vector<512x256xbf16>, vector<2x256xf32> -> vector<2x256xf32>
    %39 = arith.addf %10, %38 : vector<2x256xf32>
    %cst_31 = arith.constant 0.000000e+00 : f32
    %40 = vector.broadcast %cst_31 : f32 to vector<2x256xf32>
    %41 = arith.maximumf %39, %40 : vector<2x256xf32>
    %42 = arith.truncf %41 : vector<2x256xf32> to vector<2x256xbf16>
    %c0_32 = arith.constant 0 : index
    %c0_33 = arith.constant 0 : index
    %43 = vector.load %arg4[%c0_32, %c0_33] : memref<256x256xbf16, #tpu.memory_space<vmem>>, vector<256x256xbf16>
    %cst_34 = arith.constant dense<0.000000e+00> : vector<2x256xf32>
    %44 = tpu.matmul %42, %43, %cst_34 {dimension_numbers = #tpu.dot_dimension_numbers<[1], [0], [0], [1], [0, 0, 1, 1], [], []>} : vector<2x256xbf16>, vector<256x256xbf16>, vector<2x256xf32> -> vector<2x256xf32>
    %c0_35 = arith.constant 0 : index
    %c0_36 = arith.constant 0 : index
    %45 = vector.load %arg5[%c0_35, %c0_36] : memref<1x256xf32, #tpu.memory_space<vmem>>, vector<1x256xf32>
    %46 = vector.broadcast %45 : vector<1x256xf32> to vector<2x256xf32>
    %47 = arith.addf %44, %46 : vector<2x256xf32>
    %cst_37 = arith.constant 0.000000e+00 : f32
    %48 = vector.broadcast %cst_37 : f32 to vector<2x256xf32>
    %49 = arith.maximumf %47, %48 : vector<2x256xf32>
    %50 = arith.truncf %49 : vector<2x256xf32> to vector<2x256xbf16>
    %c0_38 = arith.constant 0 : index
    %c0_39 = arith.constant 0 : index
    %51 = vector.load %arg6[%c0_38, %c0_39] : memref<256x512xbf16, #tpu.memory_space<vmem>>, vector<256x512xbf16>
    %cst_40 = arith.constant dense<0.000000e+00> : vector<2x512xf32>
    %52 = tpu.matmul %50, %51, %cst_40 {dimension_numbers = #tpu.dot_dimension_numbers<[1], [0], [0], [1], [0, 0, 1, 1], [], []>} : vector<2x256xbf16>, vector<256x512xbf16>, vector<2x512xf32> -> vector<2x512xf32>
    %53 = arith.addf %32, %52 : vector<2x512xf32>
    %c0_41 = arith.constant 0 : index
    %c0_42 = arith.constant 0 : index
    %54 = vector.load %arg7[%c0_41, %c0_42] : memref<1x512xf32, #tpu.memory_space<vmem>>, vector<1x512xf32>
    %55 = vector.broadcast %54 : vector<1x512xf32> to vector<2x512xf32>
    %56 = arith.addf %53, %55 : vector<2x512xf32>
    %c1 = arith.constant 1 : index
    %c0_43 = arith.constant 0 : index
    %c0_44 = arith.constant 0 : index
    %57 = vector.load %arg9[%c1, %c0_43, %c0_44] : memref<3x2x512xf32, #tpu.memory_space<vmem>>, vector<1x2x512xf32>
    %58 = vector.shape_cast %57 : vector<1x2x512xf32> to vector<2x512xf32>
    %59 = vector.shape_cast %56 : vector<2x512xf32> to vector<1x2x512xf32>
    tpu.vector_store %arg9[%c1, %c0_43, %c0_44], %59 {strides = array<i32>} : memref<3x2x512xf32, #tpu.memory_space<vmem>>, vector<1x2x512xf32>,
    %60 = arith.truncf %56 : vector<2x512xf32> to vector<2x512xbf16>
    %c0_45 = arith.constant 0 : index
    %c0_46 = arith.constant 0 : index
    %61 = vector.load %arg2[%c0_45, %c0_46] : memref<512x256xbf16, #tpu.memory_space<vmem>>, vector<512x256xbf16>
    %cst_47 = arith.constant dense<0.000000e+00> : vector<2x256xf32>
    %62 = tpu.matmul %60, %61, %cst_47 {dimension_numbers = #tpu.dot_dimension_numbers<[1], [0], [0], [1], [0, 0, 1, 1], [], []>} : vector<2x512xbf16>, vector<512x256xbf16>, vector<2x256xf32> -> vector<2x256xf32>
    %63 = arith.addf %10, %62 : vector<2x256xf32>
    %cst_48 = arith.constant 0.000000e+00 : f32
    %64 = vector.broadcast %cst_48 : f32 to vector<2x256xf32>
    %65 = arith.maximumf %63, %64 : vector<2x256xf32>
    %66 = arith.truncf %65 : vector<2x256xf32> to vector<2x256xbf16>
    %c0_49 = arith.constant 0 : index
    %c0_50 = arith.constant 0 : index
    %67 = vector.load %arg4[%c0_49, %c0_50] : memref<256x256xbf16, #tpu.memory_space<vmem>>, vector<256x256xbf16>
    %cst_51 = arith.constant dense<0.000000e+00> : vector<2x256xf32>
    %68 = tpu.matmul %66, %67, %cst_51 {dimension_numbers = #tpu.dot_dimension_numbers<[1], [0], [0], [1], [0, 0, 1, 1], [], []>} : vector<2x256xbf16>, vector<256x256xbf16>, vector<2x256xf32> -> vector<2x256xf32>
    %c0_52 = arith.constant 0 : index
    %c0_53 = arith.constant 0 : index
    %69 = vector.load %arg5[%c0_52, %c0_53] : memref<1x256xf32, #tpu.memory_space<vmem>>, vector<1x256xf32>
    %70 = vector.broadcast %69 : vector<1x256xf32> to vector<2x256xf32>
    %71 = arith.addf %68, %70 : vector<2x256xf32>
    %cst_54 = arith.constant 0.000000e+00 : f32
    %72 = vector.broadcast %cst_54 : f32 to vector<2x256xf32>
    %73 = arith.maximumf %71, %72 : vector<2x256xf32>
    %74 = arith.truncf %73 : vector<2x256xf32> to vector<2x256xbf16>
    %c0_55 = arith.constant 0 : index
    %c0_56 = arith.constant 0 : index
    %75 = vector.load %arg6[%c0_55, %c0_56] : memref<256x512xbf16, #tpu.memory_space<vmem>>, vector<256x512xbf16>
    %cst_57 = arith.constant dense<0.000000e+00> : vector<2x512xf32>
    %76 = tpu.matmul %74, %75, %cst_57 {dimension_numbers = #tpu.dot_dimension_numbers<[1], [0], [0], [1], [0, 0, 1, 1], [], []>} : vector<2x256xbf16>, vector<256x512xbf16>, vector<2x512xf32> -> vector<2x512xf32>
    %77 = arith.addf %56, %76 : vector<2x512xf32>
    %c0_58 = arith.constant 0 : index
    %c0_59 = arith.constant 0 : index
    %78 = vector.load %arg7[%c0_58, %c0_59] : memref<1x512xf32, #tpu.memory_space<vmem>>, vector<1x512xf32>
    %79 = vector.broadcast %78 : vector<1x512xf32> to vector<2x512xf32>
    %80 = arith.addf %77, %79 : vector<2x512xf32>
    %c2 = arith.constant 2 : index
    %c0_60 = arith.constant 0 : index
    %c0_61 = arith.constant 0 : index
    %81 = vector.load %arg9[%c2, %c0_60, %c0_61] : memref<3x2x512xf32, #tpu.memory_space<vmem>>, vector<1x2x512xf32>
    %82 = vector.shape_cast %81 : vector<1x2x512xf32> to vector<2x512xf32>
    %83 = vector.shape_cast %80 : vector<2x512xf32> to vector<1x2x512xf32>
    tpu.vector_store %arg9[%c2, %c0_60, %c0_61], %83 {strides = array<i32>} : memref<3x2x512xf32, #tpu.memory_space<vmem>>, vector<1x2x512xf32>,
    return
  }
}

</mosaic_0001>

<bundles_post_ra>
// kernel: base_model_forward.6
= control target key start
LH: loop header
LB: loop body
LE: loop exit
PB: predicated region body
PF: predicated region fallthrough
CT: control target
= control target key end

     0   :  { %s3652_s12 = smov 0   ;;  %s4101_s0 = inlined_call_operand.vmem [shape: bf16[2048,147], index: 0, kind: input, shape index: {}]   ;;  %s4102_s1 = inlined_call_operand.vmem [shape: bf16[147,128], index: 1, kind: input, shape index: {}]   ;;  %s4103_s2 = inlined_call_operand.vmem [shape: f32[1,128], index: 2, kind: input, shape index: {}]   ;;  %s4104_s3 = inlined_call_operand.vmem [shape: bf16[2048,128], index: 3, kind: output, shape index: {}]  }
   0x1 LB: > { %s2534_s13 = sadd.s32 4294967295, %s3628_s12   ;;  %p2538_p0 = scmp.ge.s32.totalorder %s3628_s12, 1  ;;  %s3628_s12 = sphi %s3652_s12, %s13_s12  }
   0x2   : > { %p139_p1 = scmp.lt.s32.totalorder %s3628_s12, 3 }
   0x4   : > { %p140_p2 = pnand %p2538_p0, %p139_p1 }
   0x5   : > { %v3419_v0 = vld [vmem:[%s4102_s1] sm:$0xff] (!%p140_p2)   ;;  %v3630_v1 = vmov (!%p140_p2), 0   ;;  %v3420_v2 = vld [vmem:[%s4102_s1 + $0x8] sm:$0xff] (!%p140_p2)   ;;  %v3421_v3 = vld [vmem:[%s4102_s1 + $0x10] sm:$0xff] (!%p140_p2)   ;;  %s2539_s20 = sshll.u32 (!%p140_p2), %s2534_s13, 7  ;;  %vm965_vm0 = vcmask (!%p140_p2), 154624  }
   0x6   : > { %143 = sbr.rel (%p140_p2) target bundleno = 515 (0x203), region = 32  ;;  %1165 = vmatprep.subr.bf16.mxu0 (!%p140_p2), %v3630_v1  ;;  %3389 = vmatprep.subr.bf16.mxu1 (!%p140_p2), %v3630_v1  ;;  %p165_p3 = scmp.lt.s32.totalorder (!%p140_p2), %s2539_s20, 255  ;;  %v3422_v4 = vld [vmem:[%s4102_s1 + $0x18] sm:$0xff] (!%p140_p2)   ;;  %v3423_v5 = vld [vmem:[%s4102_s1 + $0x20] sm:$0xff] (!%p140_p2)   ;;  %v3424_v8 = vld [vmem:[%s4102_s1 + $0x28] sm:$0xff] (!%p140_p2)   ;;  %vm1158_vm1 = vcmask (!%p140_p2), 1040384  }
   0x7   : > { %1166 = vmatpush1.bf16.msra.mxu0 (!%p140_p2), %v3419_v0  ;;  %3399 = vmatpush1.bf16.msra.mxu1 (!%p140_p2), %v3419_v0  ;;  %v3425_v9 = vld [vmem:[%s4102_s1 + $0x30] sm:$0xff] (!%p140_p2)   ;;  %v3426_v10 = vld [vmem:[%s4102_s1 + $0x38] sm:$0xff] (!%p140_p2)   ;;  %vm1159_vm2 = vcmask (!%p140_p2), 1041408   ;;  %v3631_v11 = vmov (!%p140_p2), 65535   ;;  %v3427_v13 = vld [vmem:[%s4102_s1 + $0x40] sm:$0xff] (!%p140_p2)  }
   0x8   : > { %1167 = vmatprep.subr.bf16.mxu0 (!%p140_p2), %v3630_v1  ;;  %3390 = vmatprep.subr.bf16.mxu1 (!%p140_p2), %v3630_v1  ;;  %v1160_v12 = vsel (!%p140_p2), %vm1158_vm1, 4294967295, %v3631_v11  ;;  %v3428_v14 = vld [vmem:[%s4102_s1 + $0x48] ss:$0 sps:$4 sm:$0x33] (!%p140_p2)  }
   0x9   : > { %v1161_v15 = vsel (!%p140_p2), %vm1159_vm2, %v1160_v12, 0 }
   0xa   : > { %v1163_v16 = vand.u32 (!%p140_p2), %v3428_v14, %v1161_v15 }
   0xb   : > { %1168 = vmatpush1.bf16.msra.mxu0 (!%p140_p2), %v3420_v2  ;;  %3400 = vmatpush1.bf16.msra.mxu1 (!%p140_p2), %v3420_v2 }
   0xc   : > { %1169 = vmatprep.subr.bf16.mxu0 (!%p140_p2), %v3630_v1  ;;  %3391 = vmatprep.subr.bf16.mxu1 (!%p140_p2), %v3630_v1 }
   0xd   : > { %s4106_s20 = smov (!%p165_p3, %s2539_s20), 255 }
   0xe   : > { %s2877_s23 = sshll.u32 %s4106_s20, 3  ;;  %s2543_s15 = sshll.u32 %s4106_s20, 2 }
   0xf   : > { %1170 = vmatpush1.bf16.msra.mxu0 %v3421_v3  ;;  %3401 = vmatpush1.bf16.msra.mxu1 %v3421_v3  ;;  %s3678_s26 = scalar_lea.vmem %s4101_s0, %s2877_s23  ;;  %s3881_s18 = scalar_lea.vmem %s4104_s3, %s2543_s15 }
  0x10   : > { %1171 = vmatprep.subr.bf16.mxu0 %v3630_v1  ;;  %3392 = vmatprep.subr.bf16.mxu1 %v3630_v1  ;;  %v3431_v6 = vld [vmem:[%s3678_s26 + $0x4] ss:$8 sps:$4 sm:$0xff]   ;;  %v3429_v17 = vld [vmem:[%s3678_s26] ss:$8 sps:$4 sm:$0xff]   ;;  %v3435_v19 = vld [vmem:[%s3678_s26 + $0x14] ss:$8 sps:$4 sm:$0xff]  }
  0x11   : > { %v3434_v7 = vld [vmem:[%s3678_s26 + $0x204] ss:$8 sps:$4 sm:$0xff]   ;;  %2683 = vmatprep.mubr.msk.bf16.mxu0 %vm965_vm0, %v3431_v6  ;;  %v3432_v18 = vld [vmem:[%s3678_s26 + $0x200] ss:$8 sps:$4 sm:$0xff]   ;;  %v3437_v20 = vld [vmem:[%s3678_s26 + $0x214] ss:$8 sps:$4 sm:$0xff]  }
  0x12   : > { %2715 = vmatprep.mubr.msk.bf16.mxu1 %vm965_vm0, %v3434_v7  ;;  %v3439_v21 = vld [vmem:[%s3678_s26 + $0x10] ss:$8 sps:$4 sm:$0xff]   ;;  %v3441_v23 = vld [vmem:[%s3678_s26 + $0x24] ss:$8 sps:$4 sm:$0xff]   ;;  %v3445_v25 = vld [vmem:[%s3678_s26 + $0x20] ss:$8 sps:$4 sm:$0xff]  }
  0x13   : > { %1172 = vmatpush1.bf16.msra.mxu0 %v3422_v4  ;;  %3402 = vmatpush1.bf16.msra.mxu1 %v3422_v4  ;;  %v3440_v22 = vld [vmem:[%s3678_s26 + $0x210] ss:$8 sps:$4 sm:$0xff]   ;;  %v3443_v24 = vld [vmem:[%s3678_s26 + $0x224] ss:$8 sps:$4 sm:$0xff]   ;;  %v3446_v26 = vld [vmem:[%s3678_s26 + $0x220] ss:$8 sps:$4 sm:$0xff]  }
  0x14   : > { %1173 = vmatprep.subr.bf16.mxu0 %v3630_v1  ;;  %3393 = vmatprep.subr.bf16.mxu1 %v3630_v1  ;;  %v3447_v27 = vld [vmem:[%s3678_s26 + $0x34] ss:$8 sps:$4 sm:$0xff]   ;;  %v3451_v29 = vld [vmem:[%s3678_s26 + $0x30] ss:$8 sps:$4 sm:$0xff]   ;;  %v3453_v31 = vld [vmem:[%s3678_s26 + $0x44] ss:$8 sps:$4 sm:$0xff]  }
  0x15   : > { %v3449_v28 = vld [vmem:[%s3678_s26 + $0x234] ss:$8 sps:$4 sm:$0xff]   ;;  %v3452_v30 = vld [vmem:[%s3678_s26 + $0x230] ss:$8 sps:$4 sm:$0xff]   ;;  %v3455_v32 = vld [vmem:[%s3678_s26 + $0x244] ss:$8 sps:$4 sm:$0xff]  }
  0x16   : > { %v3457_v33 = vld [vmem:[%s3678_s26 + $0x40] ss:$8 sps:$4 sm:$0xff]   ;;  %v3459_v35 = vld [vmem:[%s3678_s26 + $0x54] ss:$8 sps:$4 sm:$0xff]   ;;  %v3463_v37 = vld [vmem:[%s3678_s26 + $0x50] ss:$8 sps:$4 sm:$0xff]  }
  0x17   : > { %1174 = vmatpush1.bf16.msra.mxu0 %v3423_v5  ;;  %3403 = vmatpush1.bf16.msra.mxu1 %v3423_v5  ;;  %v3458_v34 = vld [vmem:[%s3678_s26 + $0x240] ss:$8 sps:$4 sm:$0xff]   ;;  %v3461_v36 = vld [vmem:[%s3678_s26 + $0x254] ss:$8 sps:$4 sm:$0xff]   ;;  %v3464_v38 = vld [vmem:[%s3678_s26 + $0x250] ss:$8 sps:$4 sm:$0xff]  }
  0x18   : > { %1175 = vmatprep.subr.bf16.mxu0 %v3630_v1  ;;  %3394 = vmatprep.subr.bf16.mxu1 %v3630_v1  ;;  %v3465_v39 = vld [vmem:[%s3678_s26 + $0x64] ss:$8 sps:$4 sm:$0xff]   ;;  %v3469_v41 = vld [vmem:[%s3678_s26 + $0x60] ss:$8 sps:$4 sm:$0xff]   ;;  %v3471_v43 = vld [vmem:[%s3678_s26 + $0x74] ss:$8 sps:$4 sm:$0xff]  }
  0x19   : > { %v3467_v40 = vld [vmem:[%s3678_s26 + $0x264] ss:$8 sps:$4 sm:$0xff]   ;;  %v3470_v42 = vld [vmem:[%s3678_s26 + $0x260] ss:$8 sps:$4 sm:$0xff]   ;;  %v3473_v44 = vld [vmem:[%s3678_s26 + $0x274] ss:$8 sps:$4 sm:$0xff]  }
  0x1a   : > { %v3475_v45 = vld [vmem:[%s3678_s26 + $0x70] ss:$8 sps:$4 sm:$0xff]   ;;  %v3477_v47 = vld [vmem:[%s3678_s26 + $0x84] ss:$8 sps:$4 sm:$0xff]   ;;  %v3481_v49 = vld [vmem:[%s3678_s26 + $0x80] ss:$8 sps:$4 sm:$0xff]  }
  0x1b   : > { %1176 = vmatpush1.bf16.msra.mxu0 %v3424_v8  ;;  %3404 = vmatpush1.bf16.msra.mxu1 %v3424_v8  ;;  %v3476_v46 = vld [vmem:[%s3678_s26 + $0x270] ss:$8 sps:$4 sm:$0xff]   ;;  %v3479_v48 = vld [vmem:[%s3678_s26 + $0x284] ss:$8 sps:$4 sm:$0xff]   ;;  %v3482_v50 = vld [vmem:[%s3678_s26 + $0x280] ss:$8 sps:$4 sm:$0xff]  }
  0x1c   : > { %1177 = vmatprep.subr.bf16.mxu0 %v3630_v1  ;;  %3395 = vmatprep.subr.bf16.mxu1 %v3630_v1  ;;  %v3483_v51 = vld [vmem:[%s3678_s26 + $0x94] ss:$8 sps:$4 sm:$0xff]   ;;  %v3487_v53 = vld [vmem:[%s3678_s26 + $0x90] ss:$8 sps:$4 sm:$0xff]   ;;  %v3489_v55 = vld [vmem:[%s3678_s26 + $0xa4] ss:$8 sps:$4 sm:$0xff]  }
  0x1d   : > { %v3485_v52 = vld [vmem:[%s3678_s26 + $0x294] ss:$8 sps:$4 sm:$0xff]   ;;  %v3488_v54 = vld [vmem:[%s3678_s26 + $0x290] ss:$8 sps:$4 sm:$0xff]   ;;  %v3491_v56 = vld [vmem:[%s3678_s26 + $0x2a4] ss:$8 sps:$4 sm:$0xff]  }
  0x1e   : > { %v3493_v57 = vld [vmem:[%s3678_s26 + $0xa0] ss:$8 sps:$4 sm:$0xff]   ;;  %v3495_v59 = vld [vmem:[%s3678_s26 + $0xb4] ss:$8 sps:$4 sm:$0xff]   ;;  %v3499_v61 = vld [vmem:[%s3678_s26 + $0xb0] ss:$8 sps:$4 sm:$0xff]  }
  0x1f   : > { %1178 = vmatpush1.bf16.msra.mxu0 %v3425_v9  ;;  %3405 = vmatpush1.bf16.msra.mxu1 %v3425_v9  ;;  %v3494_v58 = vld [vmem:[%s3678_s26 + $0x2a0] ss:$8 sps:$4 sm:$0xff]   ;;  %v3497_v60 = vld [vmem:[%s3678_s26 + $0x2b4] ss:$8 sps:$4 sm:$0xff]   ;;  %v3500_v62 = vld [vmem:[%s3678_s26 + $0x2b0] ss:$8 sps:$4 sm:$0xff]  }
  0x20   : > { %1179 = vmatprep.subr.bf16.mxu0 %v3630_v1  ;;  %3396 = vmatprep.subr.bf16.mxu1 %v3630_v1  ;;  %v3501_v63 = vld [vmem:[%s3678_s26 + $0xc4] ss:$8 sps:$4 sm:$0xff]   ;;  %v3506_v2 = vld [vmem:[%s3678_s26 + $0x2c0] ss:$8 sps:$4 sm:$0xff]   ;;  %v3507_v3 = vld [vmem:[%s3678_s26 + $0xd4] ss:$8 sps:$4 sm:$0xff]  }
  0x21   : > { %v3503_v0 = vld [vmem:[%s3678_s26 + $0x2c4] ss:$8 sps:$4 sm:$0xff]   ;;  %v3509_v4 = vld [vmem:[%s3678_s26 + $0x2d4] ss:$8 sps:$4 sm:$0xff]   ;;  %v3511_v5 = vld [vmem:[%s3678_s26 + $0xd0] ss:$8 sps:$4 sm:$0xff]  }
  0x22   : > { %v3512_v6 = vld [vmem:[%s3678_s26 + $0x2d0] ss:$8 sps:$4 sm:$0xff]   ;;  %v3513_v7 = vld [vmem:[%s3678_s26 + $0xe4] ss:$8 sps:$4 sm:$0xff]   ;;  %v3517_v9 = vld [vmem:[%s3678_s26 + $0xe0] ss:$8 sps:$4 sm:$0xff]  }
  0x23   : > { %1180 = vmatpush1.bf16.msra.mxu0 %v3426_v10  ;;  %3406 = vmatpush1.bf16.msra.mxu1 %v3426_v10  ;;  %v3515_v8 = vld [vmem:[%s3678_s26 + $0x2e4] ss:$8 sps:$4 sm:$0xff]   ;;  %v3518_v10 = vld [vmem:[%s3678_s26 + $0x2e0] ss:$8 sps:$4 sm:$0xff]   ;;  %v3519_v11 = vld [vmem:[%s3678_s26 + $0xf4] ss:$8 sps:$4 sm:$0xff]  }
  0x24   : > { %1181 = vmatprep.subr.bf16.mxu0 %v3630_v1  ;;  %3397 = vmatprep.subr.bf16.mxu1 %v3630_v1  ;;  %v3521_v12 = vld [vmem:[%s3678_s26 + $0x2f4] ss:$8 sps:$4 sm:$0xff]   ;;  %v3524_v14 = vld [vmem:[%s3678_s26 + $0x2f0] ss:$8 sps:$4 sm:$0xff]   ;;  %v3525_v15 = vld [vmem:[%s3678_s26 + $0x104] ss:$8 sps:$4 sm:$0xff]  }
  0x27   : > { %1182 = vmatpush1.bf16.msra.mxu0 %v3427_v13  ;;  %3407 = vmatpush1.bf16.msra.mxu1 %v3427_v13  ;;  %v3523_v13 = vld [vmem:[%s3678_s26 + $0xf0] ss:$8 sps:$4 sm:$0xff]  }
  0x28   : > { %1183 = vmatprep.subr.bf16.mxu0 %v3630_v1  ;;  %3398 = vmatprep.subr.bf16.mxu1 %v3630_v1  ;;  %v3505_v1 = vld [vmem:[%s3678_s26 + $0xc0] ss:$8 sps:$4 sm:$0xff]  }
  0x2b   : > { %1184 = vmatpush1.bf16.msra.mxu0 %v1163_v16  ;;  %3408 = vmatpush1.bf16.msra.mxu1 %v1163_v16  ;;  %v3527_v16 = vld [vmem:[%s3678_s26 + $0x304] ss:$8 sps:$4 sm:$0xff]  }
  0x2e   : > { %1198 = vmatmul.mubr.bf16.vlgmr.msra.gmra.mrb[0].mxu0 %v3429_v17  ;;  %1454 = vmatmul.mubr.bf16.vlgmr.msra.gmra.mrb[0].mxu1 %v3432_v18  ;;  %v3529_v17 = vld [vmem:[%s3678_s26 + $0x100] ss:$8 sps:$4 sm:$0xff]  }
  0x2f   : > { %2684 = vmatprep.mubr.msk.bf16.mxu0 %vm965_vm0, %v3435_v19  ;;  %2716 = vmatprep.mubr.msk.bf16.mxu1 %vm965_vm0, %v3437_v20  ;;  %v3530_v18 = vld [vmem:[%s3678_s26 + $0x300] ss:$8 sps:$4 sm:$0xff]   ;;  %v3531_v19 = vld [vmem:[%s3678_s26 + $0x114] ss:$8 sps:$4 sm:$0xff]  }
  0x30   : > { %v3533_v20 = vld [vmem:[%s3678_s26 + $0x314] ss:$8 sps:$4 sm:$0xff]  }
  0x36   : > { %1206 = vmatmul.mubr.bf16.gmra.mrb[4].mxu0 %v3439_v21  ;;  %1462 = vmatmul.mubr.bf16.gmra.mrb[4].mxu1 %v3440_v22  ;;  %v3535_v21 = vld [vmem:[%s3678_s26 + $0x110] ss:$8 sps:$4 sm:$0xff]  }
  0x37   : > { %2685 = vmatprep.mubr.msk.bf16.mxu0 %vm965_vm0, %v3441_v23  ;;  %2717 = vmatprep.mubr.msk.bf16.mxu1 %vm965_vm0, %v3443_v24  ;;  %v3536_v22 = vld [vmem:[%s3678_s26 + $0x310] ss:$8 sps:$4 sm:$0xff]   ;;  %v3537_v23 = vld [vmem:[%s3678_s26 + $0x124] ss:$8 sps:$4 sm:$0xff]  }
  0x38   : > { %v3539_v24 = vld [vmem:[%s3678_s26 + $0x324] ss:$8 sps:$4 sm:$0xff]  }
  0x3e   : > { %1214 = vmatmul.mubr.bf16.gmra.mrb[8].mxu0 %v3445_v25  ;;  %1470 = vmatmul.mubr.bf16.gmra.mrb[8].mxu1 %v3446_v26  ;;  %v3541_v25 = vld [vmem:[%s3678_s26 + $0x120] ss:$8 sps:$4 sm:$0xff]  }
  0x3f   : > { %2686 = vmatprep.mubr.msk.bf16.mxu0 %vm965_vm0, %v3447_v27  ;;  %2718 = vmatprep.mubr.msk.bf16.mxu1 %vm965_vm0, %v3449_v28  ;;  %v3542_v26 = vld [vmem:[%s3678_s26 + $0x320] ss:$8 sps:$4 sm:$0xff]   ;;  %v3543_v27 = vld [vmem:[%s3678_s26 + $0x134] ss:$8 sps:$4 sm:$0xff]  }
  0x40   : > { %v3545_v28 = vld [vmem:[%s3678_s26 + $0x334] ss:$8 sps:$4 sm:$0xff]  }
  0x46   : > { %1222 = vmatmul.mubr.bf16.gmra.mrb[12].mxu0 %v3451_v29  ;;  %1478 = vmatmul.mubr.bf16.gmra.mrb[12].mxu1 %v3452_v30  ;;  %v3547_v29 = vld [vmem:[%s3678_s26 + $0x130] ss:$8 sps:$4 sm:$0xff]  }
  0x47   : > { %2687 = vmatprep.mubr.msk.bf16.mxu0 %vm965_vm0, %v3453_v31  ;;  %2719 = vmatprep.mubr.msk.bf16.mxu1 %vm965_vm0, %v3455_v32  ;;  %v3548_v30 = vld [vmem:[%s3678_s26 + $0x330] ss:$8 sps:$4 sm:$0xff]   ;;  %v3549_v31 = vld [vmem:[%s3678_s26 + $0x144] ss:$8 sps:$4 sm:$0xff]  }
  0x48   : > { %v3551_v32 = vld [vmem:[%s3678_s26 + $0x344] ss:$8 sps:$4 sm:$0xff]  }
  0x4e   : > { %1230 = vmatmul.mubr.bf16.gmra.mrb[16].mxu0 %v3457_v33  ;;  %1486 = vmatmul.mubr.bf16.gmra.mrb[16].mxu1 %v3458_v34  ;;  %v3553_v33 = vld [vmem:[%s3678_s26 + $0x140] ss:$8 sps:$4 sm:$0xff]  }
  0x4f   : > { %2688 = vmatprep.mubr.msk.bf16.mxu0 %vm965_vm0, %v3459_v35  ;;  %2720 = vmatprep.mubr.msk.bf16.mxu1 %vm965_vm0, %v3461_v36  ;;  %v3554_v34 = vld [vmem:[%s3678_s26 + $0x340] ss:$8 sps:$4 sm:$0xff]   ;;  %v3555_v35 = vld [vmem:[%s3678_s26 + $0x154] ss:$8 sps:$4 sm:$0xff]  }
  0x50   : > { %v3557_v36 = vld [vmem:[%s3678_s26 + $0x354] ss:$8 sps:$4 sm:$0xff]  }
  0x56   : > { %1238 = vmatmul.mubr.bf16.gmra.mrb[20].mxu0 %v3463_v37  ;;  %1494 = vmatmul.mubr.bf16.gmra.mrb[20].mxu1 %v3464_v38  ;;  %v3559_v37 = vld [vmem:[%s3678_s26 + $0x150] ss:$8 sps:$4 sm:$0xff]  }
  0x57   : > { %2689 = vmatprep.mubr.msk.bf16.mxu0 %vm965_vm0, %v3465_v39  ;;  %2721 = vmatprep.mubr.msk.bf16.mxu1 %vm965_vm0, %v3467_v40  ;;  %v3560_v38 = vld [vmem:[%s3678_s26 + $0x350] ss:$8 sps:$4 sm:$0xff]   ;;  %v3561_v39 = vld [vmem:[%s3678_s26 + $0x164] ss:$8 sps:$4 sm:$0xff]  }
  0x58   : > { %v3563_v40 = vld [vmem:[%s3678_s26 + $0x364] ss:$8 sps:$4 sm:$0xff]  }
  0x5e   : > { %1246 = vmatmul.mubr.bf16.gmra.mrb[24].mxu0 %v3469_v41  ;;  %1502 = vmatmul.mubr.bf16.gmra.mrb[24].mxu1 %v3470_v42  ;;  %v3565_v41 = vld [vmem:[%s3678_s26 + $0x160] ss:$8 sps:$4 sm:$0xff]  }
  0x5f   : > { %2690 = vmatprep.mubr.msk.bf16.mxu0 %vm965_vm0, %v3471_v43  ;;  %2722 = vmatprep.mubr.msk.bf16.mxu1 %vm965_vm0, %v3473_v44  ;;  %v3566_v42 = vld [vmem:[%s3678_s26 + $0x360] ss:$8 sps:$4 sm:$0xff]   ;;  %v3567_v43 = vld [vmem:[%s3678_s26 + $0x174] ss:$8 sps:$4 sm:$0xff]  }
  0x60   : > { %v3569_v44 = vld [vmem:[%s3678_s26 + $0x374] ss:$8 sps:$4 sm:$0xff]  }
  0x66   : > { %1254 = vmatmul.mubr.bf16.gmra.mrb[28].mxu0 %v3475_v45  ;;  %1510 = vmatmul.mubr.bf16.gmra.mrb[28].mxu1 %v3476_v46  ;;  %v3571_v45 = vld [vmem:[%s3678_s26 + $0x170] ss:$8 sps:$4 sm:$0xff]  }
  0x67   : > { %2691 = vmatprep.mubr.msk.bf16.mxu0 %vm965_vm0, %v3477_v47  ;;  %2723 = vmatprep.mubr.msk.bf16.mxu1 %vm965_vm0, %v3479_v48  ;;  %v3572_v46 = vld [vmem:[%s3678_s26 + $0x370] ss:$8 sps:$4 sm:$0xff]   ;;  %v3573_v47 = vld [vmem:[%s3678_s26 + $0x184] ss:$8 sps:$4 sm:$0xff]  }
  0x68   : > { %v3575_v48 = vld [vmem:[%s3678_s26 + $0x384] ss:$8 sps:$4 sm:$0xff]  }
  0x6e   : > { %1262 = vmatmul.mubr.bf16.gmra.mrb[32].mxu0 %v3481_v49  ;;  %1518 = vmatmul.mubr.bf16.gmra.mrb[32].mxu1 %v3482_v50  ;;  %v3577_v49 = vld [vmem:[%s3678_s26 + $0x180] ss:$8 sps:$4 sm:$0xff]  }
  0x6f   : > { %2692 = vmatprep.mubr.msk.bf16.mxu0 %vm965_vm0, %v3483_v51  ;;  %2724 = vmatprep.mubr.msk.bf16.mxu1 %vm965_vm0, %v3485_v52  ;;  %v3578_v50 = vld [vmem:[%s3678_s26 + $0x380] ss:$8 sps:$4 sm:$0xff]   ;;  %v3579_v51 = vld [vmem:[%s3678_s26 + $0x194] ss:$8 sps:$4 sm:$0xff]  }
  0x70   : > { %v3581_v52 = vld [vmem:[%s3678_s26 + $0x394] ss:$8 sps:$4 sm:$0xff]  }
  0x76   : > { %1270 = vmatmul.mubr.bf16.gmra.mrb[36].mxu0 %v3487_v53  ;;  %1526 = vmatmul.mubr.bf16.gmra.mrb[36].mxu1 %v3488_v54  ;;  %v3583_v53 = vld [vmem:[%s3678_s26 + $0x190] ss:$8 sps:$4 sm:$0xff]  }
  0x77   : > { %2693 = vmatprep.mubr.msk.bf16.mxu0 %vm965_vm0, %v3489_v55  ;;  %2725 = vmatprep.mubr.msk.bf16.mxu1 %vm965_vm0, %v3491_v56  ;;  %v3584_v54 = vld [vmem:[%s3678_s26 + $0x390] ss:$8 sps:$4 sm:$0xff]   ;;  %v3585_v55 = vld [vmem:[%s3678_s26 + $0x1a4] ss:$8 sps:$4 sm:$0xff]  }
  0x78   : > { %v3587_v56 = vld [vmem:[%s3678_s26 + $0x3a4] ss:$8 sps:$4 sm:$0xff]  }
  0x7e   : > { %1278 = vmatmul.mubr.bf16.gmra.mrb[40].mxu0 %v3493_v57  ;;  %1534 = vmatmul.mubr.bf16.gmra.mrb[40].mxu1 %v3494_v58  ;;  %v3589_v57 = vld [vmem:[%s3678_s26 + $0x1a0] ss:$8 sps:$4 sm:$0xff]  }
  0x7f   : > { %2694 = vmatprep.mubr.msk.bf16.mxu0 %vm965_vm0, %v3495_v59  ;;  %2726 = vmatprep.mubr.msk.bf16.mxu1 %vm965_vm0, %v3497_v60  ;;  %v3590_v58 = vld [vmem:[%s3678_s26 + $0x3a0] ss:$8 sps:$4 sm:$0xff]   ;;  %v3591_v59 = vld [vmem:[%s3678_s26 + $0x1b4] ss:$8 sps:$4 sm:$0xff]  }
  0x80   : > { %v3593_v60 = vld [vmem:[%s3678_s26 + $0x3b4] ss:$8 sps:$4 sm:$0xff]  }
  0x86   : > { %1286 = vmatmul.mubr.bf16.gmra.mrb[44].mxu0 %v3499_v61  ;;  %1542 = vmatmul.mubr.bf16.gmra.mrb[44].mxu1 %v3500_v62  ;;  %v3865_v61 = vld [vmem:[%s4103_s2] ss:$0 sm:$0xff] }
  0x87   : > { %2695 = vmatprep.mubr.msk.bf16.mxu0 %vm965_vm0, %v3501_v63  ;;  %2727 = vmatprep.mubr.msk.bf16.mxu1 %vm965_vm0, %v3503_v0 }
  0x8e   : > { %1294 = vmatmul.mubr.bf16.gmra.mrb[48].mxu0 %v3505_v1  ;;  %1550 = vmatmul.mubr.bf16.gmra.mrb[48].mxu1 %v3506_v2 }
  0x8f   : > { %2696 = vmatprep.mubr.msk.bf16.mxu0 %vm965_vm0, %v3507_v3  ;;  %2728 = vmatprep.mubr.msk.bf16.mxu1 %vm965_vm0, %v3509_v4  ;;  %v3595_v4 = vld [vmem:[%s3678_s26 + $0x1b0] ss:$8 sps:$4 sm:$0xff]  }
  0x96   : > { %1302 = vmatmul.mubr.bf16.gmra.mrb[52].mxu0 %v3511_v5  ;;  %1558 = vmatmul.mubr.bf16.gmra.mrb[52].mxu1 %v3512_v6  ;;  %v3596_v5 = vld [vmem:[%s3678_s26 + $0x3b0] ss:$8 sps:$4 sm:$0xff]  }
  0x97   : > { %2697 = vmatprep.mubr.msk.bf16.mxu0 %vm965_vm0, %v3513_v7  ;;  %2729 = vmatprep.mubr.msk.bf16.mxu1 %vm965_vm0, %v3515_v8  ;;  %v3597_v8 = vld [vmem:[%s3678_s26 + $0x1c4] ss:$8 sps:$4 sm:$0xff]  }
  0x9e   : > { %1310 = vmatmul.mubr.bf16.gmra.mrb[56].mxu0 %v3517_v9  ;;  %1566 = vmatmul.mubr.bf16.gmra.mrb[56].mxu1 %v3518_v10  ;;  %v3599_v9 = vld [vmem:[%s3678_s26 + $0x3c4] ss:$8 sps:$4 sm:$0xff]  }
  0x9f   : > { %2698 = vmatprep.mubr.msk.bf16.mxu0 %vm965_vm0, %v3519_v11  ;;  %2730 = vmatprep.mubr.msk.bf16.mxu1 %vm965_vm0, %v3521_v12 }
  0xa6   : > { %1318 = vmatmul.mubr.bf16.gmra.mrb[60].mxu0 %v3523_v13  ;;  %1574 = vmatmul.mubr.bf16.gmra.mrb[60].mxu1 %v3524_v14 }
  0xa7   : > { %2699 = vmatprep.mubr.msk.bf16.mxu0 %vm965_vm0, %v3525_v15  ;;  %2731 = vmatprep.mubr.msk.bf16.mxu1 %vm965_vm0, %v3527_v16 }
  0xae   : > { %1326 = vmatmul.mubr.bf16.gmra.mrb[64].mxu0 %v3529_v17  ;;  %1582 = vmatmul.mubr.bf16.gmra.mrb[64].mxu1 %v3530_v18 }
  0xaf   : > { %2700 = vmatprep.mubr.msk.bf16.mxu0 %vm965_vm0, %v3531_v19  ;;  %2732 = vmatprep.mubr.msk.bf16.mxu1 %vm965_vm0, %v3533_v20 }
  0xb6   : > { %1334 = vmatmul.mubr.bf16.gmra.mrb[68].mxu0 %v3535_v21  ;;  %1590 = vmatmul.mubr.bf16.gmra.mrb[68].mxu1 %v3536_v22 }
  0xb7   : > { %2701 = vmatprep.mubr.msk.bf16.mxu0 %vm965_vm0, %v3537_v23  ;;  %2733 = vmatprep.mubr.msk.bf16.mxu1 %vm965_vm0, %v3539_v24 }
  0xbe   : > { %1342 = vmatmul.mubr.bf16.gmra.mrb[72].mxu0 %v3541_v25  ;;  %1598 = vmatmul.mubr.bf16.gmra.mrb[72].mxu1 %v3542_v26  ;;  %v3601_v26 = vld [vmem:[%s3678_s26 + $0x1c0] ss:$8 sps:$4 sm:$0xff]  }
  0xbf   : > { %2702 = vmatprep.mubr.msk.bf16.mxu0 %vm965_vm0, %v3543_v27  ;;  %2734 = vmatprep.mubr.msk.bf16.mxu1 %vm965_vm0, %v3545_v28  ;;  %v3602_v27 = vld [vmem:[%s3678_s26 + $0x3c0] ss:$8 sps:$4 sm:$0xff]  }
  0xc6   : > { %1350 = vmatmul.mubr.bf16.gmra.mrb[76].mxu0 %v3547_v29  ;;  %1606 = vmatmul.mubr.bf16.gmra.mrb[76].mxu1 %v3548_v30  ;;  %v3603_v30 = vld [vmem:[%s3678_s26 + $0x1d4] ss:$8 sps:$4 sm:$0xff]  }
  0xc7   : > { %2703 = vmatprep.mubr.msk.bf16.mxu0 %vm965_vm0, %v3549_v31  ;;  %2735 = vmatprep.mubr.msk.bf16.mxu1 %vm965_vm0, %v3551_v32  ;;  %v3605_v31 = vld [vmem:[%s3678_s26 + $0x3d4] ss:$8 sps:$4 sm:$0xff]  }
  0xce   : > { %1358 = vmatmul.mubr.bf16.gmra.mrb[80].mxu0 %v3553_v33  ;;  %1614 = vmatmul.mubr.bf16.gmra.mrb[80].mxu1 %v3554_v34 }
  0xcf   : > { %2704 = vmatprep.mubr.msk.bf16.mxu0 %vm965_vm0, %v3555_v35  ;;  %2736 = vmatprep.mubr.msk.bf16.mxu1 %vm965_vm0, %v3557_v36 }
  0xd6   : > { %1366 = vmatmul.mubr.bf16.gmra.mrb[84].mxu0 %v3559_v37  ;;  %1622 = vmatmul.mubr.bf16.gmra.mrb[84].mxu1 %v3560_v38 }
  0xd7   : > { %2705 = vmatprep.mubr.msk.bf16.mxu0 %vm965_vm0, %v3561_v39  ;;  %2737 = vmatprep.mubr.msk.bf16.mxu1 %vm965_vm0, %v3563_v40 }
  0xde   : > { %1374 = vmatmul.mubr.bf16.gmra.mrb[88].mxu0 %v3565_v41  ;;  %1630 = vmatmul.mubr.bf16.gmra.mrb[88].mxu1 %v3566_v42 }
  0xdf   : > { %2706 = vmatprep.mubr.msk.bf16.mxu0 %vm965_vm0, %v3567_v43  ;;  %2738 = vmatprep.mubr.msk.bf16.mxu1 %vm965_vm0, %v3569_v44 }
  0xe6   : > { %1382 = vmatmul.mubr.bf16.gmra.mrb[92].mxu0 %v3571_v45  ;;  %1638 = vmatmul.mubr.bf16.gmra.mrb[92].mxu1 %v3572_v46 }
  0xe7   : > { %2707 = vmatprep.mubr.msk.bf16.mxu0 %vm965_vm0, %v3573_v47  ;;  %2739 = vmatprep.mubr.msk.bf16.mxu1 %vm965_vm0, %v3575_v48  ;;  %v3607_v48 = vld [vmem:[%s3678_s26 + $0x1d0] ss:$8 sps:$4 sm:$0xff]  }
  0xee   : > { %1390 = vmatmul.mubr.bf16.gmra.mrb[96].mxu0 %v3577_v49  ;;  %1646 = vmatmul.mubr.bf16.gmra.mrb[96].mxu1 %v3578_v50  ;;  %v3608_v49 = vld [vmem:[%s3678_s26 + $0x3d0] ss:$8 sps:$4 sm:$0xff]  }
  0xef   : > { %2708 = vmatprep.mubr.msk.bf16.mxu0 %vm965_vm0, %v3579_v51  ;;  %2740 = vmatprep.mubr.msk.bf16.mxu1 %vm965_vm0, %v3581_v52  ;;  %v3609_v52 = vld [vmem:[%s3678_s26 + $0x1e4] ss:$8 sps:$4 sm:$0xff]  }
  0xf6   : > { %1398 = vmatmul.mubr.bf16.gmra.mrb[100].mxu0 %v3583_v53  ;;  %1654 = vmatmul.mubr.bf16.gmra.mrb[100].mxu1 %v3584_v54  ;;  %v3611_v53 = vld [vmem:[%s3678_s26 + $0x3e4] ss:$8 sps:$4 sm:$0xff]  }
  0xf7   : > { %2709 = vmatprep.mubr.msk.bf16.mxu0 %vm965_vm0, %v3585_v55  ;;  %2741 = vmatprep.mubr.msk.bf16.mxu1 %vm965_vm0, %v3587_v56 }
  0xfe   : > { %1406 = vmatmul.mubr.bf16.gmra.mrb[104].mxu0 %v3589_v57  ;;  %1662 = vmatmul.mubr.bf16.gmra.mrb[104].mxu1 %v3590_v58 }
  0xff   : > { %2710 = vmatprep.mubr.msk.bf16.mxu0 %vm965_vm0, %v3591_v59  ;;  %2742 = vmatprep.mubr.msk.bf16.mxu1 %vm965_vm0, %v3593_v60 }
 0x101   : > { %v1199_v62 = vpop.f32.mrb[0].mxu0  ;;  %v1455_v63 = vpop.f32.mrb[0].mxu1 }
 0x102   : > { %v1200_v0 = vadd.f32 %v3865_v61, %v1199_v62  ;;  %v1456_v1 = vadd.f32 %v3865_v61, %v1455_v63  ;;  %v1201_v2 = vpop.f32.mrb[1].mxu0  ;;  %v1457_v3 = vpop.f32.mrb[1].mxu1 }
 0x103   : > { %v1202_v6 = vpop.f32.mrb[2].mxu0  ;;  %v1458_v7 = vpop.f32.mrb[2].mxu1 }
 0x104   : > { %v1203_v10 = vadd.f32 %v3865_v61, %v1202_v6  ;;  %v1459_v11 = vadd.f32 %v3865_v61, %v1458_v7  ;;  %v1204_v12 = vpop.f32.mrb[3].mxu0  ;;  %v1460_v13 = vpop.f32.mrb[3].mxu1  ;;  %v1710_v14 = vmax.f32 %v1200_v0, 0.0  ;;  %v1774_v15 = vmax.f32 %v1456_v1, 0.0  ;;  %v3613_v7 = vld [vmem:[%s3678_s26 + $0x1e0] ss:$8 sps:$4 sm:$0xff]  }
 0x105   : > { %v3617_v12 = vld [vmem:[%s3678_s26 + $0x3f4] ss:$8 sps:$4 sm:$0xff]  }
 0x106   : > { %v1711_v16 = vmax.f32 %v1203_v10, 0.0  ;;  %v1775_v17 = vmax.f32 %v1459_v11, 0.0  ;;  %1414 = vmatmul.mubr.bf16.gmra.mrb[108].mxu0 %v3595_v4  ;;  %1670 = vmatmul.mubr.bf16.gmra.mrb[108].mxu1 %v3596_v5  ;;  %v3615_v11 = vld [vmem:[%s3678_s26 + $0x1f4] ss:$8 sps:$4 sm:$0xff]  }
 0x107   : > { %2711 = vmatprep.mubr.msk.bf16.mxu0 %vm965_vm0, %v3597_v8  ;;  %2743 = vmatprep.mubr.msk.bf16.mxu1 %vm965_vm0, %v3599_v9  ;;  %v3614_v8 = vld [vmem:[%s3678_s26 + $0x3e0] ss:$8 sps:$4 sm:$0xff]  }
 0x108   : > { %v3009_v18 = vpack.c.bf16 %v1711_v16, %v1710_v14  ;;  %v3169_v19 = vpack.c.bf16 %v1775_v17, %v1774_v15 }
 0x109   : > { %v1207_v20 = vpop.f32.mrb[4].mxu0  ;;  %v1463_v21 = vpop.f32.mrb[4].mxu1 }
 0x10a   : > { %3010 = vst [vmem:[%s3881_s18] sm:$0xff] %v3009_v18   ;;  %3357 = vst [vmem:[%s3881_s18 + $0x100] sm:$0xff] %v3169_v19   ;;  %v1208_v22 = vadd.f32 %v3865_v61, %v1207_v20  ;;  %v1464_v23 = vadd.f32 %v3865_v61, %v1463_v21  ;;  %v1209_v24 = vpop.f32.mrb[5].mxu0  ;;  %v1465_v25 = vpop.f32.mrb[5].mxu1 }
 0x10b   : > { %v1210_v28 = vpop.f32.mrb[6].mxu0  ;;  %v1466_v29 = vpop.f32.mrb[6].mxu1 }
 0x10c   : > { %v1211_v32 = vadd.f32 %v3865_v61, %v1210_v28  ;;  %v1467_v33 = vadd.f32 %v3865_v61, %v1466_v29  ;;  %v1212_v34 = vpop.f32.mrb[7].mxu0  ;;  %v1468_v35 = vpop.f32.mrb[7].mxu1  ;;  %v1712_v36 = vmax.f32 %v1208_v22, 0.0  ;;  %v1776_v37 = vmax.f32 %v1464_v23, 0.0  ;;  %v3619_v29 = vld [vmem:[%s3678_s26 + $0x1f0] ss:$8 sps:$4 sm:$0xff]  }
 0x10e   : > { %v1713_v38 = vmax.f32 %v1211_v32, 0.0  ;;  %v1777_v39 = vmax.f32 %v1467_v33, 0.0  ;;  %1422 = vmatmul.mubr.bf16.gmra.mrb[112].mxu0 %v3601_v26  ;;  %1678 = vmatmul.mubr.bf16.gmra.mrb[112].mxu1 %v3602_v27 }
 0x10f   : > { %2712 = vmatprep.mubr.msk.bf16.mxu0 %vm965_vm0, %v3603_v30  ;;  %2744 = vmatprep.mubr.msk.bf16.mxu1 %vm965_vm0, %v3605_v31  ;;  %v3620_v30 = vld [vmem:[%s3678_s26 + $0x3f0] ss:$8 sps:$4 sm:$0xff]  }
 0x110   : > { %v3014_v40 = vpack.c.bf16 %v1713_v38, %v1712_v36  ;;  %v3174_v41 = vpack.c.bf16 %v1777_v39, %v1776_v37 }
 0x111   : > { %v1215_v42 = vpop.f32.mrb[8].mxu0  ;;  %v1471_v43 = vpop.f32.mrb[8].mxu1 }
 0x112   : > { %3326 = vst [vmem:[%s3881_s18 + $0x8] sm:$0xff] %v3014_v40   ;;  %3358 = vst [vmem:[%s3881_s18 + $0x108] sm:$0xff] %v3174_v41   ;;  %v1216_v44 = vadd.f32 %v3865_v61, %v1215_v42  ;;  %v1472_v45 = vadd.f32 %v3865_v61, %v1471_v43  ;;  %v1217_v46 = vpop.f32.mrb[9].mxu0  ;;  %v1473_v47 = vpop.f32.mrb[9].mxu1 }
 0x113   : > { %v1218_v50 = vpop.f32.mrb[10].mxu0  ;;  %v1474_v51 = vpop.f32.mrb[10].mxu1 }
 0x114   : > { %v1219_v54 = vadd.f32 %v3865_v61, %v1218_v50  ;;  %v1475_v55 = vadd.f32 %v3865_v61, %v1474_v51  ;;  %v1220_v56 = vpop.f32.mrb[11].mxu0  ;;  %v1476_v57 = vpop.f32.mrb[11].mxu1  ;;  %v1714_v58 = vmax.f32 %v1216_v44, 0.0  ;;  %v1778_v59 = vmax.f32 %v1472_v45, 0.0 }
 0x116   : > { %v1715_v60 = vmax.f32 %v1219_v54, 0.0  ;;  %v1779_v62 = vmax.f32 %v1475_v55, 0.0  ;;  %1430 = vmatmul.mubr.bf16.gmra.mrb[116].mxu0 %v3607_v48  ;;  %1686 = vmatmul.mubr.bf16.gmra.mrb[116].mxu1 %v3608_v49 }
 0x117   : > { %2713 = vmatprep.mubr.msk.bf16.mxu0 %vm965_vm0, %v3609_v52  ;;  %2745 = vmatprep.mubr.msk.bf16.mxu1 %vm965_vm0, %v3611_v53 }
 0x118   : > { %v3019_v63 = vpack.c.bf16 %v1715_v60, %v1714_v58  ;;  %v3179_v0 = vpack.c.bf16 %v1779_v62, %v1778_v59 }
 0x119   : > { %v1223_v1 = vpop.f32.mrb[12].mxu0  ;;  %v1479_v2 = vpop.f32.mrb[12].mxu1 }
 0x11a   : > { %3327 = vst [vmem:[%s3881_s18 + $0x10] sm:$0xff] %v3019_v63   ;;  %3359 = vst [vmem:[%s3881_s18 + $0x110] sm:$0xff] %v3179_v0   ;;  %v1224_v3 = vadd.f32 %v3865_v61, %v1223_v1  ;;  %v1480_v4 = vadd.f32 %v3865_v61, %v1479_v2  ;;  %v1225_v5 = vpop.f32.mrb[13].mxu0  ;;  %v1481_v6 = vpop.f32.mrb[13].mxu1 }
 0x11b   : > { %v1226_v9 = vpop.f32.mrb[14].mxu0  ;;  %v1482_v10 = vpop.f32.mrb[14].mxu1 }
 0x11c   : > { %v1227_v13 = vadd.f32 %v3865_v61, %v1226_v9  ;;  %v1483_v14 = vadd.f32 %v3865_v61, %v1482_v10  ;;  %v1228_v15 = vpop.f32.mrb[15].mxu0  ;;  %v1484_v16 = vpop.f32.mrb[15].mxu1  ;;  %v1716_v17 = vmax.f32 %v1224_v3, 0.0  ;;  %v1780_v18 = vmax.f32 %v1480_v4, 0.0 }
 0x11e   : > { %v1717_v19 = vmax.f32 %v1227_v13, 0.0  ;;  %v1781_v20 = vmax.f32 %v1483_v14, 0.0  ;;  %1438 = vmatmul.mubr.bf16.gmra.mrb[120].mxu0 %v3613_v7  ;;  %1694 = vmatmul.mubr.bf16.gmra.mrb[120].mxu1 %v3614_v8 }
 0x11f   : > { %2714 = vmatprep.mubr.msk.bf16.mxu0 %vm965_vm0, %v3615_v11  ;;  %2746 = vmatprep.mubr.msk.bf16.mxu1 %vm965_vm0, %v3617_v12 }
 0x120   : > { %v3024_v21 = vpack.c.bf16 %v1717_v19, %v1716_v17  ;;  %v3184_v22 = vpack.c.bf16 %v1781_v20, %v1780_v18 }
 0x121   : > { %v1231_v23 = vpop.f32.mrb[16].mxu0  ;;  %v1487_v24 = vpop.f32.mrb[16].mxu1 }
 0x122   : > { %3328 = vst [vmem:[%s3881_s18 + $0x18] sm:$0xff] %v3024_v21   ;;  %3360 = vst [vmem:[%s3881_s18 + $0x118] sm:$0xff] %v3184_v22   ;;  %v1232_v25 = vadd.f32 %v3865_v61, %v1231_v23  ;;  %v1488_v26 = vadd.f32 %v3865_v61, %v1487_v24  ;;  %v1233_v27 = vpop.f32.mrb[17].mxu0  ;;  %v1489_v28 = vpop.f32.mrb[17].mxu1 }
 0x123   : > { %v1234_v31 = vpop.f32.mrb[18].mxu0  ;;  %v1490_v32 = vpop.f32.mrb[18].mxu1 }
 0x124   : > { %v1235_v33 = vadd.f32 %v3865_v61, %v1234_v31  ;;  %v1491_v34 = vadd.f32 %v3865_v61, %v1490_v32  ;;  %v1236_v35 = vpop.f32.mrb[19].mxu0  ;;  %v1492_v36 = vpop.f32.mrb[19].mxu1  ;;  %v1718_v37 = vmax.f32 %v1232_v25, 0.0  ;;  %v1782_v38 = vmax.f32 %v1488_v26, 0.0 }
 0x126   : > { %v1719_v39 = vmax.f32 %v1235_v33, 0.0  ;;  %v1783_v40 = vmax.f32 %v1491_v34, 0.0  ;;  %1446 = vmatmul.mubr.bf16.gmra.mrb[124].mxu0 %v3619_v29  ;;  %1702 = vmatmul.mubr.bf16.gmra.mrb[124].mxu1 %v3620_v30 }
 0x128   : > { %v3029_v41 = vpack.c.bf16 %v1719_v39, %v1718_v37  ;;  %v3189_v42 = vpack.c.bf16 %v1783_v40, %v1782_v38 }
 0x129   : > { %v1239_v43 = vpop.f32.mrb[20].mxu0  ;;  %v1495_v44 = vpop.f32.mrb[20].mxu1 }
 0x12a   : > { %3329 = vst [vmem:[%s3881_s18 + $0x20] sm:$0xff] %v3029_v41   ;;  %3361 = vst [vmem:[%s3881_s18 + $0x120] sm:$0xff] %v3189_v42   ;;  %v1240_v45 = vadd.f32 %v3865_v61, %v1239_v43  ;;  %v1496_v46 = vadd.f32 %v3865_v61, %v1495_v44  ;;  %v1241_v47 = vpop.f32.mrb[21].mxu0  ;;  %v1497_v48 = vpop.f32.mrb[21].mxu1 }
 0x12b   : > { %v1242_v49 = vpop.f32.mrb[22].mxu0  ;;  %v1498_v50 = vpop.f32.mrb[22].mxu1 }
 0x12c   : > { %v1243_v51 = vadd.f32 %v3865_v61, %v1242_v49  ;;  %v1499_v52 = vadd.f32 %v3865_v61, %v1498_v50  ;;  %v1244_v53 = vpop.f32.mrb[23].mxu0  ;;  %v1500_v54 = vpop.f32.mrb[23].mxu1  ;;  %v1720_v55 = vmax.f32 %v1240_v45, 0.0  ;;  %v1784_v56 = vmax.f32 %v1496_v46, 0.0 }
 0x12e   : > { %v1721_v57 = vmax.f32 %v1243_v51, 0.0  ;;  %v1785_v58 = vmax.f32 %v1499_v52, 0.0 }
 0x130   : > { %v3034_v59 = vpack.c.bf16 %v1721_v57, %v1720_v55  ;;  %v3194_v60 = vpack.c.bf16 %v1785_v58, %v1784_v56 }
 0x131   : > { %v1247_v62 = vpop.f32.mrb[24].mxu0  ;;  %v1503_v63 = vpop.f32.mrb[24].mxu1 }
 0x132   : > { %3330 = vst [vmem:[%s3881_s18 + $0x28] sm:$0xff] %v3034_v59   ;;  %3362 = vst [vmem:[%s3881_s18 + $0x128] sm:$0xff] %v3194_v60   ;;  %v1248_v0 = vadd.f32 %v3865_v61, %v1247_v62  ;;  %v1504_v1 = vadd.f32 %v3865_v61, %v1503_v63  ;;  %v1249_v2 = vpop.f32.mrb[25].mxu0  ;;  %v1505_v3 = vpop.f32.mrb[25].mxu1 }
 0x133   : > { %v1250_v4 = vpop.f32.mrb[26].mxu0  ;;  %v1506_v5 = vpop.f32.mrb[26].mxu1 }
 0x134   : > { %v1251_v6 = vadd.f32 %v3865_v61, %v1250_v4  ;;  %v1507_v7 = vadd.f32 %v3865_v61, %v1506_v5  ;;  %v1252_v8 = vpop.f32.mrb[27].mxu0  ;;  %v1508_v9 = vpop.f32.mrb[27].mxu1  ;;  %v1722_v10 = vmax.f32 %v1248_v0, 0.0  ;;  %v1786_v11 = vmax.f32 %v1504_v1, 0.0 }
 0x136   : > { %v1723_v12 = vmax.f32 %v1251_v6, 0.0  ;;  %v1787_v13 = vmax.f32 %v1507_v7, 0.0 }
 0x138   : > { %v3039_v14 = vpack.c.bf16 %v1723_v12, %v1722_v10  ;;  %v3199_v15 = vpack.c.bf16 %v1787_v13, %v1786_v11 }
 0x139   : > { %v1255_v16 = vpop.f32.mrb[28].mxu0  ;;  %v1511_v17 = vpop.f32.mrb[28].mxu1 }
 0x13a   : > { %3331 = vst [vmem:[%s3881_s18 + $0x30] sm:$0xff] %v3039_v14   ;;  %3363 = vst [vmem:[%s3881_s18 + $0x130] sm:$0xff] %v3199_v15   ;;  %v1256_v18 = vadd.f32 %v3865_v61, %v1255_v16  ;;  %v1512_v19 = vadd.f32 %v3865_v61, %v1511_v17  ;;  %v1257_v20 = vpop.f32.mrb[29].mxu0  ;;  %v1513_v21 = vpop.f32.mrb[29].mxu1 }
 0x13b   : > { %v1258_v22 = vpop.f32.mrb[30].mxu0  ;;  %v1514_v23 = vpop.f32.mrb[30].mxu1 }
 0x13c   : > { %v1259_v24 = vadd.f32 %v3865_v61, %v1258_v22  ;;  %v1515_v25 = vadd.f32 %v3865_v61, %v1514_v23  ;;  %v1260_v26 = vpop.f32.mrb[31].mxu0  ;;  %v1516_v27 = vpop.f32.mrb[31].mxu1  ;;  %v1724_v28 = vmax.f32 %v1256_v18, 0.0  ;;  %v1788_v29 = vmax.f32 %v1512_v19, 0.0 }
 0x13e   : > { %v1725_v30 = vmax.f32 %v1259_v24, 0.0  ;;  %v1789_v31 = vmax.f32 %v1515_v25, 0.0 }
 0x140   : > { %v3044_v32 = vpack.c.bf16 %v1725_v30, %v1724_v28  ;;  %v3204_v33 = vpack.c.bf16 %v1789_v31, %v1788_v29 }
 0x141   : > { %v1263_v34 = vpop.f32.mrb[32].mxu0  ;;  %v1519_v35 = vpop.f32.mrb[32].mxu1 }
 0x142   : > { %3332 = vst [vmem:[%s3881_s18 + $0x38] sm:$0xff] %v3044_v32   ;;  %3364 = vst [vmem:[%s3881_s18 + $0x138] sm:$0xff] %v3204_v33   ;;  %v1264_v36 = vadd.f32 %v3865_v61, %v1263_v34  ;;  %v1520_v37 = vadd.f32 %v3865_v61, %v1519_v35  ;;  %v1265_v38 = vpop.f32.mrb[33].mxu0  ;;  %v1521_v39 = vpop.f32.mrb[33].mxu1 }
 0x143   : > { %v1266_v40 = vpop.f32.mrb[34].mxu0  ;;  %v1522_v41 = vpop.f32.mrb[34].mxu1 }
 0x144   : > { %v1267_v42 = vadd.f32 %v3865_v61, %v1266_v40  ;;  %v1523_v43 = vadd.f32 %v3865_v61, %v1522_v41  ;;  %v1268_v44 = vpop.f32.mrb[35].mxu0  ;;  %v1524_v45 = vpop.f32.mrb[35].mxu1  ;;  %v1726_v46 = vmax.f32 %v1264_v36, 0.0  ;;  %v1790_v47 = vmax.f32 %v1520_v37, 0.0 }
 0x146   : > { %v1727_v48 = vmax.f32 %v1267_v42, 0.0  ;;  %v1791_v49 = vmax.f32 %v1523_v43, 0.0 }
 0x148   : > { %v3049_v50 = vpack.c.bf16 %v1727_v48, %v1726_v46  ;;  %v3209_v51 = vpack.c.bf16 %v1791_v49, %v1790_v47 }
 0x149   : > { %v1271_v52 = vpop.f32.mrb[36].mxu0  ;;  %v1527_v53 = vpop.f32.mrb[36].mxu1 }
 0x14a   : > { %3333 = vst [vmem:[%s3881_s18 + $0x40] sm:$0xff] %v3049_v50   ;;  %3365 = vst [vmem:[%s3881_s18 + $0x140] sm:$0xff] %v3209_v51   ;;  %v1272_v54 = vadd.f32 %v3865_v61, %v1271_v52  ;;  %v1528_v55 = vadd.f32 %v3865_v61, %v1527_v53  ;;  %v1273_v56 = vpop.f32.mrb[37].mxu0  ;;  %v1529_v57 = vpop.f32.mrb[37].mxu1 }
 0x14b   : > { %v1274_v58 = vpop.f32.mrb[38].mxu0  ;;  %v1530_v59 = vpop.f32.mrb[38].mxu1 }
 0x14c   : > { %v1275_v60 = vadd.f32 %v3865_v61, %v1274_v58  ;;  %v1531_v62 = vadd.f32 %v3865_v61, %v1530_v59  ;;  %v1276_v63 = vpop.f32.mrb[39].mxu0  ;;  %v1532_v0 = vpop.f32.mrb[39].mxu1  ;;  %v1728_v1 = vmax.f32 %v1272_v54, 0.0  ;;  %v1792_v2 = vmax.f32 %v1528_v55, 0.0 }
 0x14e   : > { %v1729_v3 = vmax.f32 %v1275_v60, 0.0  ;;  %v1793_v4 = vmax.f32 %v1531_v62, 0.0 }
 0x150   : > { %v3054_v5 = vpack.c.bf16 %v1729_v3, %v1728_v1  ;;  %v3214_v6 = vpack.c.bf16 %v1793_v4, %v1792_v2 }
 0x151   : > { %v1279_v7 = vpop.f32.mrb[40].mxu0  ;;  %v1535_v8 = vpop.f32.mrb[40].mxu1 }
 0x152   : > { %3334 = vst [vmem:[%s3881_s18 + $0x48] sm:$0xff] %v3054_v5   ;;  %3366 = vst [vmem:[%s3881_s18 + $0x148] sm:$0xff] %v3214_v6   ;;  %v1280_v9 = vadd.f32 %v3865_v61, %v1279_v7  ;;  %v1536_v10 = vadd.f32 %v3865_v61, %v1535_v8  ;;  %v1281_v11 = vpop.f32.mrb[41].mxu0  ;;  %v1537_v12 = vpop.f32.mrb[41].mxu1 }
 0x153   : > { %v1282_v13 = vpop.f32.mrb[42].mxu0  ;;  %v1538_v14 = vpop.f32.mrb[42].mxu1 }
 0x154   : > { %v1283_v15 = vadd.f32 %v3865_v61, %v1282_v13  ;;  %v1539_v16 = vadd.f32 %v3865_v61, %v1538_v14  ;;  %v1284_v17 = vpop.f32.mrb[43].mxu0  ;;  %v1540_v18 = vpop.f32.mrb[43].mxu1  ;;  %v1730_v19 = vmax.f32 %v1280_v9, 0.0  ;;  %v1794_v20 = vmax.f32 %v1536_v10, 0.0 }
 0x156   : > { %v1731_v21 = vmax.f32 %v1283_v15, 0.0  ;;  %v1795_v22 = vmax.f32 %v1539_v16, 0.0 }
 0x158   : > { %v3059_v23 = vpack.c.bf16 %v1731_v21, %v1730_v19  ;;  %v3219_v24 = vpack.c.bf16 %v1795_v22, %v1794_v20 }
 0x159   : > { %v1287_v25 = vpop.f32.mrb[44].mxu0  ;;  %v1543_v26 = vpop.f32.mrb[44].mxu1 }
 0x15a   : > { %3335 = vst [vmem:[%s3881_s18 + $0x50] sm:$0xff] %v3059_v23   ;;  %3367 = vst [vmem:[%s3881_s18 + $0x150] sm:$0xff] %v3219_v24   ;;  %v1288_v27 = vadd.f32 %v3865_v61, %v1287_v25  ;;  %v1544_v28 = vadd.f32 %v3865_v61, %v1543_v26  ;;  %v1289_v29 = vpop.f32.mrb[45].mxu0  ;;  %v1545_v30 = vpop.f32.mrb[45].mxu1 }
 0x15b   : > { %v1290_v31 = vpop.f32.mrb[46].mxu0  ;;  %v1546_v32 = vpop.f32.mrb[46].mxu1 }
 0x15c   : > { %v1291_v33 = vadd.f32 %v3865_v61, %v1290_v31  ;;  %v1547_v34 = vadd.f32 %v3865_v61, %v1546_v32  ;;  %v1292_v35 = vpop.f32.mrb[47].mxu0  ;;  %v1548_v36 = vpop.f32.mrb[47].mxu1  ;;  %v1732_v37 = vmax.f32 %v1288_v27, 0.0  ;;  %v1796_v38 = vmax.f32 %v1544_v28, 0.0 }
 0x15e   : > { %v1733_v39 = vmax.f32 %v1291_v33, 0.0  ;;  %v1797_v40 = vmax.f32 %v1547_v34, 0.0 }
 0x160   : > { %v3064_v41 = vpack.c.bf16 %v1733_v39, %v1732_v37  ;;  %v3224_v42 = vpack.c.bf16 %v1797_v40, %v1796_v38 }
 0x161   : > { %v1295_v43 = vpop.f32.mrb[48].mxu0  ;;  %v1551_v44 = vpop.f32.mrb[48].mxu1 }
 0x162   : > { %3336 = vst [vmem:[%s3881_s18 + $0x58] sm:$0xff] %v3064_v41   ;;  %3368 = vst [vmem:[%s3881_s18 + $0x158] sm:$0xff] %v3224_v42   ;;  %v1296_v45 = vadd.f32 %v3865_v61, %v1295_v43  ;;  %v1552_v46 = vadd.f32 %v3865_v61, %v1551_v44  ;;  %v1297_v47 = vpop.f32.mrb[49].mxu0  ;;  %v1553_v48 = vpop.f32.mrb[49].mxu1 }
 0x163   : > { %v1298_v49 = vpop.f32.mrb[50].mxu0  ;;  %v1554_v50 = vpop.f32.mrb[50].mxu1 }
 0x164   : > { %v1299_v51 = vadd.f32 %v3865_v61, %v1298_v49  ;;  %v1555_v52 = vadd.f32 %v3865_v61, %v1554_v50  ;;  %v1300_v53 = vpop.f32.mrb[51].mxu0  ;;  %v1556_v54 = vpop.f32.mrb[51].mxu1  ;;  %v1734_v55 = vmax.f32 %v1296_v45, 0.0  ;;  %v1798_v56 = vmax.f32 %v1552_v46, 0.0 }
 0x166   : > { %v1735_v57 = vmax.f32 %v1299_v51, 0.0  ;;  %v1799_v58 = vmax.f32 %v1555_v52, 0.0 }
 0x168   : > { %v3069_v59 = vpack.c.bf16 %v1735_v57, %v1734_v55  ;;  %v3229_v60 = vpack.c.bf16 %v1799_v58, %v1798_v56 }
 0x169   : > { %v1303_v62 = vpop.f32.mrb[52].mxu0  ;;  %v1559_v63 = vpop.f32.mrb[52].mxu1 }
 0x16a   : > { %3337 = vst [vmem:[%s3881_s18 + $0x60] sm:$0xff] %v3069_v59   ;;  %3369 = vst [vmem:[%s3881_s18 + $0x160] sm:$0xff] %v3229_v60   ;;  %v1304_v0 = vadd.f32 %v3865_v61, %v1303_v62  ;;  %v1560_v1 = vadd.f32 %v3865_v61, %v1559_v63  ;;  %v1305_v2 = vpop.f32.mrb[53].mxu0  ;;  %v1561_v3 = vpop.f32.mrb[53].mxu1 }
 0x16b   : > { %v1306_v4 = vpop.f32.mrb[54].mxu0  ;;  %v1562_v5 = vpop.f32.mrb[54].mxu1 }
 0x16c   : > { %v1307_v6 = vadd.f32 %v3865_v61, %v1306_v4  ;;  %v1563_v7 = vadd.f32 %v3865_v61, %v1562_v5  ;;  %v1308_v8 = vpop.f32.mrb[55].mxu0  ;;  %v1564_v9 = vpop.f32.mrb[55].mxu1  ;;  %v1736_v10 = vmax.f32 %v1304_v0, 0.0  ;;  %v1800_v11 = vmax.f32 %v1560_v1, 0.0 }
 0x16e   : > { %v1737_v12 = vmax.f32 %v1307_v6, 0.0  ;;  %v1801_v13 = vmax.f32 %v1563_v7, 0.0 }
 0x170   : > { %v3074_v14 = vpack.c.bf16 %v1737_v12, %v1736_v10  ;;  %v3234_v15 = vpack.c.bf16 %v1801_v13, %v1800_v11 }
 0x171   : > { %v1311_v16 = vpop.f32.mrb[56].mxu0  ;;  %v1567_v17 = vpop.f32.mrb[56].mxu1 }
 0x172   : > { %3338 = vst [vmem:[%s3881_s18 + $0x68] sm:$0xff] %v3074_v14   ;;  %3370 = vst [vmem:[%s3881_s18 + $0x168] sm:$0xff] %v3234_v15   ;;  %v1312_v18 = vadd.f32 %v3865_v61, %v1311_v16  ;;  %v1568_v19 = vadd.f32 %v3865_v61, %v1567_v17  ;;  %v1313_v20 = vpop.f32.mrb[57].mxu0  ;;  %v1569_v21 = vpop.f32.mrb[57].mxu1 }
 0x173   : > { %v1314_v22 = vpop.f32.mrb[58].mxu0  ;;  %v1570_v23 = vpop.f32.mrb[58].mxu1 }
 0x174   : > { %v1315_v24 = vadd.f32 %v3865_v61, %v1314_v22  ;;  %v1571_v25 = vadd.f32 %v3865_v61, %v1570_v23  ;;  %v1316_v26 = vpop.f32.mrb[59].mxu0  ;;  %v1572_v27 = vpop.f32.mrb[59].mxu1  ;;  %v1738_v28 = vmax.f32 %v1312_v18, 0.0  ;;  %v1802_v29 = vmax.f32 %v1568_v19, 0.0 }
 0x176   : > { %v1739_v30 = vmax.f32 %v1315_v24, 0.0  ;;  %v1803_v31 = vmax.f32 %v1571_v25, 0.0 }
 0x178   : > { %v3079_v32 = vpack.c.bf16 %v1739_v30, %v1738_v28  ;;  %v3239_v33 = vpack.c.bf16 %v1803_v31, %v1802_v29 }
 0x179   : > { %v1319_v34 = vpop.f32.mrb[60].mxu0  ;;  %v1575_v35 = vpop.f32.mrb[60].mxu1 }
 0x17a   : > { %3339 = vst [vmem:[%s3881_s18 + $0x70] sm:$0xff] %v3079_v32   ;;  %3371 = vst [vmem:[%s3881_s18 + $0x170] sm:$0xff] %v3239_v33   ;;  %v1320_v36 = vadd.f32 %v3865_v61, %v1319_v34  ;;  %v1576_v37 = vadd.f32 %v3865_v61, %v1575_v35  ;;  %v1321_v38 = vpop.f32.mrb[61].mxu0  ;;  %v1577_v39 = vpop.f32.mrb[61].mxu1 }
 0x17b   : > { %v1322_v40 = vpop.f32.mrb[62].mxu0  ;;  %v1578_v41 = vpop.f32.mrb[62].mxu1 }
 0x17c   : > { %v1323_v42 = vadd.f32 %v3865_v61, %v1322_v40  ;;  %v1579_v43 = vadd.f32 %v3865_v61, %v1578_v41  ;;  %v1324_v44 = vpop.f32.mrb[63].mxu0  ;;  %v1580_v45 = vpop.f32.mrb[63].mxu1  ;;  %v1740_v46 = vmax.f32 %v1320_v36, 0.0  ;;  %v1804_v47 = vmax.f32 %v1576_v37, 0.0 }
 0x17e   : > { %v1741_v48 = vmax.f32 %v1323_v42, 0.0  ;;  %v1805_v49 = vmax.f32 %v1579_v43, 0.0 }
 0x180   : > { %v3084_v50 = vpack.c.bf16 %v1741_v48, %v1740_v46  ;;  %v3244_v51 = vpack.c.bf16 %v1805_v49, %v1804_v47 }
 0x181   : > { %v1327_v52 = vpop.f32.mrb[64].mxu0  ;;  %v1583_v53 = vpop.f32.mrb[64].mxu1 }
 0x182   : > { %3340 = vst [vmem:[%s3881_s18 + $0x78] sm:$0xff] %v3084_v50   ;;  %3372 = vst [vmem:[%s3881_s18 + $0x178] sm:$0xff] %v3244_v51   ;;  %v1328_v54 = vadd.f32 %v3865_v61, %v1327_v52  ;;  %v1584_v55 = vadd.f32 %v3865_v61, %v1583_v53  ;;  %v1329_v56 = vpop.f32.mrb[65].mxu0  ;;  %v1585_v57 = vpop.f32.mrb[65].mxu1 }
 0x183   : > { %v1330_v58 = vpop.f32.mrb[66].mxu0  ;;  %v1586_v59 = vpop.f32.mrb[66].mxu1 }
 0x184   : > { %v1331_v60 = vadd.f32 %v3865_v61, %v1330_v58  ;;  %v1587_v62 = vadd.f32 %v3865_v61, %v1586_v59  ;;  %v1332_v63 = vpop.f32.mrb[67].mxu0  ;;  %v1588_v0 = vpop.f32.mrb[67].mxu1  ;;  %v1742_v1 = vmax.f32 %v1328_v54, 0.0  ;;  %v1806_v2 = vmax.f32 %v1584_v55, 0.0 }
 0x186   : > { %v1743_v3 = vmax.f32 %v1331_v60, 0.0  ;;  %v1807_v4 = vmax.f32 %v1587_v62, 0.0 }
 0x188   : > { %v3089_v5 = vpack.c.bf16 %v1743_v3, %v1742_v1  ;;  %v3249_v6 = vpack.c.bf16 %v1807_v4, %v1806_v2 }
 0x189   : > { %v1335_v7 = vpop.f32.mrb[68].mxu0  ;;  %v1591_v8 = vpop.f32.mrb[68].mxu1 }
 0x18a   : > { %3341 = vst [vmem:[%s3881_s18 + $0x80] sm:$0xff] %v3089_v5   ;;  %3373 = vst [vmem:[%s3881_s18 + $0x180] sm:$0xff] %v3249_v6   ;;  %v1336_v9 = vadd.f32 %v3865_v61, %v1335_v7  ;;  %v1592_v10 = vadd.f32 %v3865_v61, %v1591_v8  ;;  %v1337_v11 = vpop.f32.mrb[69].mxu0  ;;  %v1593_v12 = vpop.f32.mrb[69].mxu1 }
 0x18b   : > { %v1338_v13 = vpop.f32.mrb[70].mxu0  ;;  %v1594_v14 = vpop.f32.mrb[70].mxu1 }
 0x18c   : > { %v1339_v15 = vadd.f32 %v3865_v61, %v1338_v13  ;;  %v1595_v16 = vadd.f32 %v3865_v61, %v1594_v14  ;;  %v1340_v17 = vpop.f32.mrb[71].mxu0  ;;  %v1596_v18 = vpop.f32.mrb[71].mxu1  ;;  %v1744_v19 = vmax.f32 %v1336_v9, 0.0  ;;  %v1808_v20 = vmax.f32 %v1592_v10, 0.0 }
 0x18e   : > { %v1745_v21 = vmax.f32 %v1339_v15, 0.0  ;;  %v1809_v22 = vmax.f32 %v1595_v16, 0.0 }
 0x190   : > { %v3094_v23 = vpack.c.bf16 %v1745_v21, %v1744_v19  ;;  %v3254_v24 = vpack.c.bf16 %v1809_v22, %v1808_v20 }
 0x191   : > { %v1343_v25 = vpop.f32.mrb[72].mxu0  ;;  %v1599_v26 = vpop.f32.mrb[72].mxu1 }
 0x192   : > { %3342 = vst [vmem:[%s3881_s18 + $0x88] sm:$0xff] %v3094_v23   ;;  %3374 = vst [vmem:[%s3881_s18 + $0x188] sm:$0xff] %v3254_v24   ;;  %v1344_v27 = vadd.f32 %v3865_v61, %v1343_v25  ;;  %v1600_v28 = vadd.f32 %v3865_v61, %v1599_v26  ;;  %v1345_v29 = vpop.f32.mrb[73].mxu0  ;;  %v1601_v30 = vpop.f32.mrb[73].mxu1 }
 0x193   : > { %v1346_v31 = vpop.f32.mrb[74].mxu0  ;;  %v1602_v32 = vpop.f32.mrb[74].mxu1 }
 0x194   : > { %v1347_v33 = vadd.f32 %v3865_v61, %v1346_v31  ;;  %v1603_v34 = vadd.f32 %v3865_v61, %v1602_v32  ;;  %v1348_v35 = vpop.f32.mrb[75].mxu0  ;;  %v1604_v36 = vpop.f32.mrb[75].mxu1  ;;  %v1746_v37 = vmax.f32 %v1344_v27, 0.0  ;;  %v1810_v38 = vmax.f32 %v1600_v28, 0.0 }
 0x196   : > { %v1747_v39 = vmax.f32 %v1347_v33, 0.0  ;;  %v1811_v40 = vmax.f32 %v1603_v34, 0.0 }
 0x198   : > { %v3099_v41 = vpack.c.bf16 %v1747_v39, %v1746_v37  ;;  %v3259_v42 = vpack.c.bf16 %v1811_v40, %v1810_v38 }
 0x199   : > { %v1351_v43 = vpop.f32.mrb[76].mxu0  ;;  %v1607_v44 = vpop.f32.mrb[76].mxu1 }
 0x19a   : > { %3343 = vst [vmem:[%s3881_s18 + $0x90] sm:$0xff] %v3099_v41   ;;  %3375 = vst [vmem:[%s3881_s18 + $0x190] sm:$0xff] %v3259_v42   ;;  %v1352_v45 = vadd.f32 %v3865_v61, %v1351_v43  ;;  %v1608_v46 = vadd.f32 %v3865_v61, %v1607_v44  ;;  %v1353_v47 = vpop.f32.mrb[77].mxu0  ;;  %v1609_v48 = vpop.f32.mrb[77].mxu1 }
 0x19b   : > { %v1354_v49 = vpop.f32.mrb[78].mxu0  ;;  %v1610_v50 = vpop.f32.mrb[78].mxu1 }
 0x19c   : > { %v1355_v51 = vadd.f32 %v3865_v61, %v1354_v49  ;;  %v1611_v52 = vadd.f32 %v3865_v61, %v1610_v50  ;;  %v1356_v53 = vpop.f32.mrb[79].mxu0  ;;  %v1612_v54 = vpop.f32.mrb[79].mxu1  ;;  %v1748_v55 = vmax.f32 %v1352_v45, 0.0  ;;  %v1812_v56 = vmax.f32 %v1608_v46, 0.0 }
 0x19e   : > { %v1749_v57 = vmax.f32 %v1355_v51, 0.0  ;;  %v1813_v58 = vmax.f32 %v1611_v52, 0.0 }
 0x1a0   : > { %v3104_v59 = vpack.c.bf16 %v1749_v57, %v1748_v55  ;;  %v3264_v60 = vpack.c.bf16 %v1813_v58, %v1812_v56 }
 0x1a1   : > { %v1359_v62 = vpop.f32.mrb[80].mxu0  ;;  %v1615_v63 = vpop.f32.mrb[80].mxu1 }
 0x1a2   : > { %3344 = vst [vmem:[%s3881_s18 + $0x98] sm:$0xff] %v3104_v59   ;;  %3376 = vst [vmem:[%s3881_s18 + $0x198] sm:$0xff] %v3264_v60   ;;  %v1360_v0 = vadd.f32 %v3865_v61, %v1359_v62  ;;  %v1616_v1 = vadd.f32 %v3865_v61, %v1615_v63  ;;  %v1361_v2 = vpop.f32.mrb[81].mxu0  ;;  %v1617_v3 = vpop.f32.mrb[81].mxu1 }
 0x1a3   : > { %v1362_v4 = vpop.f32.mrb[82].mxu0  ;;  %v1618_v5 = vpop.f32.mrb[82].mxu1 }
 0x1a4   : > { %v1363_v6 = vadd.f32 %v3865_v61, %v1362_v4  ;;  %v1619_v7 = vadd.f32 %v3865_v61, %v1618_v5  ;;  %v1364_v8 = vpop.f32.mrb[83].mxu0  ;;  %v1620_v9 = vpop.f32.mrb[83].mxu1  ;;  %v1750_v10 = vmax.f32 %v1360_v0, 0.0  ;;  %v1814_v11 = vmax.f32 %v1616_v1, 0.0 }
 0x1a5   : > { %v4048_v9 = vld [vmem:[%s4103_s2] ss:$0 sm:$0xff] }
 0x1a6   : > { %v1751_v12 = vmax.f32 %v1363_v6, 0.0  ;;  %v1815_v13 = vmax.f32 %v1619_v7, 0.0 }
 0x1a8   : > { %v3109_v14 = vpack.c.bf16 %v1751_v12, %v1750_v10  ;;  %v3269_v15 = vpack.c.bf16 %v1815_v13, %v1814_v11 }
 0x1a9   : > { %v1367_v16 = vpop.f32.mrb[84].mxu0  ;;  %v1623_v17 = vpop.f32.mrb[84].mxu1 }
 0x1aa   : > { %3345 = vst [vmem:[%s3881_s18 + $0xa0] sm:$0xff] %v3109_v14   ;;  %3377 = vst [vmem:[%s3881_s18 + $0x1a0] sm:$0xff] %v3269_v15   ;;  %v1368_v18 = vadd.f32 %v3865_v61, %v1367_v16  ;;  %v1624_v19 = vadd.f32 %v3865_v61, %v1623_v17  ;;  %v1369_v20 = vpop.f32.mrb[85].mxu0  ;;  %v1625_v21 = vpop.f32.mrb[85].mxu1 }
 0x1ab   : > { %v1370_v22 = vpop.f32.mrb[86].mxu0  ;;  %v1626_v23 = vpop.f32.mrb[86].mxu1 }
 0x1ac   : > { %v1371_v24 = vadd.f32 %v3865_v61, %v1370_v22  ;;  %v1627_v25 = vadd.f32 %v3865_v61, %v1626_v23  ;;  %v1372_v26 = vpop.f32.mrb[87].mxu0  ;;  %v1628_v27 = vpop.f32.mrb[87].mxu1  ;;  %v1752_v28 = vmax.f32 %v1368_v18, 0.0  ;;  %v1816_v29 = vmax.f32 %v1624_v19, 0.0 }
 0x1ae   : > { %v1753_v30 = vmax.f32 %v1371_v24, 0.0  ;;  %v1817_v31 = vmax.f32 %v1627_v25, 0.0 }
 0x1b0   : > { %v3114_v32 = vpack.c.bf16 %v1753_v30, %v1752_v28  ;;  %v3274_v33 = vpack.c.bf16 %v1817_v31, %v1816_v29 }
 0x1b1   : > { %v1375_v34 = vpop.f32.mrb[88].mxu0  ;;  %v1631_v35 = vpop.f32.mrb[88].mxu1 }
 0x1b2   : > { %3346 = vst [vmem:[%s3881_s18 + $0xa8] sm:$0xff] %v3114_v32   ;;  %3378 = vst [vmem:[%s3881_s18 + $0x1a8] sm:$0xff] %v3274_v33   ;;  %v1376_v36 = vadd.f32 %v3865_v61, %v1375_v34  ;;  %v1632_v37 = vadd.f32 %v3865_v61, %v1631_v35  ;;  %v1377_v38 = vpop.f32.mrb[89].mxu0  ;;  %v1633_v39 = vpop.f32.mrb[89].mxu1 }
 0x1b3   : > { %v1378_v40 = vpop.f32.mrb[90].mxu0  ;;  %v1634_v41 = vpop.f32.mrb[90].mxu1 }
 0x1b4   : > { %v1379_v42 = vadd.f32 %v3865_v61, %v1378_v40  ;;  %v1635_v43 = vadd.f32 %v3865_v61, %v1634_v41  ;;  %v1380_v44 = vpop.f32.mrb[91].mxu0  ;;  %v1636_v45 = vpop.f32.mrb[91].mxu1  ;;  %v1754_v46 = vmax.f32 %v1376_v36, 0.0  ;;  %v1818_v47 = vmax.f32 %v1632_v37, 0.0 }
 0x1b6   : > { %v1755_v48 = vmax.f32 %v1379_v42, 0.0  ;;  %v1819_v49 = vmax.f32 %v1635_v43, 0.0 }
 0x1b8   : > { %v3119_v50 = vpack.c.bf16 %v1755_v48, %v1754_v46  ;;  %v3279_v51 = vpack.c.bf16 %v1819_v49, %v1818_v47 }
 0x1b9   : > { %v1383_v52 = vpop.f32.mrb[92].mxu0  ;;  %v1639_v53 = vpop.f32.mrb[92].mxu1 }
 0x1ba   : > { %3347 = vst [vmem:[%s3881_s18 + $0xb0] sm:$0xff] %v3119_v50   ;;  %3379 = vst [vmem:[%s3881_s18 + $0x1b0] sm:$0xff] %v3279_v51   ;;  %v1384_v54 = vadd.f32 %v3865_v61, %v1383_v52  ;;  %v1640_v55 = vadd.f32 %v3865_v61, %v1639_v53  ;;  %v1385_v56 = vpop.f32.mrb[93].mxu0  ;;  %v1641_v57 = vpop.f32.mrb[93].mxu1 }
 0x1bb   : > { %v1386_v58 = vpop.f32.mrb[94].mxu0  ;;  %v1642_v59 = vpop.f32.mrb[94].mxu1 }
 0x1bc   : > { %v1387_v60 = vadd.f32 %v3865_v61, %v1386_v58  ;;  %v1643_v62 = vadd.f32 %v3865_v61, %v1642_v59  ;;  %v1388_v63 = vpop.f32.mrb[95].mxu0  ;;  %v1644_v0 = vpop.f32.mrb[95].mxu1  ;;  %v1756_v1 = vmax.f32 %v1384_v54, 0.0  ;;  %v1820_v2 = vmax.f32 %v1640_v55, 0.0 }
 0x1be   : > { %v1757_v3 = vmax.f32 %v1387_v60, 0.0  ;;  %v1821_v4 = vmax.f32 %v1643_v62, 0.0 }
 0x1c0   : > { %v3124_v5 = vpack.c.bf16 %v1757_v3, %v1756_v1  ;;  %v3284_v6 = vpack.c.bf16 %v1821_v4, %v1820_v2 }
 0x1c1   : > { %v1391_v7 = vpop.f32.mrb[96].mxu0  ;;  %v1647_v8 = vpop.f32.mrb[96].mxu1 }
 0x1c2   : > { %3348 = vst [vmem:[%s3881_s18 + $0xb8] sm:$0xff] %v3124_v5   ;;  %3380 = vst [vmem:[%s3881_s18 + $0x1b8] sm:$0xff] %v3284_v6   ;;  %v1392_v10 = vadd.f32 %v4048_v9, %v1391_v7  ;;  %v1648_v61 = vadd.f32 %v4048_v9, %v1647_v8  ;;  %v1393_v11 = vpop.f32.mrb[97].mxu0  ;;  %v1649_v12 = vpop.f32.mrb[97].mxu1 }
 0x1c3   : > { %v1394_v13 = vpop.f32.mrb[98].mxu0  ;;  %v1650_v14 = vpop.f32.mrb[98].mxu1 }
 0x1c4   : > { %v1395_v15 = vadd.f32 %v4048_v9, %v1394_v13  ;;  %v1651_v16 = vadd.f32 %v4048_v9, %v1650_v14  ;;  %v1396_v17 = vpop.f32.mrb[99].mxu0  ;;  %v1652_v18 = vpop.f32.mrb[99].mxu1  ;;  %v1758_v19 = vmax.f32 %v1392_v10, 0.0  ;;  %v1822_v20 = vmax.f32 %v1648_v61, 0.0 }
 0x1c6   : > { %v1759_v21 = vmax.f32 %v1395_v15, 0.0  ;;  %v1823_v22 = vmax.f32 %v1651_v16, 0.0 }
 0x1c8   : > { %v3129_v23 = vpack.c.bf16 %v1759_v21, %v1758_v19  ;;  %v3289_v24 = vpack.c.bf16 %v1823_v22, %v1822_v20 }
 0x1c9   : > { %v1399_v25 = vpop.f32.mrb[100].mxu0  ;;  %v1655_v26 = vpop.f32.mrb[100].mxu1 }
 0x1ca   : > { %3349 = vst [vmem:[%s3881_s18 + $0xc0] sm:$0xff] %v3129_v23   ;;  %3381 = vst [vmem:[%s3881_s18 + $0x1c0] sm:$0xff] %v3289_v24   ;;  %v1400_v27 = vadd.f32 %v4048_v9, %v1399_v25  ;;  %v1656_v28 = vadd.f32 %v4048_v9, %v1655_v26  ;;  %v1401_v29 = vpop.f32.mrb[101].mxu0  ;;  %v1657_v30 = vpop.f32.mrb[101].mxu1 }
 0x1cb   : > { %v1402_v31 = vpop.f32.mrb[102].mxu0  ;;  %v1658_v32 = vpop.f32.mrb[102].mxu1 }
 0x1cc   : > { %v1403_v33 = vadd.f32 %v4048_v9, %v1402_v31  ;;  %v1659_v34 = vadd.f32 %v4048_v9, %v1658_v32  ;;  %v1404_v35 = vpop.f32.mrb[103].mxu0  ;;  %v1660_v36 = vpop.f32.mrb[103].mxu1  ;;  %v1760_v37 = vmax.f32 %v1400_v27, 0.0  ;;  %v1824_v38 = vmax.f32 %v1656_v28, 0.0 }
 0x1ce   : > { %v1761_v39 = vmax.f32 %v1403_v33, 0.0  ;;  %v1825_v40 = vmax.f32 %v1659_v34, 0.0 }
 0x1d0   : > { %v3134_v41 = vpack.c.bf16 %v1761_v39, %v1760_v37  ;;  %v3294_v42 = vpack.c.bf16 %v1825_v40, %v1824_v38 }
 0x1d1   : > { %v1407_v43 = vpop.f32.mrb[104].mxu0  ;;  %v1663_v44 = vpop.f32.mrb[104].mxu1 }
 0x1d2   : > { %3350 = vst [vmem:[%s3881_s18 + $0xc8] sm:$0xff] %v3134_v41   ;;  %3382 = vst [vmem:[%s3881_s18 + $0x1c8] sm:$0xff] %v3294_v42   ;;  %v1408_v45 = vadd.f32 %v4048_v9, %v1407_v43  ;;  %v1664_v46 = vadd.f32 %v4048_v9, %v1663_v44  ;;  %v1409_v47 = vpop.f32.mrb[105].mxu0  ;;  %v1665_v48 = vpop.f32.mrb[105].mxu1 }
 0x1d3   : > { %v1410_v49 = vpop.f32.mrb[106].mxu0  ;;  %v1666_v50 = vpop.f32.mrb[106].mxu1 }
 0x1d4   : > { %v1411_v51 = vadd.f32 %v4048_v9, %v1410_v49  ;;  %v1667_v52 = vadd.f32 %v4048_v9, %v1666_v50  ;;  %v1412_v53 = vpop.f32.mrb[107].mxu0  ;;  %v1668_v54 = vpop.f32.mrb[107].mxu1  ;;  %v1762_v55 = vmax.f32 %v1408_v45, 0.0  ;;  %v1826_v56 = vmax.f32 %v1664_v46, 0.0 }
 0x1d6   : > { %v1763_v57 = vmax.f32 %v1411_v51, 0.0  ;;  %v1827_v58 = vmax.f32 %v1667_v52, 0.0 }
 0x1d8   : > { %v3139_v59 = vpack.c.bf16 %v1763_v57, %v1762_v55  ;;  %v3299_v60 = vpack.c.bf16 %v1827_v58, %v1826_v56 }
 0x1d9   : > { %v1415_v62 = vpop.f32.mrb[108].mxu0  ;;  %v1671_v63 = vpop.f32.mrb[108].mxu1 }
 0x1da   : > { %3351 = vst [vmem:[%s3881_s18 + $0xd0] sm:$0xff] %v3139_v59   ;;  %3383 = vst [vmem:[%s3881_s18 + $0x1d0] sm:$0xff] %v3299_v60   ;;  %v1416_v0 = vadd.f32 %v4048_v9, %v1415_v62  ;;  %v1672_v1 = vadd.f32 %v4048_v9, %v1671_v63  ;;  %v1417_v2 = vpop.f32.mrb[109].mxu0  ;;  %v1673_v3 = vpop.f32.mrb[109].mxu1 }
 0x1db   : > { %v1418_v4 = vpop.f32.mrb[110].mxu0  ;;  %v1674_v5 = vpop.f32.mrb[110].mxu1 }
 0x1dc   : > { %v1419_v6 = vadd.f32 %v4048_v9, %v1418_v4  ;;  %v1675_v7 = vadd.f32 %v4048_v9, %v1674_v5  ;;  %v1420_v8 = vpop.f32.mrb[111].mxu0  ;;  %v1676_v10 = vpop.f32.mrb[111].mxu1  ;;  %v1764_v61 = vmax.f32 %v1416_v0, 0.0  ;;  %v1828_v11 = vmax.f32 %v1672_v1, 0.0 }
 0x1de   : > { %v1765_v12 = vmax.f32 %v1419_v6, 0.0  ;;  %v1829_v13 = vmax.f32 %v1675_v7, 0.0 }
 0x1e0   : > { %v3144_v14 = vpack.c.bf16 %v1765_v12, %v1764_v61  ;;  %v3304_v15 = vpack.c.bf16 %v1829_v13, %v1828_v11 }
 0x1e1   : > { %v1423_v16 = vpop.f32.mrb[112].mxu0  ;;  %v1679_v17 = vpop.f32.mrb[112].mxu1 }
 0x1e2   : > { %3352 = vst [vmem:[%s3881_s18 + $0xd8] sm:$0xff] %v3144_v14   ;;  %3384 = vst [vmem:[%s3881_s18 + $0x1d8] sm:$0xff] %v3304_v15   ;;  %v1424_v18 = vadd.f32 %v4048_v9, %v1423_v16  ;;  %v1680_v19 = vadd.f32 %v4048_v9, %v1679_v17  ;;  %v1425_v20 = vpop.f32.mrb[113].mxu0  ;;  %v1681_v21 = vpop.f32.mrb[113].mxu1 }
 0x1e3   : > { %v1426_v22 = vpop.f32.mrb[114].mxu0  ;;  %v1682_v23 = vpop.f32.mrb[114].mxu1 }
 0x1e4   : > { %v1427_v24 = vadd.f32 %v4048_v9, %v1426_v22  ;;  %v1683_v25 = vadd.f32 %v4048_v9, %v1682_v23  ;;  %v1428_v26 = vpop.f32.mrb[115].mxu0  ;;  %v1684_v27 = vpop.f32.mrb[115].mxu1  ;;  %v1766_v28 = vmax.f32 %v1424_v18, 0.0  ;;  %v1830_v29 = vmax.f32 %v1680_v19, 0.0 }
 0x1e6   : > { %v1767_v30 = vmax.f32 %v1427_v24, 0.0  ;;  %v1831_v31 = vmax.f32 %v1683_v25, 0.0 }
 0x1e8   : > { %v3149_v32 = vpack.c.bf16 %v1767_v30, %v1766_v28  ;;  %v3309_v33 = vpack.c.bf16 %v1831_v31, %v1830_v29 }
 0x1e9   : > { %v1431_v34 = vpop.f32.mrb[116].mxu0  ;;  %v1687_v35 = vpop.f32.mrb[116].mxu1 }
 0x1ea   : > { %3353 = vst [vmem:[%s3881_s18 + $0xe0] sm:$0xff] %v3149_v32   ;;  %3385 = vst [vmem:[%s3881_s18 + $0x1e0] sm:$0xff] %v3309_v33   ;;  %v1432_v36 = vadd.f32 %v4048_v9, %v1431_v34  ;;  %v1688_v37 = vadd.f32 %v4048_v9, %v1687_v35  ;;  %v1433_v38 = vpop.f32.mrb[117].mxu0  ;;  %v1689_v39 = vpop.f32.mrb[117].mxu1 }
 0x1eb   : > { %v1434_v40 = vpop.f32.mrb[118].mxu0  ;;  %v1690_v41 = vpop.f32.mrb[118].mxu1 }
 0x1ec   : > { %v1435_v42 = vadd.f32 %v4048_v9, %v1434_v40  ;;  %v1691_v43 = vadd.f32 %v4048_v9, %v1690_v41  ;;  %v1436_v44 = vpop.f32.mrb[119].mxu0  ;;  %v1692_v45 = vpop.f32.mrb[119].mxu1  ;;  %v1768_v46 = vmax.f32 %v1432_v36, 0.0  ;;  %v1832_v47 = vmax.f32 %v1688_v37, 0.0 }
 0x1ee   : > { %v1769_v48 = vmax.f32 %v1435_v42, 0.0  ;;  %v1833_v49 = vmax.f32 %v1691_v43, 0.0 }
 0x1f0   : > { %v3154_v50 = vpack.c.bf16 %v1769_v48, %v1768_v46  ;;  %v3314_v51 = vpack.c.bf16 %v1833_v49, %v1832_v47 }
 0x1f1   : > { %v1439_v52 = vpop.f32.mrb[120].mxu0  ;;  %v1695_v53 = vpop.f32.mrb[120].mxu1 }
 0x1f2   : > { %3354 = vst [vmem:[%s3881_s18 + $0xe8] sm:$0xff] %v3154_v50   ;;  %3386 = vst [vmem:[%s3881_s18 + $0x1e8] sm:$0xff] %v3314_v51   ;;  %v1440_v54 = vadd.f32 %v4048_v9, %v1439_v52  ;;  %v1696_v55 = vadd.f32 %v4048_v9, %v1695_v53  ;;  %v1441_v56 = vpop.f32.mrb[121].mxu0  ;;  %v1697_v57 = vpop.f32.mrb[121].mxu1 }
 0x1f3   : > { %v1442_v58 = vpop.f32.mrb[122].mxu0  ;;  %v1698_v59 = vpop.f32.mrb[122].mxu1 }
 0x1f4   : > { %v1443_v60 = vadd.f32 %v4048_v9, %v1442_v58  ;;  %v1699_v62 = vadd.f32 %v4048_v9, %v1698_v59  ;;  %v1444_v63 = vpop.f32.mrb[123].mxu0  ;;  %v1700_v0 = vpop.f32.mrb[123].mxu1  ;;  %v1770_v1 = vmax.f32 %v1440_v54, 0.0  ;;  %v1834_v2 = vmax.f32 %v1696_v55, 0.0 }
 0x1f6   : > { %v1771_v3 = vmax.f32 %v1443_v60, 0.0  ;;  %v1835_v4 = vmax.f32 %v1699_v62, 0.0 }
 0x1f8   : > { %v3159_v5 = vpack.c.bf16 %v1771_v3, %v1770_v1  ;;  %v3319_v6 = vpack.c.bf16 %v1835_v4, %v1834_v2 }
 0x1f9   : > { %v1447_v7 = vpop.f32.mrb[124].mxu0  ;;  %v1703_v8 = vpop.f32.mrb[124].mxu1 }
 0x1fa   : > { %3355 = vst [vmem:[%s3881_s18 + $0xf0] sm:$0xff] %v3159_v5   ;;  %3387 = vst [vmem:[%s3881_s18 + $0x1f0] sm:$0xff] %v3319_v6   ;;  %v1448_v10 = vadd.f32 %v4048_v9, %v1447_v7  ;;  %v1704_v61 = vadd.f32 %v4048_v9, %v1703_v8  ;;  %v1449_v11 = vpop.f32.mrb[125].mxu0  ;;  %v1705_v12 = vpop.f32.mrb[125].mxu1 }
 0x1fb   : > { %v1450_v13 = vpop.f32.mrb[126].mxu0  ;;  %v1706_v14 = vpop.f32.mrb[126].mxu1 }
 0x1fc   : > { %v1451_v15 = vadd.f32 %v4048_v9, %v1450_v13  ;;  %v1707_v16 = vadd.f32 %v4048_v9, %v1706_v14  ;;  %v1452_v17 = vpop.f32.mrb[127].mxu0  ;;  %v1708_v18 = vpop.f32.mrb[127].mxu1  ;;  %v1772_v19 = vmax.f32 %v1448_v10, 0.0  ;;  %v1836_v20 = vmax.f32 %v1704_v61, 0.0 }
 0x1fe   : > { %v1773_v21 = vmax.f32 %v1451_v15, 0.0  ;;  %v1837_v22 = vmax.f32 %v1707_v16, 0.0 }
 0x200   : > { %v3164_v23 = vpack.c.bf16 %v1773_v21, %v1772_v19  ;;  %v3324_v24 = vpack.c.bf16 %v1837_v22, %v1836_v20 }
 0x202   : > { %3356 = vst [vmem:[%s3881_s18 + $0xf8] sm:$0xff] %v3164_v23   ;;  %3388 = vst [vmem:[%s3881_s18 + $0x1f8] sm:$0xff] %v3324_v24  }
 0x203 PF: > { %s13_s12 = sadd.s32 1, %s3628_s12  }
 0x204   : > { %p10_p4 = scmp.ge.s32.totalorder %s13_s12, 4  }
 0x206   :  { %12 = sbr.rel (!%p10_p4) target bundleno = 1 (0x1), region = 62 }

// kernel: base_model_forward.7
= control target key start
LH: loop header
LB: loop body
LE: loop exit
PB: predicated region body
PF: predicated region fallthrough
CT: control target
= control target key end

     0   :  { %s882_s12 = smov 0   ;;  %s984_s0 = inlined_call_operand.vmem [shape: bf16[128,288], index: 0, kind: input, shape index: {}]   ;;  %s985_s1 = inlined_call_operand.vmem [shape: bf16[288,128], index: 1, kind: input, shape index: {}]   ;;  %s986_s2 = inlined_call_operand.vmem [shape: f32[1,128], index: 2, kind: input, shape index: {}]   ;;  %s987_s3 = inlined_call_operand.vmem [shape: bf16[128,128], index: 3, kind: output, shape index: {}]  }
   0x1 LB: > { %s652_s13 = sadd.s32 4294967295, %s860_s12   ;;  %p656_p0 = scmp.ge.s32.totalorder %s860_s12, 1  ;;  %s860_s12 = sphi %s882_s12, %s13_s12  }
   0x2   : > { %p139_p1 = scmp.lt.s32.totalorder %s860_s12, 3 }
   0x4   : > { %p140_p2 = pnand %p656_p0, %p139_p1 }
   0x5   : > { %v820_v0 = vld [vmem:[%s985_s1 + $0x40] sm:$0xff] (!%p140_p2)   ;;  %s657_s16 = sshll.u32 (!%p140_p2), %s652_s13, 3  ;;  %v822_v2 = vld [vmem:[%s985_s1 + $0x48] sm:$0xff] (!%p140_p2)   ;;  %v824_v4 = vld [vmem:[%s985_s1 + $0x50] sm:$0xff] (!%p140_p2)   ;;  %vm405_vm0 = vcmask (!%p140_p2), 261120  }
   0x6   : > { %143 = sbr.rel (%p140_p2) target bundleno = 280 (0x118), region = 32  ;;  %v821_v1 = vld [vmem:[%s985_s1] sm:$0xff] (!%p140_p2)   ;;  %737 = vmatprep.subr.bf16.mxu0 (!%p140_p2), %v820_v0  ;;  %795 = vmatprep.subr.bf16.mxu1 (!%p140_p2), %v820_v0  ;;  %p165_p3 = scmp.lt.s32.totalorder (!%p140_p2), %s657_s16, 15  ;;  %v823_v3 = vld [vmem:[%s985_s1 + $0x8] sm:$0xff] (!%p140_p2)   ;;  %v825_v5 = vld [vmem:[%s985_s1 + $0x10] sm:$0xff] (!%p140_p2)  }
   0x7   : > { %738 = vmatpush3.bf16.msra.mxu0 (!%p140_p2), %v821_v1  ;;  %803 = vmatpush3.bf16.msra.mxu1 (!%p140_p2), %v821_v1  ;;  %v826_v6 = vld [vmem:[%s985_s1 + $0x58] sm:$0xff] (!%p140_p2)   ;;  %v828_v8 = vld [vmem:[%s985_s1 + $0x60] sm:$0xff] (!%p140_p2)   ;;  %v830_v10 = vld [vmem:[%s985_s1 + $0x68] sm:$0xff] (!%p140_p2)  }
   0x8   : > { %739 = vmatprep.subr.bf16.mxu0 (!%p140_p2), %v822_v2  ;;  %796 = vmatprep.subr.bf16.mxu1 (!%p140_p2), %v822_v2  ;;  %v827_v7 = vld [vmem:[%s985_s1 + $0x18] sm:$0xff] (!%p140_p2)   ;;  %v829_v9 = vld [vmem:[%s985_s1 + $0x20] sm:$0xff] (!%p140_p2)   ;;  %v831_v13 = vld [vmem:[%s985_s1 + $0x28] sm:$0xff] (!%p140_p2)  }
   0x9   : > { %v832_v14 = vld [vmem:[%s985_s1 + $0x70] sm:$0xff] (!%p140_p2)   ;;  %v834_v16 = vld [vmem:[%s985_s1 + $0x78] sm:$0xff] (!%p140_p2)   ;;  %v842_v18 = vld [vmem:[%s985_s1 + $0x80] sm:$0xff] (!%p140_p2)  }
   0xa   : > { %v833_v15 = vld [vmem:[%s985_s1 + $0x30] sm:$0xff] (!%p140_p2)   ;;  %v835_v17 = vld [vmem:[%s985_s1 + $0x38] sm:$0xff] (!%p140_p2)   ;;  %v843_v22 = vld [vmem:[%s985_s1 + $0x88] sm:$0xff] (!%p140_p2)  }
   0xb   : > { %740 = vmatpush3.bf16.msra.mxu0 (!%p140_p2), %v823_v3  ;;  %804 = vmatpush3.bf16.msra.mxu1 (!%p140_p2), %v823_v3  ;;  %v661_v42 = vld [vmem:[%s986_s2] ss:$0 sm:$0xff] (!%p140_p2) }
   0xc   : > { %741 = vmatprep.subr.bf16.mxu0 (!%p140_p2), %v824_v4  ;;  %797 = vmatprep.subr.bf16.mxu1 (!%p140_p2), %v824_v4 }
   0xd   : > { %s989_s16 = smov (!%p165_p3, %s657_s16), 15 }
   0xe   : > { %s811_s29 = smul.u32 12, %s989_s16  ;;  %s660_s5 = sshll.u32 %s989_s16, 2 }
   0xf   : > { %742 = vmatpush3.bf16.msra.mxu0 %v825_v5  ;;  %805 = vmatpush3.bf16.msra.mxu1 %v825_v5  ;;  %s975_s8 = scalar_lea.vmem %s987_s3, %s660_s5 }
  0x10   : > { %743 = vmatprep.subr.bf16.mxu0 %v826_v6  ;;  %798 = vmatprep.subr.bf16.mxu1 %v826_v6  ;;  %s923_s9 = scalar_lea.vmem %s984_s0, %s811_s29 }
  0x11   : > { %v838_v11 = vld [vmem:[%s923_s9 + $0x4] ss:$12 sps:$4 sm:$0xff]   ;;  %v841_v12 = vld [vmem:[%s923_s9 + $0x4c] ss:$12 sps:$4 sm:$0xff]   ;;  %v839_v20 = vld [vmem:[%s923_s9 + $0x48] ss:$12 sps:$4 sm:$0xff]  }
  0x12   : > { %450 = vmatprep.mubr.bf16.mxu0 %v838_v11  ;;  %474 = vmatprep.mubr.bf16.mxu1 %v841_v12  ;;  %v836_v19 = vld [vmem:[%s923_s9] ss:$12 sps:$4 sm:$0xff]   ;;  %v844_v21 = vld [vmem:[%s923_s9 + $0x1c] ss:$12 sps:$4 sm:$0xff]   ;;  %v847_v24 = vld [vmem:[%s923_s9 + $0x18] ss:$12 sps:$4 sm:$0xff]  }
  0x13   : > { %744 = vmatpush3.bf16.msra.mxu0 %v827_v7  ;;  %806 = vmatpush3.bf16.msra.mxu1 %v827_v7  ;;  %v846_v23 = vld [vmem:[%s923_s9 + $0x8] ss:$12 sps:$4 sm:$0xff]   ;;  %v848_v25 = vld [vmem:[%s923_s9 + $0x20] ss:$12 sps:$4 sm:$0xff]   ;;  %v851_v27 = vld [vmem:[%s923_s9 + $0x38] ss:$12 sps:$4 sm:$0xff]  }
  0x14   : > { %745 = vmatprep.subr.bf16.mxu0 %v828_v8  ;;  %799 = vmatprep.subr.bf16.mxu1 %v828_v8  ;;  %v849_v26 = vld [vmem:[%s923_s9 + $0x34] ss:$12 sps:$4 sm:$0xff]   ;;  %v852_v28 = vld [vmem:[%s923_s9 + $0x30] ss:$12 sps:$4 sm:$0xff]  }
  0x15   : > { %v853_v29 = vld [vmem:[%s923_s9 + $0x50] ss:$12 sps:$4 sm:$0xff]  }
  0x17   : > { %746 = vmatpush3.bf16.msra.mxu0 %v829_v9  ;;  %807 = vmatpush3.bf16.msra.mxu1 %v829_v9 }
  0x18   : > { %747 = vmatprep.subr.bf16.mxu0 %v830_v10  ;;  %800 = vmatprep.subr.bf16.mxu1 %v830_v10 }
  0x1b   : > { %748 = vmatpush3.bf16.msra.mxu0 %v831_v13  ;;  %808 = vmatpush3.bf16.msra.mxu1 %v831_v13 }
  0x1c   : > { %749 = vmatprep.subr.bf16.mxu0 %v832_v14  ;;  %801 = vmatprep.subr.bf16.mxu1 %v832_v14 }
  0x1f   : > { %750 = vmatpush3.bf16.msra.mxu0 %v833_v15  ;;  %809 = vmatpush3.bf16.msra.mxu1 %v833_v15 }
  0x20   : > { %751 = vmatprep.subr.bf16.mxu0 %v834_v16  ;;  %802 = vmatprep.subr.bf16.mxu1 %v834_v16 }
  0x23   : > { %752 = vmatpush3.bf16.msra.mxu0 %v835_v17  ;;  %810 = vmatpush3.bf16.msra.mxu1 %v835_v17 }
  0x24   : > { %783 = vmatprep.subr.bf16.mxu1 %v842_v18 }
  0x26   : > { %451 = vmatmul.mubr.bf16.vlgmr.msra.gmra.mrb[0].mxu0 %v836_v19  ;;  %475 = vmatmul.mubr.bf16.vlgmr.msra.gmra.mrb[0].mxu1 %v839_v20 }
  0x27   : > { %784 = vmatpush3.bf16.msra.mxu1 %v842_v18  ;;  %458 = vmatprep.mubr.bf16.mxu0 %v844_v21 }
  0x28   : > { %785 = vmatprep.subr.bf16.mxu1 %v843_v22  ;;  %787 = vmatprep.mubr.msk.bf16.mxu1 %vm405_vm0, %v846_v23 }
  0x2b   : > { %786 = vmatpush3.bf16.msra.mxu1 %v843_v22 }
  0x2e   : > { %459 = vmatmul.mubr.bf16.gmra.mrb[4].mxu0 %v847_v24  ;;  %788 = vmatmul.mubr.msk.bf16.vlgmr.msra.gmra.mrb[4].mxu1 %vm405_vm0, %v848_v25 }
  0x2f   : > { %466 = vmatprep.mubr.bf16.mxu0 %v849_v26  ;;  %791 = vmatprep.mubr.msk.bf16.mxu1 %vm405_vm0, %v851_v27 }
  0x36   : > { %467 = vmatmul.mubr.bf16.gmra.mrb[8].mxu0 %v852_v28  ;;  %792 = vmatmul.mubr.msk.bf16.gmra.mrb[8].mxu1 %vm405_vm0, %v853_v29 }
  0xf9   : > { %v753_v30 = vpop.f32.mrb[0].mxu0  ;;  %v771_v31 = vpop.f32.mrb[0].mxu1 }
  0xfa   : > { %v754_v32 = vpop.f32.mrb[1].mxu0  ;;  %v772_v33 = vpop.f32.mrb[1].mxu1 }
  0xfb   : > { %v755_v34 = vadd.f32 %v754_v32, %v753_v30  ;;  %v756_v35 = vpop.f32.mrb[2].mxu0  ;;  %v773_v36 = vadd.f32 %v772_v33, %v771_v31  ;;  %v774_v37 = vpop.f32.mrb[2].mxu1 }
  0xfc   : > { %v757_v38 = vpop.f32.mrb[3].mxu0  ;;  %v775_v39 = vpop.f32.mrb[3].mxu1 }
  0xfd   : > { %v758_v40 = vadd.f32 %v757_v38, %v756_v35  ;;  %v776_v41 = vadd.f32 %v775_v39, %v774_v37  ;;  %v453_v45 = vadd.f32 %v755_v34, %v661_v42  ;;  %v477_v62 = vadd.f32 %v773_v36, %v661_v42 }
  0xff   : > { %v456_v52 = vadd.f32 %v758_v40, %v661_v42  ;;  %v480_v6 = vadd.f32 %v776_v41, %v661_v42 }
 0x101   : > { %v759_v43 = vpop.f32.mrb[4].mxu0  ;;  %v789_v44 = vpop.f32.mrb[4].mxu1 }
 0x102   : > { %v760_v46 = vpop.f32.mrb[5].mxu0  ;;  %v517_v47 = vpop.f32.mrb[5].mxu1 }
 0x103   : > { %v761_v48 = vadd.f32 %v760_v46, %v759_v43  ;;  %v518_v49 = vadd.f32 %v517_v47, %v453_v45  ;;  %v762_v50 = vpop.f32.mrb[6].mxu0  ;;  %v790_v51 = vpop.f32.mrb[6].mxu1 }
 0x104   : > { %v763_v53 = vpop.f32.mrb[7].mxu0  ;;  %v520_v54 = vpop.f32.mrb[7].mxu1 }
 0x105   : > { %v461_v55 = vadd.f32 %v761_v48, %v661_v42  ;;  %v764_v56 = vadd.f32 %v763_v53, %v762_v50  ;;  %v521_v57 = vadd.f32 %v520_v54, %v456_v52  ;;  %v548_v59 = vmax.f32 %v518_v49, 0.0 }
 0x107   : > { %v526_v58 = vadd.f32 %v789_v44, %v461_v55  ;;  %v464_v60 = vadd.f32 %v764_v56, %v661_v42  ;;  %v549_v61 = vmax.f32 %v521_v57, 0.0 }
 0x109   : > { %v529_v63 = vadd.f32 %v790_v51, %v464_v60  ;;  %v717_v0 = vpack.c.bf16 %v549_v61, %v548_v59  ;;  %v765_v1 = vpop.f32.mrb[8].mxu0  ;;  %v793_v2 = vpop.f32.mrb[8].mxu1  ;;  %v550_v7 = vmax.f32 %v526_v58, 0.0 }
 0x10a   : > { %v542_v3 = vadd.f32 %v793_v2, %v477_v62  ;;  %v766_v4 = vpop.f32.mrb[9].mxu0  ;;  %v533_v5 = vpop.f32.mrb[9].mxu1 }
 0x10b   : > { %v551_v8 = vmax.f32 %v529_v63, 0.0  ;;  %718 = vst [vmem:[%s975_s8] sm:$0xff] %v717_v0   ;;  %v767_v9 = vadd.f32 %v766_v4, %v765_v1  ;;  %v768_v10 = vpop.f32.mrb[10].mxu0  ;;  %v794_v11 = vpop.f32.mrb[10].mxu1 }
 0x10c   : > { %v545_v12 = vadd.f32 %v794_v11, %v480_v6  ;;  %v769_v13 = vpop.f32.mrb[11].mxu0  ;;  %v536_v14 = vpop.f32.mrb[11].mxu1  ;;  %v554_v18 = vmax.f32 %v542_v3, 0.0 }
 0x10d   : > { %v722_v15 = vpack.c.bf16 %v551_v8, %v550_v7  ;;  %v469_v16 = vadd.f32 %v767_v9, %v661_v42  ;;  %v770_v17 = vadd.f32 %v769_v13, %v768_v10 }
 0x10e   : > { %v555_v19 = vmax.f32 %v545_v12, 0.0 }
 0x10f   : > { %734 = vst [vmem:[%s975_s8 + $0x8] sm:$0xff] %v722_v15   ;;  %v534_v20 = vadd.f32 %v533_v5, %v469_v16  ;;  %v472_v21 = vadd.f32 %v770_v17, %v661_v42 }
 0x110   : > { %v732_v22 = vpack.c.bf16 %v555_v19, %v554_v18 }
 0x111   : > { %v537_v23 = vadd.f32 %v536_v14, %v472_v21  ;;  %v552_v24 = vmax.f32 %v534_v20, 0.0 }
 0x112   : > { %736 = vst [vmem:[%s975_s8 + $0x18] sm:$0xff] %v732_v22  }
 0x113   : > { %v553_v25 = vmax.f32 %v537_v23, 0.0 }
 0x115   : > { %v727_v26 = vpack.c.bf16 %v553_v25, %v552_v24 }
 0x117   : > { %735 = vst [vmem:[%s975_s8 + $0x10] sm:$0xff] %v727_v26  }
 0x118 PF: > { %s13_s12 = sadd.s32 1, %s860_s12  }
 0x119   : > { %p10_p4 = scmp.ge.s32.totalorder %s13_s12, 4  }
 0x11b   :  { %12 = sbr.rel (!%p10_p4) target bundleno = 1 (0x1), region = 62 }

// kernel: base_model_forward.8
= control target key start
LH: loop header
LB: loop body
LE: loop exit
PB: predicated region body
PF: predicated region fallthrough
CT: control target
= control target key end

     0   :  { %s1513_s18 = smov 0   ;;  %s1696_s0 = inlined_call_operand.vmem [shape: bf16[128,576], index: 0, kind: input, shape index: {}]   ;;  %s1697_s1 = inlined_call_operand.vmem [shape: bf16[576,128], index: 1, kind: input, shape index: {}]   ;;  %s1698_s2 = inlined_call_operand.vmem [shape: bf16[128,32], index: 2, kind: input, shape index: {}]   ;;  %s1699_s3 = inlined_call_operand.vmem [shape: bf16[32,128], index: 3, kind: input, shape index: {}]   ;;  %s1700_s4 = inlined_call_operand.vmem [shape: f32[1,128], index: 4, kind: input, shape index: {}]   ;;  %s1701_s5 = inlined_call_operand.vmem [shape: bf16[128,128], index: 5, kind: output, shape index: {}]  }
   0x1 LB: > { %s1127_s19 = sadd.s32 4294967295, %s1481_s18   ;;  %p1131_p0 = scmp.ge.s32.totalorder %s1481_s18, 1  ;;  %s1481_s18 = sphi %s1513_s18, %s15_s18  }
   0x2   : > { %p200_p1 = scmp.lt.s32.totalorder %s1481_s18, 3 }
   0x4   : > { %p201_p2 = pnand %p1131_p0, %p200_p1 }
   0x5   : > { %v1405_v0 = vld [vmem:[%s1699_s3] sm:$0xff] (!%p201_p2)   ;;  %s1132_s22 = sshll.u32 (!%p201_p2), %s1127_s19, 3  ;;  %v1408_v3 = vld [vmem:[%s1699_s3 + $0x8] sm:$0xff] (!%p201_p2)   ;;  %vm394_vm0 = vcmask (!%p201_p2), 261120   ;;  %v1413_v7 = vld [vmem:[%s1697_s1 + $0xd0] sm:$0xff] (!%p201_p2)   ;;  %vm788_vm1 = vcmask (!%p201_p2), 523264  }
   0x6   : > { %204 = sbr.rel (%p201_p2) target bundleno = 304 (0x130), region = 40  ;;  %v1406_v1 = vld [vmem:[%s1697_s1 + $0xc0] sm:$0xff] (!%p201_p2)   ;;  %p235_p3 = scmp.lt.s32.totalorder (!%p201_p2), %s1132_s22, 15  ;;  %1344 = vmatprep.subr.bf16.mxu1 (!%p201_p2), %v1405_v0  ;;  %v1409_v4 = vld [vmem:[%s1697_s1 + $0xc8] sm:$0xff] (!%p201_p2)   ;;  %v1416_v11 = vld [vmem:[%s1697_s1 + $0x90] sm:$0xff] (!%p201_p2)  }
   0x7   : > { %v1407_v2 = vld [vmem:[%s1697_s1 + $0x80] sm:$0xff] (!%p201_p2)   ;;  %1296 = vmatprep.subr.bf16.mxu0 (!%p201_p2), %v1406_v1  ;;  %1345 = vmatpush3.bf16.msra.mxu1 (!%p201_p2), %v1405_v0  ;;  %v1410_v5 = vld [vmem:[%s1697_s1 + $0x88] sm:$0xff] (!%p201_p2)   ;;  %v1418_v13 = vld [vmem:[%s1697_s1 + $0xd8] sm:$0xff] (!%p201_p2)  }
   0x8   : > { %1297 = vmatpush3.bf16.msra.mxu0 (!%p201_p2), %v1407_v2  ;;  %1346 = vmatprep.subr.bf16.mxu1 (!%p201_p2), %v1408_v3  ;;  %v1412_v6 = vld [vmem:[%s1697_s1 + $0x40] sm:$0xff] (!%p201_p2)   ;;  %v1417_v12 = vld [vmem:[%s1697_s1 + $0x48] sm:$0xff] (!%p201_p2)   ;;  %v1420_v15 = vld [vmem:[%s1697_s1 + $0x98] sm:$0xff] (!%p201_p2)  }
   0x9   : > { %1298 = vmatprep.subr.bf16.mxu0 (!%p201_p2), %v1409_v4  ;;  %v1415_v10 = vld [vmem:[%s1697_s1] sm:$0xff] (!%p201_p2)   ;;  %v1419_v14 = vld [vmem:[%s1697_s1 + $0x8] sm:$0xff] (!%p201_p2)   ;;  %v1421_v16 = vld [vmem:[%s1697_s1 + $0x50] sm:$0xff] (!%p201_p2)  }
   0xa   : > { %v1422_v17 = vld [vmem:[%s1697_s1 + $0xe0] sm:$0xff] (!%p201_p2)   ;;  %v1423_v18 = vld [vmem:[%s1697_s1 + $0x10] sm:$0xff] (!%p201_p2)   ;;  %v1425_v20 = vld [vmem:[%s1697_s1 + $0x58] sm:$0xff] (!%p201_p2)  }
   0xb   : > { %1347 = vmatpush3.bf16.msra.mxu1 (!%p201_p2), %v1408_v3  ;;  %v1424_v19 = vld [vmem:[%s1697_s1 + $0xa0] sm:$0xff] (!%p201_p2)   ;;  %v1426_v21 = vld [vmem:[%s1697_s1 + $0xe8] sm:$0xff] (!%p201_p2)   ;;  %v1427_v22 = vld [vmem:[%s1697_s1 + $0x18] sm:$0xff] (!%p201_p2)  }
   0xc   : > { %1299 = vmatpush3.bf16.msra.mxu0 (!%p201_p2), %v1410_v5  ;;  %1256 = vmatprep.subr.bf16.mxu1 (!%p201_p2), %v1412_v6  ;;  %v1428_v23 = vld [vmem:[%s1697_s1 + $0xa8] sm:$0xff] (!%p201_p2)   ;;  %v1429_v24 = vld [vmem:[%s1697_s1 + $0x60] sm:$0xff] (!%p201_p2)   ;;  %v1430_v25 = vld [vmem:[%s1697_s1 + $0xf0] sm:$0xff] (!%p201_p2)  }
   0xd   : > { %s1703_s22 = smov (!%p235_p3, %s1132_s22), 15  ;;  %1300 = vmatprep.subr.bf16.mxu0 %v1413_v7  ;;  %v1431_v26 = vld [vmem:[%s1697_s1 + $0x20] sm:$0xff]   ;;  %v1432_v27 = vld [vmem:[%s1697_s1 + $0xb0] sm:$0xff]   ;;  %v1433_v28 = vld [vmem:[%s1697_s1 + $0x68] sm:$0xff]  }
   0xe   : > { %s1135_s8 = sshll.u32 %s1703_s22, 2  ;;  %s1396_s29 = smul.u32 20, %s1703_s22  ;;  %v1434_v29 = vld [vmem:[%s1697_s1 + $0xf8] sm:$0xff]   ;;  %v1435_v30 = vld [vmem:[%s1697_s1 + $0x28] sm:$0xff]   ;;  %v1442_v36 = vld [vmem:[%s1697_s1 + $0x70] sm:$0xff]  }
   0xf   : > { %s1550_s13 = scalar_lea.vmem %s1698_s2, %s1135_s8  ;;  %v1436_v31 = vld [vmem:[%s1697_s1 + $0xb8] sm:$0xff]   ;;  %v1443_v37 = vld [vmem:[%s1697_s1 + $0x100] sm:$0xff]   ;;  %v1444_v38 = vld [vmem:[%s1697_s1 + $0x30] sm:$0xff]   ;;  %s251_s21 = scalar_lea.vmem %s1701_s5, %s1135_s8 }
  0x10   : > { %v1411_v8 = vld [vmem:[%s1550_s13] sm:$0xff]   ;;  %v1414_v9 = vld [vmem:[%s1550_s13 + $0x8] sm:$0xff]   ;;  %1301 = vmatpush3.bf16.msra.mxu0 %v1416_v11  ;;  %s1623_s17 = scalar_lea.vmem %s1696_s0, %s1396_s29  ;;  %v1437_v32 = vld [vmem:[%s1550_s13 + $0x10] sm:$0xff]  }
  0x11   : > { %1348 = vmatprep.mubr.msk.bf16.mxu1 %vm394_vm0, %v1411_v8  ;;  %1302 = vmatprep.subr.bf16.mxu0 %v1418_v13  ;;  %v1438_v33 = vld [vmem:[%s1623_s17 + $0x8] ss:$20 sps:$4 sm:$0xff]   ;;  %v1440_v34 = vld [vmem:[%s1623_s17 + $0xc] ss:$20 sps:$4 sm:$0xff]   ;;  %v1449_v42 = vld [vmem:[%s1623_s17 + $0x4] ss:$20 sps:$4 sm:$0xff]  }
  0x12   : > { %1349 = vmatmul.mubr.msk.bf16.vlgmr.msra.gmra.mrb[0].mxu1 %vm394_vm0, %v1414_v9  ;;  %v1441_v35 = vld [vmem:[%s1550_s13 + $0x18] sm:$0xff]   ;;  %898 = vmatprep.mubr.bf16.mxu0 %v1440_v34  ;;  %v1447_v41 = vld [vmem:[%s1623_s17] ss:$20 sps:$4 sm:$0xff]   ;;  %v1452_v44 = vld [vmem:[%s1623_s17 + $0x30] ss:$20 sps:$4 sm:$0xff]  }
  0x13   : > { %1257 = vmatpush3.bf16.msra.mxu1 %v1415_v10  ;;  %1352 = vmatprep.mubr.msk.bf16.mxu1 %vm394_vm0, %v1437_v32  ;;  %v1445_v39 = vld [vmem:[%s1697_s1 + $0x78] sm:$0xff]   ;;  %v1450_v43 = vld [vmem:[%s1623_s17 + $0x34] ss:$20 sps:$4 sm:$0xff]   ;;  %v1454_v46 = vld [vmem:[%s1623_s17 + $0x2c] ss:$20 sps:$4 sm:$0xff]  }
  0x14   : > { %1258 = vmatprep.subr.bf16.mxu1 %v1417_v12  ;;  %1303 = vmatpush3.bf16.msra.mxu0 %v1420_v15  ;;  %v1446_v40 = vld [vmem:[%s1697_s1 + $0x38] sm:$0xff]   ;;  %v1453_v45 = vld [vmem:[%s1697_s1 + $0x108] sm:$0xff]   ;;  %v1460_v48 = vld [vmem:[%s1697_s1 + $0x110] sm:$0xff]  }
  0x15   : > { %1304 = vmatprep.subr.bf16.mxu0 %v1422_v17  ;;  %v1456_v47 = vld [vmem:[%s1623_s17 + $0x5c] ss:$20 sps:$4 sm:$0xff]   ;;  %v1459_v50 = vld [vmem:[%s1623_s17 + $0x58] ss:$20 sps:$4 sm:$0xff]   ;;  %v1461_v53 = vld [vmem:[%s1623_s17 + $0x54] ss:$20 sps:$4 sm:$0xff]  }
  0x16   : > { %v1458_v49 = vld [vmem:[%s1623_s17 + $0x28] ss:$20 sps:$4 sm:$0xff]   ;;  %v1463_v51 = vld [vmem:[%s1623_s17 + $0x84] ss:$20 sps:$4 sm:$0xff]   ;;  %v1466_v54 = vld [vmem:[%s1623_s17 + $0x80] ss:$20 sps:$4 sm:$0xff]  }
  0x17   : > { %1259 = vmatpush3.bf16.msra.mxu1 %v1419_v14  ;;  %v1467_v52 = vld [vmem:[%s1697_s1 + $0x118] sm:$0xff]   ;;  %v1470_v55 = vld [vmem:[%s1623_s17 + $0x10] ss:$20 sps:$4 sm:$0xff]   ;;  %v1473_v59 = vld [vmem:[%s1623_s17 + $0x60] ss:$20 sps:$4 sm:$0xff]  }
  0x18   : > { %1260 = vmatprep.subr.bf16.mxu1 %v1421_v16  ;;  %1305 = vmatpush3.bf16.msra.mxu0 %v1424_v19  ;;  %v1465_v56 = vld [vmem:[%s1623_s17 + $0x50] ss:$20 sps:$4 sm:$0xff]   ;;  %v1472_v58 = vld [vmem:[%s1623_s17 + $0x38] ss:$20 sps:$4 sm:$0xff]   ;;  %v1474_v61 = vld [vmem:[%s1623_s17 + $0x88] ss:$20 sps:$4 sm:$0xff]  }
  0x19   : > { %1306 = vmatprep.subr.bf16.mxu0 %v1426_v21  ;;  %v1468_v57 = vld [vmem:[%s1623_s17 + $0x7c] ss:$20 sps:$4 sm:$0xff]   ;;  %v1471_v60 = vld [vmem:[%s1623_s17 + $0x78] ss:$20 sps:$4 sm:$0xff]  }
  0x1a   : > { %1353 = vmatmul.mubr.msk.bf16.gmra.mrb[4].mxu1 %vm394_vm0, %v1441_v35 }
  0x1b   : > { %1261 = vmatpush3.bf16.msra.mxu1 %v1423_v18  ;;  %833 = vmatprep.mubr.bf16.mxu1 %v1449_v42 }
  0x1c   : > { %1262 = vmatprep.subr.bf16.mxu1 %v1425_v20  ;;  %1307 = vmatpush3.bf16.msra.mxu0 %v1428_v23 }
  0x1d   : > { %1308 = vmatprep.subr.bf16.mxu0 %v1430_v25 }
  0x1f   : > { %1263 = vmatpush3.bf16.msra.mxu1 %v1427_v22 }
  0x20   : > { %1264 = vmatprep.subr.bf16.mxu1 %v1429_v24  ;;  %1309 = vmatpush3.bf16.msra.mxu0 %v1432_v27 }
  0x21   : > { %1310 = vmatprep.subr.bf16.mxu0 %v1434_v29 }
  0x23   : > { %1265 = vmatpush3.bf16.msra.mxu1 %v1431_v26 }
  0x24   : > { %1266 = vmatprep.subr.bf16.mxu1 %v1433_v28  ;;  %1311 = vmatpush3.bf16.msra.mxu0 %v1436_v31 }
  0x25   : > { %1356 = vmatprep.subr.bf16.mxu0 %v1443_v37 }
  0x27   : > { %1267 = vmatpush3.bf16.msra.mxu1 %v1435_v30  ;;  %899 = vmatmul.mubr.bf16.vlgmr.msra.gmra.mrb[0].mxu0 %v1438_v33 }
  0x28   : > { %1268 = vmatprep.subr.bf16.mxu1 %v1442_v36  ;;  %1357 = vmatpush3.bf16.msra.mxu0 %v1443_v37 }
  0x29   : > { %906 = vmatprep.mubr.bf16.mxu0 %v1450_v43  ;;  %1358 = vmatprep.subr.bf16.mxu0 %v1453_v45 }
  0x2b   : > { %1269 = vmatpush3.bf16.msra.mxu1 %v1444_v38 }
  0x2c   : > { %1270 = vmatprep.subr.bf16.mxu1 %v1445_v39  ;;  %1359 = vmatpush3.bf16.msra.mxu0 %v1453_v45 }
  0x2d   : > { %1360 = vmatprep.subr.bf16.mxu0 %v1460_v48 }
  0x2f   : > { %1271 = vmatpush3.bf16.msra.mxu1 %v1446_v40  ;;  %907 = vmatmul.mubr.bf16.gmra.mrb[4].mxu0 %v1452_v44 }
  0x30   : > { %914 = vmatprep.mubr.bf16.mxu0 %v1456_v47  ;;  %1361 = vmatpush3.bf16.msra.mxu0 %v1460_v48 }
  0x31   : > { %1362 = vmatprep.subr.bf16.mxu0 %v1467_v52 }
  0x32   : > { %834 = vmatmul.mubr.bf16.vlgmr.msra.gmra.mrb[8].mxu1 %v1447_v41 }
  0x33   : > { %841 = vmatprep.mubr.bf16.mxu1 %v1454_v46 }
  0x34   : > { %1363 = vmatpush3.bf16.msra.mxu0 %v1467_v52 }
  0x37   : > { %915 = vmatmul.mubr.bf16.gmra.mrb[8].mxu0 %v1459_v50 }
  0x38   : > { %922 = vmatprep.mubr.bf16.mxu0 %v1463_v51 }
  0x3a   : > { %842 = vmatmul.mubr.bf16.gmra.mrb[12].mxu1 %v1458_v49 }
  0x3b   : > { %849 = vmatprep.mubr.bf16.mxu1 %v1461_v53 }
  0x3f   : > { %923 = vmatmul.mubr.bf16.gmra.mrb[12].mxu0 %v1466_v54 }
  0x40   : > { %1364 = vmatprep.mubr.msk.bf16.mxu0 %vm788_vm1, %v1470_v55 }
  0x42   : > { %850 = vmatmul.mubr.bf16.gmra.mrb[16].mxu1 %v1465_v56 }
  0x43   : > { %857 = vmatprep.mubr.bf16.mxu1 %v1468_v57 }
  0x47   : > { %1365 = vmatmul.mubr.msk.bf16.vlgmr.msra.gmra.mrb[16].mxu0 %vm788_vm1, %v1472_v58 }
  0x48   : > { %1368 = vmatprep.mubr.msk.bf16.mxu0 %vm788_vm1, %v1473_v59  ;;  %v1208_v59 = vld [vmem:[%s1700_s4] ss:$0 sm:$0xff] }
  0x4a   : > { %858 = vmatmul.mubr.bf16.gmra.mrb[20].mxu1 %v1471_v60 }
  0x4f   : > { %1369 = vmatmul.mubr.msk.bf16.gmra.mrb[20].mxu0 %vm788_vm1, %v1474_v61 }
  0xe5   : > { %v1350_v62 = vpop.f32.mrb[0].mxu1 }
  0xe6   : > { %v441_v63 = vpop.f32.mrb[1].mxu1 }
  0xe7   : > { %v1351_v0 = vpop.f32.mrb[2].mxu1 }
  0xe8   : > { %v444_v1 = vpop.f32.mrb[3].mxu1 }
  0xed   : > { %v1679_v2 = vpop.f32.mrb[4].mxu1 }
  0xee   : > { %v457_v4 = vpop.f32.mrb[5].mxu1 }
  0xef   : > { %v1681_v7 = vpop.f32.mrb[6].mxu1 }
  0xf0   : > { %v460_v9 = vpop.f32.mrb[7].mxu1 }
  0xfa   : > { %v1312_v3 = vpop.f32.mrb[0].mxu0 }
  0xfb   : > { %v1313_v5 = vpop.f32.mrb[1].mxu0 }
  0xfc   : > { %v1314_v6 = vadd.f32 %v1313_v5, %v1312_v3  ;;  %v1315_v8 = vpop.f32.mrb[2].mxu0 }
  0xfd   : > { %v1316_v10 = vpop.f32.mrb[3].mxu0 }
  0xfe   : > { %v1317_v11 = vadd.f32 %v1316_v10, %v1315_v8 }
 0x102   : > { %v1318_v12 = vpop.f32.mrb[4].mxu0 }
 0x103   : > { %v1319_v13 = vpop.f32.mrb[5].mxu0 }
 0x104   : > { %v1320_v15 = vadd.f32 %v1319_v13, %v1318_v12  ;;  %v1321_v16 = vpop.f32.mrb[6].mxu0 }
 0x105   : > { %v1272_v14 = vpop.f32.mrb[8].mxu1  ;;  %v1322_v18 = vpop.f32.mrb[7].mxu0 }
 0x106   : > { %v1273_v17 = vpop.f32.mrb[9].mxu1  ;;  %v1323_v21 = vadd.f32 %v1322_v18, %v1321_v16 }
 0x107   : > { %v1274_v19 = vadd.f32 %v1273_v17, %v1272_v14  ;;  %v1275_v20 = vpop.f32.mrb[10].mxu1 }
 0x108   : > { %v1276_v22 = vpop.f32.mrb[11].mxu1 }
 0x109   : > { %v836_v23 = vadd.f32 %v1274_v19, %v441_v63  ;;  %v1277_v24 = vadd.f32 %v1276_v22, %v1275_v20 }
 0x10a   : > { %v1324_v26 = vpop.f32.mrb[8].mxu0 }
 0x10b   : > { %v839_v25 = vadd.f32 %v1277_v24, %v444_v1  ;;  %v901_v27 = vadd.f32 %v1314_v6, %v836_v23  ;;  %v1325_v28 = vpop.f32.mrb[9].mxu0 }
 0x10c   : > { %v1326_v30 = vadd.f32 %v1325_v28, %v1324_v26  ;;  %v1327_v31 = vpop.f32.mrb[10].mxu0 }
 0x10d   : > { %v1278_v29 = vpop.f32.mrb[12].mxu1  ;;  %v904_v32 = vadd.f32 %v1317_v11, %v839_v25  ;;  %v1328_v34 = vpop.f32.mrb[11].mxu0 }
 0x10e   : > { %v1279_v33 = vpop.f32.mrb[13].mxu1  ;;  %v1329_v37 = vadd.f32 %v1328_v34, %v1327_v31 }
 0x10f   : > { %v1280_v35 = vadd.f32 %v1279_v33, %v1278_v29  ;;  %v1281_v36 = vpop.f32.mrb[14].mxu1 }
 0x110   : > { %v1282_v38 = vpop.f32.mrb[15].mxu1 }
 0x111   : > { %v844_v39 = vadd.f32 %v1350_v62, %v1280_v35  ;;  %v1283_v40 = vadd.f32 %v1282_v38, %v1281_v36 }
 0x112   : > { %v1330_v42 = vpop.f32.mrb[12].mxu0 }
 0x113   : > { %v847_v41 = vadd.f32 %v1351_v0, %v1283_v40  ;;  %v909_v43 = vadd.f32 %v1320_v15, %v844_v39  ;;  %v1331_v44 = vpop.f32.mrb[13].mxu0 }
 0x114   : > { %v1332_v46 = vadd.f32 %v1331_v44, %v1330_v42  ;;  %v1333_v47 = vpop.f32.mrb[14].mxu0 }
 0x115   : > { %v1284_v45 = vpop.f32.mrb[16].mxu1  ;;  %v912_v48 = vadd.f32 %v1323_v21, %v847_v41  ;;  %v1334_v50 = vpop.f32.mrb[15].mxu0 }
 0x116   : > { %v1285_v49 = vpop.f32.mrb[17].mxu1  ;;  %v1335_v53 = vadd.f32 %v1334_v50, %v1333_v47 }
 0x117   : > { %v1286_v51 = vadd.f32 %v1285_v49, %v1284_v45  ;;  %v1287_v52 = vpop.f32.mrb[18].mxu1 }
 0x118   : > { %v1288_v54 = vpop.f32.mrb[19].mxu1 }
 0x119   : > { %v852_v55 = vadd.f32 %v1286_v51, %v457_v4  ;;  %v1289_v56 = vadd.f32 %v1288_v54, %v1287_v52 }
 0x11a   : > { %v1366_v58 = vpop.f32.mrb[16].mxu0 }
 0x11b   : > { %v855_v57 = vadd.f32 %v1289_v56, %v460_v9  ;;  %v917_v60 = vadd.f32 %v1326_v30, %v852_v55  ;;  %v974_v61 = vadd.f32 %v1366_v58, %v909_v43  ;;  %v965_v62 = vpop.f32.mrb[17].mxu0 }
 0x11c   : > { %v966_v0 = vadd.f32 %v965_v62, %v901_v27  ;;  %v1367_v1 = vpop.f32.mrb[18].mxu0 }
 0x11d   : > { %v1290_v63 = vpop.f32.mrb[20].mxu1  ;;  %v920_v3 = vadd.f32 %v1329_v37, %v855_v57  ;;  %v1005_v5 = vadd.f32 %v1208_v59, %v974_v61  ;;  %v977_v8 = vadd.f32 %v1367_v1, %v912_v48  ;;  %v968_v10 = vpop.f32.mrb[19].mxu0 }
 0x11e   : > { %v1291_v6 = vpop.f32.mrb[21].mxu1  ;;  %v1003_v11 = vadd.f32 %v1208_v59, %v966_v0  ;;  %v969_v12 = vadd.f32 %v968_v10, %v904_v32 }
 0x11f   : > { %v1292_v4 = vadd.f32 %v1291_v6, %v1290_v63  ;;  %v1293_v9 = vpop.f32.mrb[22].mxu1  ;;  %v1006_v13 = vadd.f32 %v1208_v59, %v977_v8  ;;  %v1013_v18 = vmax.f32 %v1005_v5, 0.0 }
 0x120   : > { %v1294_v14 = vpop.f32.mrb[23].mxu1  ;;  %v1004_v17 = vadd.f32 %v1208_v59, %v969_v12  ;;  %v1011_v20 = vmax.f32 %v1003_v11, 0.0 }
 0x121   : > { %v860_v15 = vadd.f32 %v1679_v2, %v1292_v4  ;;  %v1295_v16 = vadd.f32 %v1294_v14, %v1293_v9  ;;  %v1014_v19 = vmax.f32 %v1006_v13, 0.0 }
 0x122   : > { %v1012_v22 = vmax.f32 %v1004_v17, 0.0  ;;  %v1370_v24 = vpop.f32.mrb[20].mxu0 }
 0x123   : > { %v863_v21 = vadd.f32 %v1681_v7, %v1295_v16  ;;  %v925_v23 = vadd.f32 %v1332_v46, %v860_v15  ;;  %v1235_v25 = vpack.c.bf16 %v1014_v19, %v1013_v18  ;;  %v981_v26 = vpop.f32.mrb[21].mxu0 }
 0x124   : > { %v1230_v27 = vpack.c.bf16 %v1012_v22, %v1011_v20  ;;  %v982_v2 = vadd.f32 %v981_v26, %v917_v60  ;;  %v1371_v30 = vpop.f32.mrb[22].mxu0 }
 0x125   : > { %v990_v28 = vadd.f32 %v1370_v24, %v925_v23  ;;  %v928_v29 = vadd.f32 %v1335_v53, %v863_v21  ;;  %1247 = vst [vmem:[%s251_s21 + $0x8] sm:$0xff] %v1235_v25   ;;  %v984_v31 = vpop.f32.mrb[23].mxu0 }
 0x126   : > { %1231 = vst [vmem:[%s251_s21] sm:$0xff] %v1230_v27   ;;  %v1007_v33 = vadd.f32 %v1208_v59, %v982_v2  ;;  %v985_v35 = vadd.f32 %v984_v31, %v920_v3 }
 0x127   : > { %v1009_v32 = vadd.f32 %v1208_v59, %v990_v28  ;;  %v993_v34 = vadd.f32 %v1371_v30, %v928_v29 }
 0x128   : > { %v1008_v37 = vadd.f32 %v1208_v59, %v985_v35  ;;  %v1015_v38 = vmax.f32 %v1007_v33, 0.0 }
 0x129   : > { %v1010_v36 = vadd.f32 %v1208_v59, %v993_v34  ;;  %v1017_v7 = vmax.f32 %v1009_v32, 0.0 }
 0x12a   : > { %v1016_v40 = vmax.f32 %v1008_v37, 0.0 }
 0x12b   : > { %v1018_v39 = vmax.f32 %v1010_v36, 0.0 }
 0x12c   : > { %v1240_v42 = vpack.c.bf16 %v1016_v40, %v1015_v38 }
 0x12d   : > { %v1245_v41 = vpack.c.bf16 %v1018_v39, %v1017_v7 }
 0x12e   : > { %1248 = vst [vmem:[%s251_s21 + $0x10] sm:$0xff] %v1240_v42  }
 0x12f   : > { %1249 = vst [vmem:[%s251_s21 + $0x18] sm:$0xff] %v1245_v41  }
 0x130 PF: > { %s15_s18 = sadd.s32 1, %s1481_s18  }
 0x131   : > { %p12_p4 = scmp.ge.s32.totalorder %s15_s18, 4  }
 0x133   :  { %14 = sbr.rel (!%p12_p4) target bundleno = 1 (0x1), region = 73 }

// kernel: base_model_forward.9
= control target key start
LH: loop header
LB: loop body
LE: loop exit
PB: predicated region body
PF: predicated region fallthrough
CT: control target
= control target key end

     0   :  { %s907_s12 = smov 0   ;;  %s1048_s0 = inlined_call_operand.vmem [shape: bf16[32,576], index: 0, kind: input, shape index: {}]   ;;  %s1049_s1 = inlined_call_operand.vmem [shape: bf16[576,128], index: 1, kind: input, shape index: {}]   ;;  %s1050_s2 = inlined_call_operand.vmem [shape: f32[1,128], index: 2, kind: input, shape index: {}]   ;;  %s1051_s3 = inlined_call_operand.vmem [shape: bf16[32,128], index: 3, kind: output, shape index: {}]  }
   0x1 LB: > { %s699_s13 = sadd.s32 4294967295, %s883_s12   ;;  %p703_p0 = scmp.ge.s32.totalorder %s883_s12, 1  ;;  %s883_s12 = sphi %s907_s12, %s13_s12  }
   0x2   : > { %p139_p1 = scmp.lt.s32.totalorder %s883_s12, 3 }
   0x4   : > { %p140_p2 = pnand %p703_p0, %p139_p1 }
   0x5   : > { %v834_v0 = vld [vmem:[%s1049_s1 + $0x40] sm:$0xff] (!%p140_p2)   ;;  %v838_v4 = vld [vmem:[%s1049_s1 + $0x48] sm:$0xff] (!%p140_p2)   ;;  %v842_v8 = vld [vmem:[%s1049_s1 + $0x50] sm:$0xff] (!%p140_p2)   ;;  %s704_s17 = sshll.u32 (!%p140_p2), %s699_s13, 1  ;;  %v885_v33 = vmov (!%p140_p2), 0.0   ;;  %vm886_vm0 = vmmov (!%p140_p2), 0  }
   0x6   : > { %143 = sbr.rel (%p140_p2) target bundleno = 275 (0x113), region = 32  ;;  %v835_v1 = vld [vmem:[%s1049_s1] sm:$0xff] (!%p140_p2)   ;;  %762 = vmatprep.subr.bf16.mxu0 (!%p140_p2), %v834_v0  ;;  %v839_v5 = vld [vmem:[%s1049_s1 + $0x8] sm:$0xff] (!%p140_p2)   ;;  %v843_v9 = vld [vmem:[%s1049_s1 + $0x10] sm:$0xff] (!%p140_p2)   ;;  %p165_p3 = scmp.lt.s32.totalorder (!%p140_p2), %s704_s17, 3  ;;  %vm504_vm1 = vcmask (!%p140_p2), 523264  }
   0x7   : > { %v836_v2 = vld [vmem:[%s1049_s1 + $0xc0] sm:$0xff] (!%p140_p2)   ;;  %763 = vmatpush3.bf16.msra.mxu0 (!%p140_p2), %v835_v1  ;;  %v840_v6 = vld [vmem:[%s1049_s1 + $0xc8] sm:$0xff] (!%p140_p2)   ;;  %v844_v10 = vld [vmem:[%s1049_s1 + $0xd0] sm:$0xff] (!%p140_p2)  }
   0x8   : > { %v837_v3 = vld [vmem:[%s1049_s1 + $0x80] sm:$0xff] (!%p140_p2)   ;;  %784 = vmatprep.subr.bf16.mxu1 (!%p140_p2), %v836_v2  ;;  %764 = vmatprep.subr.bf16.mxu0 (!%p140_p2), %v838_v4  ;;  %v841_v7 = vld [vmem:[%s1049_s1 + $0x88] sm:$0xff] (!%p140_p2)   ;;  %v845_v11 = vld [vmem:[%s1049_s1 + $0x90] sm:$0xff] (!%p140_p2)  }
   0x9   : > { %785 = vmatpush3.bf16.msra.mxu1 (!%p140_p2), %v837_v3  ;;  %v846_v12 = vld [vmem:[%s1049_s1 + $0x58] sm:$0xff] (!%p140_p2)   ;;  %v850_v16 = vld [vmem:[%s1049_s1 + $0x60] sm:$0xff] (!%p140_p2)   ;;  %v854_v20 = vld [vmem:[%s1049_s1 + $0x68] sm:$0xff] (!%p140_p2)  }
   0xa   : > { %786 = vmatprep.subr.bf16.mxu1 (!%p140_p2), %v840_v6  ;;  %v847_v13 = vld [vmem:[%s1049_s1 + $0x18] sm:$0xff] (!%p140_p2)   ;;  %v851_v17 = vld [vmem:[%s1049_s1 + $0x20] sm:$0xff] (!%p140_p2)   ;;  %v855_v21 = vld [vmem:[%s1049_s1 + $0x28] sm:$0xff] (!%p140_p2)  }
   0xb   : > { %765 = vmatpush3.bf16.msra.mxu0 (!%p140_p2), %v839_v5  ;;  %v848_v14 = vld [vmem:[%s1049_s1 + $0xd8] sm:$0xff] (!%p140_p2)   ;;  %v852_v18 = vld [vmem:[%s1049_s1 + $0xe0] sm:$0xff] (!%p140_p2)   ;;  %v856_v22 = vld [vmem:[%s1049_s1 + $0xe8] sm:$0xff] (!%p140_p2)  }
   0xc   : > { %766 = vmatprep.subr.bf16.mxu0 (!%p140_p2), %v842_v8  ;;  %v849_v15 = vld [vmem:[%s1049_s1 + $0x98] sm:$0xff] (!%p140_p2)   ;;  %v853_v19 = vld [vmem:[%s1049_s1 + $0xa0] sm:$0xff] (!%p140_p2)   ;;  %v857_v23 = vld [vmem:[%s1049_s1 + $0xa8] sm:$0xff] (!%p140_p2)  }
   0xd   : > { %787 = vmatpush3.bf16.msra.mxu1 %v841_v7  ;;  %s1053_s17 = smov (!%p165_p3, %s704_s17), 3  ;;  %v858_v24 = vld [vmem:[%s1049_s1 + $0x70] sm:$0xff]   ;;  %v862_v28 = vld [vmem:[%s1049_s1 + $0x78] sm:$0xff]   ;;  %v872_v37 = vld [vmem:[%s1049_s1 + $0x100] sm:$0xff]  }
   0xe   : > { %788 = vmatprep.subr.bf16.mxu1 %v844_v10  ;;  %s823_s14 = smul.u32 20, %s1053_s17  ;;  %v859_v25 = vld [vmem:[%s1049_s1 + $0x30] sm:$0xff]   ;;  %v863_v29 = vld [vmem:[%s1049_s1 + $0x38] sm:$0xff]   ;;  %v873_v38 = vld [vmem:[%s1049_s1 + $0x108] sm:$0xff]   ;;  %s707_s18 = sshll.u32 %s1053_s17, 2 }
   0xf   : > { %767 = vmatpush3.bf16.msra.mxu0 %v843_v9  ;;  %v860_v26 = vld [vmem:[%s1049_s1 + $0xf0] sm:$0xff]   ;;  %v864_v30 = vld [vmem:[%s1049_s1 + $0xf8] sm:$0xff]   ;;  %v708_v43 = vld [vmem:[%s1050_s2] ss:$0 sm:$0xff]  ;;  %s175_s21 = scalar_lea.vmem %s1051_s3, %s707_s18 }
  0x10   : > { %768 = vmatprep.subr.bf16.mxu0 %v846_v12  ;;  %v861_v27 = vld [vmem:[%s1049_s1 + $0xb0] sm:$0xff]   ;;  %s1010_s13 = scalar_lea.vmem %s1048_s0, %s823_s14  ;;  %v868_v34 = vld [vmem:[%s1049_s1 + $0xb8] sm:$0xff]  }
  0x11   : > { %789 = vmatpush3.bf16.msra.mxu1 %v845_v11  ;;  %v865_v31 = vld [vmem:[%s1010_s13] ss:$20 sps:$4 sm:$0xff]   ;;  %v867_v32 = vld [vmem:[%s1010_s13 + $0x4] ss:$20 sps:$4 sm:$0xff]   ;;  %v869_v35 = vld [vmem:[%s1010_s13 + $0x8] ss:$20 sps:$4 sm:$0xff]  }
  0x12   : > { %790 = vmatprep.subr.bf16.mxu1 %v848_v14  ;;  %540 = vmatprep.mubr.bf16.mxu0 %v867_v32  ;;  %v871_v36 = vld [vmem:[%s1010_s13 + $0xc] ss:$20 sps:$4 sm:$0xff]   ;;  %v874_v39 = vld [vmem:[%s1049_s1 + $0x110] sm:$0xff]   ;;  %v875_v40 = vld [vmem:[%s1049_s1 + $0x118] sm:$0xff]  }
  0x13   : > { %769 = vmatpush3.bf16.msra.mxu0 %v847_v13  ;;  %581 = vmatprep.mubr.bf16.mxu1 %v871_v36  ;;  %v876_v41 = vld [vmem:[%s1010_s13 + $0x10] ss:$20 sps:$4 sm:$0xff]  }
  0x14   : > { %770 = vmatprep.subr.bf16.mxu0 %v850_v16 }
  0x15   : > { %791 = vmatpush3.bf16.msra.mxu1 %v849_v15 }
  0x16   : > { %792 = vmatprep.subr.bf16.mxu1 %v852_v18 }
  0x17   : > { %771 = vmatpush3.bf16.msra.mxu0 %v851_v17 }
  0x18   : > { %772 = vmatprep.subr.bf16.mxu0 %v854_v20 }
  0x19   : > { %793 = vmatpush3.bf16.msra.mxu1 %v853_v19 }
  0x1a   : > { %794 = vmatprep.subr.bf16.mxu1 %v856_v22 }
  0x1b   : > { %773 = vmatpush3.bf16.msra.mxu0 %v855_v21 }
  0x1c   : > { %774 = vmatprep.subr.bf16.mxu0 %v858_v24 }
  0x1d   : > { %795 = vmatpush3.bf16.msra.mxu1 %v857_v23 }
  0x1e   : > { %796 = vmatprep.subr.bf16.mxu1 %v860_v26 }
  0x1f   : > { %775 = vmatpush3.bf16.msra.mxu0 %v859_v25 }
  0x20   : > { %776 = vmatprep.subr.bf16.mxu0 %v862_v28 }
  0x21   : > { %797 = vmatpush3.bf16.msra.mxu1 %v861_v27 }
  0x22   : > { %798 = vmatprep.subr.bf16.mxu1 %v864_v30 }
  0x23   : > { %777 = vmatpush3.bf16.msra.mxu0 %v863_v29 }
  0x24   : > { %811 = vmatprep.subr.bf16.mxu0 %v885_v33 }
  0x25   : > { %799 = vmatpush3.bf16.msra.mxu1 %v868_v34 }
  0x26   : > { %541 = vmatmul.mubr.bf16.vlgmr.msra.gmra.mrb[0].mxu0 %v865_v31 }
  0x27   : > { %819 = vmatprep.mubr.msk.bf16.mxu0 %vm886_vm0, %v885_v33  ;;  %812 = vmatpush3.bf16.msra.mxu0 %v872_v37 }
  0x28   : > { %582 = vmatmul.mubr.bf16.vlgmr.msra.gmra.mrb[0].mxu1 %v869_v35  ;;  %813 = vmatprep.subr.bf16.mxu0 %v885_v33 }
  0x2b   : > { %814 = vmatpush3.bf16.msra.mxu0 %v873_v38 }
  0x2c   : > { %815 = vmatprep.subr.bf16.mxu0 %v885_v33 }
  0x2f   : > { %816 = vmatpush3.bf16.msra.mxu0 %v874_v39 }
  0x30   : > { %817 = vmatprep.subr.bf16.mxu0 %v885_v33 }
  0x33   : > { %818 = vmatpush3.bf16.msra.mxu0 %v875_v40 }
  0x36   : > { %820 = vmatmul.mubr.msk.bf16.vlgmr.msra.gmra.mrb[4].mxu0 %vm504_vm1, %v876_v41 }
  0xf9   : > { %v778_v42 = vpop.f32.mrb[0].mxu0 }
  0xfa   : > { %v779_v44 = vpop.f32.mrb[1].mxu0 }
  0xfb   : > { %v780_v45 = vadd.f32 %v779_v44, %v778_v42  ;;  %v781_v46 = vpop.f32.mrb[2].mxu0  ;;  %v800_v47 = vpop.f32.mrb[0].mxu1 }
  0xfc   : > { %v782_v48 = vpop.f32.mrb[3].mxu0  ;;  %v801_v51 = vpop.f32.mrb[1].mxu1 }
  0xfd   : > { %v543_v49 = vadd.f32 %v780_v45, %v708_v43  ;;  %v783_v50 = vadd.f32 %v782_v48, %v781_v46  ;;  %v802_v52 = vadd.f32 %v801_v51, %v800_v47  ;;  %v803_v53 = vpop.f32.mrb[2].mxu1 }
  0xfe   : > { %v804_v55 = vpop.f32.mrb[3].mxu1 }
  0xff   : > { %v546_v54 = vadd.f32 %v783_v50, %v708_v43  ;;  %v805_v56 = vadd.f32 %v804_v55, %v803_v53  ;;  %v584_v57 = vadd.f32 %v802_v52, %v543_v49 }
 0x101   : > { %v587_v58 = vadd.f32 %v805_v56, %v546_v54 }
 0x109   : > { %v624_v59 = vpop.f32.mrb[4].mxu0 }
 0x10a   : > { %v625_v60 = vadd.f32 %v624_v59, %v584_v57  ;;  %v821_v61 = vpop.f32.mrb[5].mxu0 }
 0x10b   : > { %v627_v62 = vpop.f32.mrb[6].mxu0 }
 0x10c   : > { %v628_v63 = vadd.f32 %v627_v62, %v587_v58  ;;  %v822_v0 = vpop.f32.mrb[7].mxu0  ;;  %v631_v1 = vmax.f32 %v625_v60, 0.0 }
 0x10e   : > { %v632_v2 = vmax.f32 %v628_v63, 0.0 }
 0x110   : > { %v760_v3 = vpack.c.bf16 %v632_v2, %v631_v1 }
 0x112   : > { %761 = vst [vmem:[%s175_s21] sm:$0xff] %v760_v3  }
 0x113 PF: > { %s13_s12 = sadd.s32 1, %s883_s12  }
 0x114   : > { %p10_p4 = scmp.ge.s32.totalorder %s13_s12, 4  }
 0x116   :  { %12 = sbr.rel (!%p10_p4) target bundleno = 1 (0x1), region = 62 }

// kernel: base_model_forward.10
= control target key start
LH: loop header
LB: loop body
LE: loop exit
PB: predicated region body
PF: predicated region fallthrough
CT: control target
= control target key end

     0   :  { %s1649_s18 = smov 0   ;;  %s1935_s0 = inlined_call_operand.vmem [shape: bf16[32,1152], index: 0, kind: input, shape index: {}]   ;;  %s1936_s1 = inlined_call_operand.vmem [shape: bf16[1152,128], index: 1, kind: input, shape index: {}]   ;;  %s1937_s2 = inlined_call_operand.vmem [shape: bf16[32,64], index: 2, kind: input, shape index: {}]   ;;  %s1938_s3 = inlined_call_operand.vmem [shape: bf16[64,128], index: 3, kind: input, shape index: {}]   ;;  %s1939_s4 = inlined_call_operand.vmem [shape: f32[1,128], index: 4, kind: input, shape index: {}]   ;;  %s1940_s5 = inlined_call_operand.vmem [shape: bf16[32,128], index: 5, kind: output, shape index: {}]  }
   0x1 LB: > { %s1264_s19 = sadd.s32 4294967295, %s1615_s18   ;;  %p1268_p0 = scmp.ge.s32.totalorder %s1615_s18, 1  ;;  %s1615_s18 = sphi %s1649_s18, %s15_s18  }
   0x2   : > { %p200_p1 = scmp.lt.s32.totalorder %s1615_s18, 3 }
   0x4   : > { %p201_p2 = pnand %p1268_p0, %p200_p1 }
   0x5   : > { %v1519_v0 = vld [vmem:[%s1938_s3] sm:$0xff] (!%p201_p2)   ;;  %v1617_v1 = vmov (!%p201_p2), 0.0   ;;  %vm1618_vm0 = vmmov (!%p201_p2), 0   ;;  %s1269_s26 = sshll.u32 (!%p201_p2), %s1264_s19, 1  ;;  %v1522_v4 = vld [vmem:[%s1938_s3 + $0x8] sm:$0xff] (!%p201_p2)   ;;  %v1525_v7 = vld [vmem:[%s1938_s3 + $0x10] sm:$0xff] (!%p201_p2)  }
   0x6   : > { %204 = sbr.rel (%p201_p2) target bundleno = 326 (0x146), region = 40  ;;  %1476 = vmatprep.subr.bf16.mxu0 (!%p201_p2), %v1617_v1  ;;  %v1520_v2 = vld [vmem:[%s1936_s1 + $0x40] sm:$0xff] (!%p201_p2)   ;;  %1484 = vmatprep.mubr.msk.bf16.mxu0 (!%p201_p2), %vm1618_vm0, %v1617_v1  ;;  %p235_p3 = scmp.lt.s32.totalorder (!%p201_p2), %s1269_s26, 3  ;;  %v1523_v5 = vld [vmem:[%s1936_s1 + $0x48] sm:$0xff] (!%p201_p2)   ;;  %v1526_v8 = vld [vmem:[%s1936_s1 + $0x50] sm:$0xff] (!%p201_p2)   ;;  %vm447_vm1 = vcmask (!%p201_p2), 523264  }
   0x7   : > { %1477 = vmatpush3.bf16.msra.mxu0 (!%p201_p2), %v1519_v0  ;;  %v1521_v3 = vld [vmem:[%s1936_s1] sm:$0xff] (!%p201_p2)   ;;  %1379 = vmatprep.subr.bf16.mxu1 (!%p201_p2), %v1520_v2  ;;  %v1524_v6 = vld [vmem:[%s1936_s1 + $0x8] sm:$0xff] (!%p201_p2)   ;;  %v1527_v9 = vld [vmem:[%s1936_s1 + $0x10] sm:$0xff] (!%p201_p2)  }
   0x8   : > { %1478 = vmatprep.subr.bf16.mxu0 (!%p201_p2), %v1617_v1  ;;  %1380 = vmatpush3.bf16.msra.mxu1 (!%p201_p2), %v1521_v3  ;;  %v1528_v10 = vld [vmem:[%s1938_s3 + $0x18] sm:$0xff] (!%p201_p2)   ;;  %v1531_v13 = vld [vmem:[%s1936_s1 + $0xc0] sm:$0xff] (!%p201_p2)   ;;  %v1536_v18 = vld [vmem:[%s1936_s1 + $0xc8] sm:$0xff] (!%p201_p2)  }
   0x9   : > { %1381 = vmatprep.subr.bf16.mxu1 (!%p201_p2), %v1523_v5  ;;  %v1529_v11 = vld [vmem:[%s1936_s1 + $0x58] sm:$0xff] (!%p201_p2)   ;;  %v1533_v15 = vld [vmem:[%s1936_s1 + $0x60] sm:$0xff] (!%p201_p2)   ;;  %v1537_v19 = vld [vmem:[%s1936_s1 + $0x68] sm:$0xff] (!%p201_p2)  }
   0xa   : > { %v1530_v12 = vld [vmem:[%s1936_s1 + $0x18] sm:$0xff] (!%p201_p2)   ;;  %v1534_v16 = vld [vmem:[%s1936_s1 + $0x80] sm:$0xff] (!%p201_p2)   ;;  %v1538_v20 = vld [vmem:[%s1936_s1 + $0x88] sm:$0xff] (!%p201_p2)  }
   0xb   : > { %1479 = vmatpush3.bf16.msra.mxu0 (!%p201_p2), %v1522_v4  ;;  %v1535_v17 = vld [vmem:[%s1936_s1 + $0x20] sm:$0xff] (!%p201_p2)   ;;  %v1539_v21 = vld [vmem:[%s1936_s1 + $0x28] sm:$0xff] (!%p201_p2)   ;;  %v1540_v22 = vld [vmem:[%s1936_s1 + $0xd0] sm:$0xff] (!%p201_p2)  }
   0xc   : > { %1480 = vmatprep.subr.bf16.mxu0 (!%p201_p2), %v1617_v1  ;;  %1382 = vmatpush3.bf16.msra.mxu1 (!%p201_p2), %v1524_v6  ;;  %v1541_v23 = vld [vmem:[%s1936_s1 + $0x70] sm:$0xff] (!%p201_p2)   ;;  %v1544_v26 = vld [vmem:[%s1936_s1 + $0xd8] sm:$0xff] (!%p201_p2)   ;;  %v1551_v32 = vld [vmem:[%s1936_s1 + $0xe0] sm:$0xff] (!%p201_p2)  }
   0xd   : > { %s1942_s26 = smov (!%p235_p3, %s1269_s26), 3  ;;  %1383 = vmatprep.subr.bf16.mxu1 %v1526_v8  ;;  %v1542_v24 = vld [vmem:[%s1936_s1 + $0x90] sm:$0xff]   ;;  %v1545_v27 = vld [vmem:[%s1936_s1 + $0x78] sm:$0xff]   ;;  %v1552_v33 = vld [vmem:[%s1936_s1 + $0xa0] sm:$0xff]  }
   0xe   : > { %s1272_s14 = sshll.u32 %s1942_s26, 2  ;;  %s1508_s21 = smul.u32 36, %s1942_s26  ;;  %v1543_v25 = vld [vmem:[%s1936_s1 + $0x30] sm:$0xff]   ;;  %v1546_v28 = vld [vmem:[%s1936_s1 + $0x98] sm:$0xff]   ;;  %v1553_v34 = vld [vmem:[%s1936_s1 + $0x140] sm:$0xff]  }
   0xf   : > { %1481 = vmatpush3.bf16.msra.mxu0 %v1525_v7  ;;  %s245_s22 = scalar_lea.vmem %s1937_s2, %s1272_s14  ;;  %v1547_v29 = vld [vmem:[%s1936_s1 + $0x38] sm:$0xff]   ;;  %v1554_v35 = vld [vmem:[%s1936_s1 + $0x100] sm:$0xff]   ;;  %v1555_v36 = vld [vmem:[%s1936_s1 + $0xe8] sm:$0xff]   ;;  %s251_s9 = scalar_lea.vmem %s1940_s5, %s1272_s14 }
  0x10   : > { %1482 = vmatprep.subr.bf16.mxu0 %v1617_v1  ;;  %1384 = vmatpush3.bf16.msra.mxu1 %v1527_v9  ;;  %v1532_v14 = vld [vmem:[%s245_s22] sm:$0xff]   ;;  %s1750_s8 = scalar_lea.vmem %s1935_s0, %s1508_s21  ;;  %v1556_v37 = vld [vmem:[%s1936_s1 + $0xa8] sm:$0xff]   ;;  %v1559_v40 = vld [vmem:[%s1936_s1 + $0xf0] sm:$0xff]  }
  0x11   : > { %1385 = vmatprep.subr.bf16.mxu1 %v1529_v11  ;;  %v1548_v30 = vld [vmem:[%s1750_s8] ss:$36 sps:$4 sm:$0xff]   ;;  %v1557_v38 = vld [vmem:[%s1936_s1 + $0x148] sm:$0xff]   ;;  %v1560_v41 = vld [vmem:[%s1936_s1 + $0xb0] sm:$0xff]  }
  0x12   : > { %v1550_v31 = vld [vmem:[%s1750_s8 + $0x4] ss:$36 sps:$4 sm:$0xff]   ;;  %v1561_v42 = vld [vmem:[%s1936_s1 + $0x150] sm:$0xff]   ;;  %v1563_v44 = vld [vmem:[%s1936_s1 + $0xf8] sm:$0xff]  }
  0x13   : > { %1483 = vmatpush3.bf16.msra.mxu0 %v1528_v10  ;;  %1002 = vmatprep.mubr.bf16.mxu1 %v1550_v31  ;;  %v1558_v39 = vld [vmem:[%s1936_s1 + $0x108] sm:$0xff]   ;;  %v1562_v43 = vld [vmem:[%s1936_s1 + $0x110] sm:$0xff]   ;;  %v1564_v45 = vld [vmem:[%s1936_s1 + $0xb8] sm:$0xff]  }
  0x14   : > { %1401 = vmatprep.subr.bf16.mxu0 %v1531_v13  ;;  %1386 = vmatpush3.bf16.msra.mxu1 %v1530_v12  ;;  %v1565_v46 = vld [vmem:[%s1936_s1 + $0x158] sm:$0xff]   ;;  %v1567_v48 = vld [vmem:[%s1750_s8 + $0x8] ss:$36 sps:$4 sm:$0xff]   ;;  %v1570_v50 = vld [vmem:[%s1936_s1 + $0x1c0] sm:$0xff]  }
  0x15   : > { %1387 = vmatprep.subr.bf16.mxu1 %v1533_v15  ;;  %v1566_v47 = vld [vmem:[%s1936_s1 + $0x118] sm:$0xff]   ;;  %v1569_v49 = vld [vmem:[%s1750_s8 + $0xc] ss:$36 sps:$4 sm:$0xff]   ;;  %v1571_v51 = vld [vmem:[%s1936_s1 + $0x160] sm:$0xff]  }
  0x16   : > { %1485 = vmatmul.mubr.msk.bf16.vlgmr.msra.gmra.mrb[0].mxu0 %vm447_vm1, %v1532_v14  ;;  %v1572_v52 = vld [vmem:[%s1936_s1 + $0x180] sm:$0xff]   ;;  %v1574_v54 = vld [vmem:[%s1936_s1 + $0x1c8] sm:$0xff]   ;;  %v1578_v58 = vld [vmem:[%s1936_s1 + $0x1d0] sm:$0xff]  }
  0x17   : > { %1402 = vmatpush3.bf16.msra.mxu0 %v1534_v16  ;;  %1043 = vmatprep.mubr.bf16.mxu0 %v1569_v49  ;;  %v1573_v53 = vld [vmem:[%s1936_s1 + $0x120] sm:$0xff]   ;;  %v1575_v55 = vld [vmem:[%s1936_s1 + $0x168] sm:$0xff]   ;;  %v1579_v59 = vld [vmem:[%s1936_s1 + $0x170] sm:$0xff]  }
  0x18   : > { %1403 = vmatprep.subr.bf16.mxu0 %v1536_v18  ;;  %1388 = vmatpush3.bf16.msra.mxu1 %v1535_v17  ;;  %v1576_v56 = vld [vmem:[%s1936_s1 + $0x188] sm:$0xff]   ;;  %v1580_v60 = vld [vmem:[%s1936_s1 + $0x190] sm:$0xff]   ;;  %v1582_v62 = vld [vmem:[%s1936_s1 + $0x1d8] sm:$0xff]  }
  0x19   : > { %1389 = vmatprep.subr.bf16.mxu1 %v1537_v19  ;;  %v1577_v57 = vld [vmem:[%s1936_s1 + $0x128] sm:$0xff]   ;;  %v1581_v61 = vld [vmem:[%s1936_s1 + $0x130] sm:$0xff]   ;;  %v1583_v63 = vld [vmem:[%s1936_s1 + $0x178] sm:$0xff]  }
  0x1a   : > { %v1584_v0 = vld [vmem:[%s1936_s1 + $0x198] sm:$0xff]   ;;  %v1586_v3 = vld [vmem:[%s1750_s8 + $0x10] ss:$36 sps:$4 sm:$0xff]   ;;  %v1589_v5 = vld [vmem:[%s1936_s1 + $0x1e0] sm:$0xff]  }
  0x1b   : > { %1404 = vmatpush3.bf16.msra.mxu0 %v1538_v20  ;;  %v1585_v2 = vld [vmem:[%s1936_s1 + $0x138] sm:$0xff]   ;;  %v1590_v6 = vld [vmem:[%s1936_s1 + $0x1a0] sm:$0xff]   ;;  %v1592_v8 = vld [vmem:[%s1936_s1 + $0x1e8] sm:$0xff]  }
  0x1c   : > { %1405 = vmatprep.subr.bf16.mxu0 %v1540_v22  ;;  %1390 = vmatpush3.bf16.msra.mxu1 %v1539_v21  ;;  %v1588_v4 = vld [vmem:[%s1750_s8 + $0x14] ss:$36 sps:$4 sm:$0xff]   ;;  %v1591_v7 = vld [vmem:[%s1936_s1 + $0x200] sm:$0xff]   ;;  %v1593_v9 = vld [vmem:[%s1936_s1 + $0x1a8] sm:$0xff]  }
  0x1d   : > { %1391 = vmatprep.subr.bf16.mxu1 %v1541_v23  ;;  %v1594_v10 = vld [vmem:[%s1936_s1 + $0x208] sm:$0xff]   ;;  %v1595_v11 = vld [vmem:[%s1936_s1 + $0x1f0] sm:$0xff]   ;;  %v1598_v14 = vld [vmem:[%s1936_s1 + $0x1f8] sm:$0xff]  }
  0x1e   : > { %v1596_v12 = vld [vmem:[%s1936_s1 + $0x1b0] sm:$0xff]   ;;  %v1599_v15 = vld [vmem:[%s1936_s1 + $0x1b8] sm:$0xff]   ;;  %v1604_v19 = vld [vmem:[%s1936_s1 + $0x220] sm:$0xff]  }
  0x1f   : > { %1406 = vmatpush3.bf16.msra.mxu0 %v1542_v24  ;;  %v1597_v13 = vld [vmem:[%s1936_s1 + $0x210] sm:$0xff]   ;;  %v1600_v16 = vld [vmem:[%s1936_s1 + $0x218] sm:$0xff]   ;;  %v1605_v20 = vld [vmem:[%s1936_s1 + $0x228] sm:$0xff]  }
  0x20   : > { %1407 = vmatprep.subr.bf16.mxu0 %v1544_v26  ;;  %1392 = vmatpush3.bf16.msra.mxu1 %v1543_v25  ;;  %v1603_v17 = vld [vmem:[%s1750_s8 + $0x1c] ss:$36 sps:$4 sm:$0xff]   ;;  %v1606_v21 = vld [vmem:[%s1936_s1 + $0x230] sm:$0xff]  }
  0x21   : > { %1393 = vmatprep.subr.bf16.mxu1 %v1545_v27  ;;  %v1601_v18 = vld [vmem:[%s1750_s8 + $0x18] ss:$36 sps:$4 sm:$0xff]   ;;  %v1608_v23 = vld [vmem:[%s1750_s8 + $0x20] ss:$36 sps:$4 sm:$0xff]  }
  0x22   : > { %v1607_v22 = vld [vmem:[%s1936_s1 + $0x238] sm:$0xff]  }
  0x23   : > { %1408 = vmatpush3.bf16.msra.mxu0 %v1546_v28 }
  0x24   : > { %1394 = vmatpush3.bf16.msra.mxu1 %v1547_v29  ;;  %1409 = vmatprep.subr.bf16.mxu0 %v1551_v32 }
  0x25   : > { %1423 = vmatprep.subr.bf16.mxu1 %v1553_v34 }
  0x27   : > { %1410 = vmatpush3.bf16.msra.mxu0 %v1552_v33  ;;  %1003 = vmatmul.mubr.bf16.vlgmr.msra.gmra.mrb[0].mxu1 %v1548_v30 }
  0x28   : > { %1424 = vmatpush3.bf16.msra.mxu1 %v1554_v35  ;;  %1411 = vmatprep.subr.bf16.mxu0 %v1555_v36 }
  0x29   : > { %1425 = vmatprep.subr.bf16.mxu1 %v1557_v38  ;;  %1084 = vmatprep.mubr.bf16.mxu1 %v1588_v4 }
  0x2b   : > { %1412 = vmatpush3.bf16.msra.mxu0 %v1556_v37 }
  0x2c   : > { %1426 = vmatpush3.bf16.msra.mxu1 %v1558_v39  ;;  %1413 = vmatprep.subr.bf16.mxu0 %v1559_v40 }
  0x2d   : > { %1427 = vmatprep.subr.bf16.mxu1 %v1561_v42 }
  0x2f   : > { %1414 = vmatpush3.bf16.msra.mxu0 %v1560_v41 }
  0x30   : > { %1428 = vmatpush3.bf16.msra.mxu1 %v1562_v43  ;;  %1415 = vmatprep.subr.bf16.mxu0 %v1563_v44 }
  0x31   : > { %1429 = vmatprep.subr.bf16.mxu1 %v1565_v46 }
  0x33   : > { %1416 = vmatpush3.bf16.msra.mxu0 %v1564_v45 }
  0x34   : > { %1430 = vmatpush3.bf16.msra.mxu1 %v1566_v47  ;;  %1445 = vmatprep.subr.bf16.mxu0 %v1570_v50 }
  0x35   : > { %1431 = vmatprep.subr.bf16.mxu1 %v1571_v51 }
  0x36   : > { %1044 = vmatmul.mubr.bf16.vlgmr.msra.gmra.mrb[4].mxu0 %v1567_v48 }
  0x37   : > { %1446 = vmatpush3.bf16.msra.mxu0 %v1572_v52  ;;  %1125 = vmatprep.mubr.bf16.mxu0 %v1603_v17 }
  0x38   : > { %1432 = vmatpush3.bf16.msra.mxu1 %v1573_v53  ;;  %1447 = vmatprep.subr.bf16.mxu0 %v1574_v54 }
  0x39   : > { %1433 = vmatprep.subr.bf16.mxu1 %v1575_v55 }
  0x3b   : > { %1448 = vmatpush3.bf16.msra.mxu0 %v1576_v56 }
  0x3c   : > { %1434 = vmatpush3.bf16.msra.mxu1 %v1577_v57  ;;  %1449 = vmatprep.subr.bf16.mxu0 %v1578_v58 }
  0x3d   : > { %1435 = vmatprep.subr.bf16.mxu1 %v1579_v59 }
  0x3f   : > { %1450 = vmatpush3.bf16.msra.mxu0 %v1580_v60  ;;  %v1362_v60 = vld [vmem:[%s1939_s4] ss:$0 sm:$0xff] }
  0x40   : > { %1436 = vmatpush3.bf16.msra.mxu1 %v1581_v61  ;;  %1451 = vmatprep.subr.bf16.mxu0 %v1582_v62 }
  0x41   : > { %1437 = vmatprep.subr.bf16.mxu1 %v1583_v63 }
  0x43   : > { %1452 = vmatpush3.bf16.msra.mxu0 %v1584_v0 }
  0x44   : > { %1438 = vmatpush3.bf16.msra.mxu1 %v1585_v2  ;;  %1453 = vmatprep.subr.bf16.mxu0 %v1589_v5 }
  0x45   : > { %1488 = vmatprep.subr.bf16.mxu1 %v1617_v1 }
  0x47   : > { %1085 = vmatmul.mubr.bf16.vlgmr.msra.gmra.mrb[4].mxu1 %v1586_v3  ;;  %1454 = vmatpush3.bf16.msra.mxu0 %v1590_v6 }
  0x48   : > { %1489 = vmatpush3.bf16.msra.mxu1 %v1591_v7  ;;  %1504 = vmatprep.mubr.msk.bf16.mxu1 %vm1618_vm0, %v1617_v1 }
  0x49   : > { %1455 = vmatprep.subr.bf16.mxu0 %v1592_v8  ;;  %1490 = vmatprep.subr.bf16.mxu1 %v1617_v1 }
  0x4b   : > { %1456 = vmatpush3.bf16.msra.mxu0 %v1593_v9 }
  0x4c   : > { %1491 = vmatpush3.bf16.msra.mxu1 %v1594_v10  ;;  %1457 = vmatprep.subr.bf16.mxu0 %v1595_v11 }
  0x4d   : > { %1492 = vmatprep.subr.bf16.mxu1 %v1617_v1 }
  0x4f   : > { %1458 = vmatpush3.bf16.msra.mxu0 %v1596_v12 }
  0x50   : > { %1493 = vmatpush3.bf16.msra.mxu1 %v1597_v13  ;;  %1459 = vmatprep.subr.bf16.mxu0 %v1598_v14 }
  0x51   : > { %1494 = vmatprep.subr.bf16.mxu1 %v1617_v1 }
  0x53   : > { %1460 = vmatpush3.bf16.msra.mxu0 %v1599_v15 }
  0x54   : > { %1495 = vmatpush3.bf16.msra.mxu1 %v1600_v16 }
  0x55   : > { %1496 = vmatprep.subr.bf16.mxu1 %v1617_v1 }
  0x56   : > { %1126 = vmatmul.mubr.bf16.vlgmr.msra.gmra.mrb[8].mxu0 %v1601_v18 }
  0x58   : > { %1497 = vmatpush3.bf16.msra.mxu1 %v1604_v19 }
  0x59   : > { %1498 = vmatprep.subr.bf16.mxu1 %v1617_v1 }
  0x5c   : > { %1499 = vmatpush3.bf16.msra.mxu1 %v1605_v20 }
  0x5d   : > { %1500 = vmatprep.subr.bf16.mxu1 %v1617_v1 }
  0x60   : > { %1501 = vmatpush3.bf16.msra.mxu1 %v1606_v21 }
  0x61   : > { %1502 = vmatprep.subr.bf16.mxu1 %v1617_v1 }
  0x64   : > { %1503 = vmatpush3.bf16.msra.mxu1 %v1607_v22 }
  0x67   : > { %1505 = vmatmul.mubr.bf16.vlgmr.msra.gmra.mrb[8].mxu1 %v1608_v23 }
  0xe9   : > { %v485_v24 = vpop.f32.mrb[0].mxu0 }
  0xea   : > { %v1486_v25 = vpop.f32.mrb[1].mxu0 }
  0xeb   : > { %v488_v26 = vpop.f32.mrb[2].mxu0 }
  0xec   : > { %v1487_v27 = vpop.f32.mrb[3].mxu0 }
  0xfa   : > { %v1395_v28 = vpop.f32.mrb[0].mxu1 }
  0xfb   : > { %v1396_v29 = vpop.f32.mrb[1].mxu1 }
  0xfc   : > { %v1397_v30 = vadd.f32 %v1396_v29, %v1395_v28  ;;  %v1398_v31 = vpop.f32.mrb[2].mxu1 }
  0xfd   : > { %v1399_v32 = vpop.f32.mrb[3].mxu1 }
  0xfe   : > { %v1005_v33 = vadd.f32 %v1397_v30, %v485_v24  ;;  %v1400_v34 = vadd.f32 %v1399_v32, %v1398_v31 }
 0x100   : > { %v1008_v35 = vadd.f32 %v1400_v34, %v488_v26 }
 0x109   : > { %v1417_v36 = vpop.f32.mrb[4].mxu0 }
 0x10a   : > { %v1418_v37 = vpop.f32.mrb[5].mxu0 }
 0x10b   : > { %v1419_v38 = vadd.f32 %v1418_v37, %v1417_v36  ;;  %v1420_v39 = vpop.f32.mrb[6].mxu0 }
 0x10c   : > { %v1421_v1 = vpop.f32.mrb[7].mxu0 }
 0x10d   : > { %v1046_v40 = vadd.f32 %v1419_v38, %v1005_v33  ;;  %v1422_v41 = vadd.f32 %v1421_v1, %v1420_v39 }
 0x10f   : > { %v1049_v42 = vadd.f32 %v1422_v41, %v1008_v35 }
 0x11a   : > { %v1439_v43 = vpop.f32.mrb[4].mxu1 }
 0x11b   : > { %v1440_v44 = vpop.f32.mrb[5].mxu1 }
 0x11c   : > { %v1441_v45 = vadd.f32 %v1440_v44, %v1439_v43  ;;  %v1442_v46 = vpop.f32.mrb[6].mxu1 }
 0x11d   : > { %v1443_v47 = vpop.f32.mrb[7].mxu1 }
 0x11e   : > { %v1087_v48 = vadd.f32 %v1441_v45, %v1046_v40  ;;  %v1444_v49 = vadd.f32 %v1443_v47, %v1442_v46 }
 0x120   : > { %v1090_v50 = vadd.f32 %v1444_v49, %v1049_v42 }
 0x129   : > { %v1461_v51 = vpop.f32.mrb[8].mxu0 }
 0x12a   : > { %v1462_v52 = vpop.f32.mrb[9].mxu0 }
 0x12b   : > { %v1463_v53 = vadd.f32 %v1462_v52, %v1461_v51  ;;  %v1464_v54 = vpop.f32.mrb[10].mxu0 }
 0x12c   : > { %v1465_v55 = vpop.f32.mrb[11].mxu0 }
 0x12d   : > { %v1466_v56 = vadd.f32 %v1465_v55, %v1464_v54  ;;  %v1128_v57 = vadd.f32 %v1463_v53, %v1087_v48 }
 0x12f   : > { %v1131_v58 = vadd.f32 %v1466_v56, %v1090_v50 }
 0x13a   : > { %v1168_v59 = vpop.f32.mrb[8].mxu1 }
 0x13b   : > { %v1169_v61 = vadd.f32 %v1168_v59, %v1128_v57  ;;  %v1506_v62 = vpop.f32.mrb[9].mxu1 }
 0x13c   : > { %v1171_v63 = vpop.f32.mrb[10].mxu1 }
 0x13d   : > { %v1182_v0 = vadd.f32 %v1362_v60, %v1169_v61  ;;  %v1172_v2 = vadd.f32 %v1171_v63, %v1131_v58  ;;  %v1507_v3 = vpop.f32.mrb[11].mxu1 }
 0x13f   : > { %v1183_v4 = vadd.f32 %v1362_v60, %v1172_v2  ;;  %v1184_v5 = vmax.f32 %v1182_v0, 0.0 }
 0x141   : > { %v1185_v6 = vmax.f32 %v1183_v4, 0.0 }
 0x143   : > { %v1372_v7 = vpack.c.bf16 %v1185_v6, %v1184_v5 }
 0x145   : > { %1373 = vst [vmem:[%s251_s9] sm:$0xff] %v1372_v7  }
 0x146 PF: > { %s15_s18 = sadd.s32 1, %s1615_s18  }
 0x147   : > { %p12_p4 = scmp.ge.s32.totalorder %s15_s18, 4  }
 0x149   :  { %14 = sbr.rel (!%p12_p4) target bundleno = 1 (0x1), region = 73 }

// kernel: squeeze.22
= control target key start
LH: loop header
LB: loop body
LE: loop exit
PB: predicated region body
PF: predicated region fallthrough
CT: control target
= control target key end

     0   :  { %s28_s10 = smov 3  ;;  %s176_s11 = smov 3  ;;  %vm181_vm0 = vcmask 1031168   ;;  %vm11_vm1 = vcmask 48128   ;;  %vm185_vm2 = vcmask 15360   ;;  %vm188_vm3 = vcmask 48144   ;;  %s376_s0 = inlined_call_operand.vmem [shape: f32[1,2,144], index: 0, kind: input, shape index: {}]   ;;  %s377_s1 = inlined_call_operand.vmem [shape: f32[2,24,6], index: 1, kind: output, shape index: {}]  }
   0x1   :  { %v191_v0 = vld [vmem:[%s376_s0 + $0x2] sm:$0x3]  ;;  %v8_v1 = vld [vmem:[%s376_s0] sm:$0x3]  ;;  %s14_s0 = smov 3  ;;  %s179_s12 = smov 3 }
   0x2   :  { %7 = vst [vmem:[#allocation0 + $0x8] sm:$0x3] %v191_v0  ;;  %9 = vst [vmem:[#allocation0] sm:$0x3] %v8_v1  ;;  %s239_s13 = smov 124   ;;  %s240_s14 = smov 122  }
   0x3   :  { %s241_s15 = smov 116   ;;  %s242_s16 = smov 118  }
   0x4   :  { %s243_s17 = smov 2   ;;  %s244_s18 = smov 110  }
   0x5   :  { %s245_s19 = smov 104   ;;  %s246_s20 = smov 98  }
   0x6   :  { %s72_s21 = smov 3  ;;  %s80_s22 = smov 3 }
   0x7   :  { %s247_s23 = smov 92   ;;  %s248_s24 = smov 86  }
   0x8   :  { %s88_s25 = smov 3  ;;  %s96_s26 = smov 3 }
   0x9   :  { %v15_v2 = vld [vmem:[#allocation0 + $0x9] ss:$-1 sm:%s14_s0]   ;;  %v21_v3 = vld [vmem:[#allocation0] sm:$0x3]   ;;  %s249_s27 = smov 80   ;;  %s250_s28 = smov 74  }
   0xa   :  { %16 = vrot.lane.b32.xlu0 %v15_v2, %s239_s13  ;;  %22 = vrot.lane.b32.xlu1 %v21_v3, %s240_s14  ;;  %v35_v4 = vld [vmem:[#allocation0] sm:$0x3]   ;;  %v29_v5 = vld [vmem:[#allocation0 + $0x9] ss:$-1 sm:%s28_s10]   ;;  %s104_s29 = smov 3  ;;  %s112_s30 = smov 3 }
   0xb   :  { %v177_v6 = vld [vmem:[#allocation0 + $0x1] ss:$-1 sm:%s176_s11]   ;;  %v180_v7 = vld [vmem:[#allocation0 + $0x9] ss:$-1 sm:%s179_s12]   ;;  %s251_s2 = smov 68   ;;  %s252_s3 = smov 62  }
   0xc   :  { %v182_v8 = vsel %vm181_vm0, %v180_v7, %v177_v6  ;;  %v41_v9 = vld [vmem:[#allocation0] sm:$0x3]   ;;  %s120_s4 = smov 3  ;;  %s128_s5 = smov 3 }
   0xd   :  { %v47_v10 = vld [vmem:[#allocation0] sm:$0x3]   ;;  %s253_s6 = smov 56   ;;  %s254_s7 = smov 50  }
   0xe   :  { %36 = vrot.lane.b32.xlu0 %v35_v4, %s241_s15  ;;  %30 = vrot.lane.b32.xlu1 %v29_v5, %s242_s16  ;;  %v53_v11 = vld [vmem:[#allocation0] sm:$0x3]   ;;  %s136_s8 = smov 3  ;;  %s144_s9 = smov 3 }
   0xf   :  { %v59_v12 = vld [vmem:[#allocation0] sm:$0x3]   ;;  %s255_s11 = smov 44   ;;  %s256_s12 = smov 38  }
  0x10   :  { %v65_v13 = vld [vmem:[#allocation0] sm:$0x3]   ;;  %s152_s13 = smov 3  ;;  %s160_s14 = smov 3 }
  0x11   :  { %v73_v14 = vld [vmem:[#allocation0 + $0x1] ss:$-1 sm:%s72_s21]   ;;  %s257_s15 = smov 32   ;;  %s258_s16 = smov 26  }
  0x12   :  { %183 = vrot.lane.b32.xlu0 %v182_v8, %s243_s17  ;;  %42 = vrot.lane.b32.xlu1 %v41_v9, %s244_s18  ;;  %v81_v15 = vld [vmem:[#allocation0 + $0x1] ss:$-1 sm:%s80_s22]   ;;  %s168_s17 = smov 3  ;;  %s259_s18 = smov 20  }
  0x13   :  { %v89_v16 = vld [vmem:[#allocation0 + $0x1] ss:$-1 sm:%s88_s25]  }
  0x14   :  { %v97_v17 = vld [vmem:[#allocation0 + $0x1] ss:$-1 sm:%s96_s26]  }
  0x15   :  { %v105_v18 = vld [vmem:[#allocation0 + $0x1] ss:$-1 sm:%s104_s29]  }
  0x16   :  { %48 = vrot.lane.b32.xlu0 %v47_v10, %s245_s19  ;;  %54 = vrot.lane.b32.xlu1 %v53_v11, %s246_s20  ;;  %v113_v19 = vld [vmem:[#allocation0 + $0x1] ss:$-1 sm:%s112_s30]   ;;  %s260_s19 = smov 14   ;;  %s261_s20 = smov 8  }
  0x17   :  { %v121_v20 = vld [vmem:[#allocation0 + $0x1] ss:$-1 sm:%s120_s4]  }
  0x18   :  { %v129_v21 = vld [vmem:[#allocation0 + $0x1] ss:$-1 sm:%s128_s5]  }
  0x19   :  { %v10_v22 = vld [vmem:[#allocation0] sm:$0x3]  }
  0x1a   :  { %60 = vrot.lane.b32.xlu0 %v59_v12, %s247_s23  ;;  %66 = vrot.lane.b32.xlu1 %v65_v13, %s248_s24  ;;  %12 = vst.msk [vmem:[%s377_s1] ss:$24 sm:$0x3] %vm11_vm1, %v10_v22   ;;  %v137_v23 = vld [vmem:[#allocation0 + $0x1] ss:$-1 sm:%s136_s8]  }
  0x1b   :  { %v145_v24 = vld [vmem:[#allocation0 + $0x1] ss:$-1 sm:%s144_s9]  }
  0x1c   :  { %v153_v25 = vld [vmem:[#allocation0 + $0x1] ss:$-1 sm:%s152_s13]  }
  0x1d   :  { %v161_v26 = vld [vmem:[#allocation0 + $0x1] ss:$-1 sm:%s160_s14]  }
  0x1e   :  { %74 = vrot.lane.b32.xlu0 %v73_v14, %s249_s27  ;;  %82 = vrot.lane.b32.xlu1 %v81_v15, %s250_s28  ;;  %v169_v27 = vld [vmem:[#allocation0 + $0x1] ss:$-1 sm:%s168_s17]  }
  0x22   :  { %90 = vrot.lane.b32.xlu0 %v89_v16, %s251_s2  ;;  %98 = vrot.lane.b32.xlu1 %v97_v17, %s252_s3 }
  0x26   :  { %106 = vrot.lane.b32.xlu0 %v105_v18, %s253_s6  ;;  %114 = vrot.lane.b32.xlu1 %v113_v19, %s254_s7 }
  0x2a   :  { %122 = vrot.lane.b32.xlu0 %v121_v20, %s255_s11  ;;  %130 = vrot.lane.b32.xlu1 %v129_v21, %s256_s12 }
  0x2e   :  { %138 = vrot.lane.b32.xlu0 %v137_v23, %s257_s15  ;;  %146 = vrot.lane.b32.xlu1 %v145_v24, %s258_s16 }
  0x32   :  { %154 = vrot.lane.b32.xlu0 %v153_v25, %s259_s18  ;;  %162 = vrot.lane.b32.xlu1 %v161_v26, %s260_s19 }
  0x36   :  { %170 = vrot.lane.b32.xlu0 %v169_v27, %s261_s20 }
  0x7c   :  { %v17_v28 = vpop.permute.xlu0 %16   ;;  %v23_v29 = vpop.permute.xlu1 %22  }
  0x7d   :  { %192 = vst.msk [vmem:[%s377_s1 + $0x2e] ss:$-24 sm:$0x3] %vm11_vm1, %v17_v28   ;;  %193 = vst.msk [vmem:[%s377_s1 + $0x1] ss:$24 sm:$0x3] %vm11_vm1, %v23_v29  }
  0x80   :  { %v37_v30 = vpop.permute.xlu0 %36   ;;  %v31_v31 = vpop.permute.xlu1 %30  }
  0x81   :  { %195 = vst.msk [vmem:[%s377_s1 + $0x2] ss:$24 sm:$0x3] %vm11_vm1, %v37_v30   ;;  %194 = vst.msk [vmem:[%s377_s1 + $0x2f] ss:$-24 sm:$0x3] %vm11_vm1, %v31_v31  }
  0x84   :  { %v184_v32 = vpop.permute.xlu0 %183   ;;  %v43_v33 = vpop.permute.xlu1 %42  }
  0x85   :  { %214 = vst.msk [vmem:[%s377_s1 + $0x2d] ss:$-24 sm:$0x3] %vm185_vm2, %v184_v32  }
  0x86   :  { %196 = vst.msk [vmem:[%s377_s1 + $0x3] ss:$24 sm:$0x3] %vm11_vm1, %v43_v33  }
  0x87   :  { %215 = vst.msk [vmem:[%s377_s1 + $0x2d] ss:$-24 sm:$0x3] %vm188_vm3, %v184_v32  }
  0x88   :  { %v49_v34 = vpop.permute.xlu0 %48   ;;  %v55_v35 = vpop.permute.xlu1 %54  }
  0x89   :  { %197 = vst.msk [vmem:[%s377_s1 + $0x4] ss:$24 sm:$0x3] %vm11_vm1, %v49_v34   ;;  %198 = vst.msk [vmem:[%s377_s1 + $0x5] ss:$24 sm:$0x3] %vm11_vm1, %v55_v35  }
  0x8c   :  { %v61_v36 = vpop.permute.xlu0 %60   ;;  %v67_v37 = vpop.permute.xlu1 %66  }
  0x8d   :  { %199 = vst.msk [vmem:[%s377_s1 + $0x6] ss:$24 sm:$0x3] %vm11_vm1, %v61_v36   ;;  %200 = vst.msk [vmem:[%s377_s1 + $0x7] ss:$24 sm:$0x3] %vm11_vm1, %v67_v37  }
  0x90   :  { %v75_v38 = vpop.permute.xlu0 %74   ;;  %v83_v39 = vpop.permute.xlu1 %82  }
  0x91   :  { %201 = vst.msk [vmem:[%s377_s1 + $0x20] ss:$-24 sm:$0x3] %vm11_vm1, %v75_v38   ;;  %202 = vst.msk [vmem:[%s377_s1 + $0x21] ss:$-24 sm:$0x3] %vm11_vm1, %v83_v39  }
  0x94   :  { %v91_v40 = vpop.permute.xlu0 %90   ;;  %v99_v41 = vpop.permute.xlu1 %98  }
  0x95   :  { %203 = vst.msk [vmem:[%s377_s1 + $0x22] ss:$-24 sm:$0x3] %vm11_vm1, %v91_v40   ;;  %204 = vst.msk [vmem:[%s377_s1 + $0x23] ss:$-24 sm:$0x3] %vm11_vm1, %v99_v41  }
  0x98   :  { %v107_v42 = vpop.permute.xlu0 %106   ;;  %v115_v43 = vpop.permute.xlu1 %114  }
  0x99   :  { %205 = vst.msk [vmem:[%s377_s1 + $0x24] ss:$-24 sm:$0x3] %vm11_vm1, %v107_v42   ;;  %206 = vst.msk [vmem:[%s377_s1 + $0x25] ss:$-24 sm:$0x3] %vm11_vm1, %v115_v43  }
  0x9c   :  { %v123_v44 = vpop.permute.xlu0 %122   ;;  %v131_v45 = vpop.permute.xlu1 %130  }
  0x9d   :  { %207 = vst.msk [vmem:[%s377_s1 + $0x26] ss:$-24 sm:$0x3] %vm11_vm1, %v123_v44   ;;  %208 = vst.msk [vmem:[%s377_s1 + $0x27] ss:$-24 sm:$0x3] %vm11_vm1, %v131_v45  }
  0xa0   :  { %v139_v46 = vpop.permute.xlu0 %138   ;;  %v147_v47 = vpop.permute.xlu1 %146  }
  0xa1   :  { %209 = vst.msk [vmem:[%s377_s1 + $0x28] ss:$-24 sm:$0x3] %vm11_vm1, %v139_v46   ;;  %210 = vst.msk [vmem:[%s377_s1 + $0x29] ss:$-24 sm:$0x3] %vm11_vm1, %v147_v47  }
  0xa4   :  { %v155_v48 = vpop.permute.xlu0 %154   ;;  %v163_v49 = vpop.permute.xlu1 %162  }
  0xa5   :  { %211 = vst.msk [vmem:[%s377_s1 + $0x2a] ss:$-24 sm:$0x3] %vm11_vm1, %v155_v48   ;;  %212 = vst.msk [vmem:[%s377_s1 + $0x2b] ss:$-24 sm:$0x3] %vm11_vm1, %v163_v49  }
  0xa8   :  { %v171_v50 = vpop.permute.xlu0 %170  }
  0xa9   :  { %213 = vst.msk [vmem:[%s377_s1 + $0x2c] ss:$-24 sm:$0x3] %vm11_vm1, %v171_v50  }

// kernel: base_model_forward.11
= control target key start
LH: loop header
LB: loop body
LE: loop exit
PB: predicated region body
PF: predicated region fallthrough
CT: control target
= control target key end

     0   :  { %v5301_v1 = vmov 0   ;;  %vm92_vm0 = vcmask 1041409   ;;  %s6968_s1 = inlined_call_operand.vmem [shape: bf16[128,256], index: 1, kind: input, shape index: {}]   ;;  %s6969_s2 = inlined_call_operand.vmem [shape: bf16[512,256], index: 2, kind: input, shape index: {}]   ;;  %s6970_s0 = inlined_call_operand.vmem [shape: bf16[2,16,128], index: 0, kind: input, shape index: {}]   ;;  %s6971_s8 = inlined_call_operand.vmem [shape: f32[2,512], index: 8, kind: input, shape index: {}]   ;;  %s6972_s4 = inlined_call_operand.vmem [shape: bf16[256,256], index: 4, kind: input, shape index: {}]   ;;  %s6973_s6 = inlined_call_operand.vmem [shape: bf16[256,512], index: 6, kind: input, shape index: {}]   ;;  %s6974_s3 = inlined_call_operand.vmem [shape: f32[1,256], index: 3, kind: input, shape index: {}, may-alias: {3,5}]   ;;  %s6975_s5 = inlined_call_operand.vmem [shape: f32[1,256], index: 5, kind: input, shape index: {}, may-alias: {3,5}]   ;;  %s6976_s7 = inlined_call_operand.vmem [shape: f32[1,512], index: 7, kind: input, shape index: {}]   ;;  %s6977_s9 = inlined_call_operand.vmem [shape: f32[3,2,512], index: 9, kind: output, shape index: {}]  }
   0x1   :  { %v4555_v0 = vld [vmem:[%s6968_s1 + $0x4] ss:$8 sps:$4 sm:$0xff]   ;;  %208 = vmatprep.mubr.bf16.mxu0 %v5301_v1  ;;  %v4557_v2 = vld [vmem:[%s6968_s1] ss:$8 sps:$4 sm:$0xff]   ;;  %v4558_v3 = vld [vmem:[%s6968_s1 + $0x14] ss:$8 sps:$4 sm:$0xff]  }
   0x2   :  { %176 = vmatprep.subr.bf16.mxu0 %v4555_v0  ;;  %v4560_v4 = vld [vmem:[%s6968_s1 + $0x10] ss:$8 sps:$4 sm:$0xff]   ;;  %v4561_v5 = vld [vmem:[%s6968_s1 + $0x24] ss:$8 sps:$4 sm:$0xff]   ;;  %v4563_v6 = vld [vmem:[%s6968_s1 + $0x20] ss:$8 sps:$4 sm:$0xff]  }
   0x3   :  { %177 = vmatpush1.bf16.msra.mxu0 %v4557_v2  ;;  %v4564_v7 = vld [vmem:[%s6968_s1 + $0x34] ss:$8 sps:$4 sm:$0xff]   ;;  %v4566_v8 = vld [vmem:[%s6968_s1 + $0x30] ss:$8 sps:$4 sm:$0xff]   ;;  %v4567_v9 = vld [vmem:[%s6968_s1 + $0x44] ss:$8 sps:$4 sm:$0xff]  }
   0x4   :  { %178 = vmatprep.subr.bf16.mxu0 %v4558_v3  ;;  %v4579_v10 = vld [vmem:[%s6969_s2 + $0x4] ss:$8 sps:$4 sm:$0xff]   ;;  %v4581_v11 = vld [vmem:[%s6969_s2] ss:$8 sps:$4 sm:$0xff]   ;;  %v4585_v19 = vld [vmem:[%s6969_s2 + $0x14] ss:$8 sps:$4 sm:$0xff]  }
   0x5   :  { %v4545_v12 = vld [vmem:[%s6970_s0] sm:$0xff]   ;;  %v4552_v13 = vld [vmem:[%s6970_s0 + $0x8] sm:$0xff]   ;;  %628 = vmatprep.subr.bf16.mxu1 %v4579_v10  ;;  %v4587_v22 = vld [vmem:[%s6969_s2 + $0x10] ss:$8 sps:$4 sm:$0xff]  }
   0x6   :  { %v4569_v14 = vld [vmem:[%s6968_s1 + $0x40] ss:$8 sps:$4 sm:$0xff]   ;;  %v4546_v15 = vunpack.c.l.bf16 %v4545_v12  ;;  %v4547_v16 = vunpack.c.h.bf16 %v4545_v12  ;;  %v4550_v17 = vunpack.c.l.bf16 %v4552_v13  ;;  %v4551_v18 = vunpack.c.h.bf16 %v4552_v13  ;;  %629 = vmatpush1.bf16.msra.mxu1 %v4581_v11  ;;  %v4570_v23 = vld [vmem:[%s6968_s1 + $0x54] ss:$8 sps:$4 sm:$0xff]   ;;  %v4591_v26 = vld [vmem:[%s6969_s2 + $0x24] ss:$8 sps:$4 sm:$0xff]  }
   0x7   :  { %179 = vmatpush1.bf16.msra.mxu0 %v4560_v4  ;;  %630 = vmatprep.subr.bf16.mxu1 %v4585_v19  ;;  %v4593_v27 = vld [vmem:[%s6969_s2 + $0x20] ss:$8 sps:$4 sm:$0xff]   ;;  %v4572_v28 = vld [vmem:[%s6968_s1 + $0x50] ss:$8 sps:$4 sm:$0xff]   ;;  %v4573_v31 = vld [vmem:[%s6968_s1 + $0x64] ss:$8 sps:$4 sm:$0xff]   ;;  %v78_v4 = vlaneseq }
   0x8   :  { %180 = vmatprep.subr.bf16.mxu0 %v4561_v5  ;;  %v41_v20 = vadd.f32 %v4547_v16, %v4546_v15  ;;  %v48_v21 = vadd.f32 %v4551_v18, %v4550_v17  ;;  %v4597_v32 = vld [vmem:[%s6969_s2 + $0x34] ss:$8 sps:$4 sm:$0xff]   ;;  %v4575_v35 = vld [vmem:[%s6968_s1 + $0x60] ss:$8 sps:$4 sm:$0xff]   ;;  %v4599_v36 = vld [vmem:[%s6969_s2 + $0x30] ss:$8 sps:$4 sm:$0xff]  }
   0x9   :  { %v4603_v39 = vld [vmem:[%s6969_s2 + $0x44] ss:$8 sps:$4 sm:$0xff]   ;;  %v4576_v40 = vld [vmem:[%s6968_s1 + $0x74] ss:$8 sps:$4 sm:$0xff]   ;;  %v4578_v43 = vld [vmem:[%s6968_s1 + $0x70] ss:$8 sps:$4 sm:$0xff]  }
   0xa   :  { %v42_v24 = vrot.slane %v41_v20, 4  ;;  %v49_v25 = vrot.slane %v48_v21, 4  ;;  %631 = vmatpush1.bf16.msra.mxu1 %v4587_v22  ;;  %v4605_v44 = vld [vmem:[%s6969_s2 + $0x40] ss:$8 sps:$4 sm:$0xff]   ;;  %v4609_v47 = vld [vmem:[%s6969_s2 + $0x54] ss:$8 sps:$4 sm:$0xff]  }
   0xb   :  { %181 = vmatpush1.bf16.msra.mxu0 %v4563_v6  ;;  %632 = vmatprep.subr.bf16.mxu1 %v4591_v26  ;;  %v4584_v48 = vld [vmem:[%s6969_s2 + $0x104] ss:$8 sps:$4 sm:$0xff]   ;;  %v4611_v51 = vld [vmem:[%s6969_s2 + $0x50] ss:$8 sps:$4 sm:$0xff]   ;;  %v4582_v57 = vld [vmem:[%s6969_s2 + $0x100] ss:$8 sps:$4 sm:$0xff]  }
   0xc   :  { %182 = vmatprep.subr.bf16.mxu0 %v4564_v7  ;;  %v43_v29 = vadd.f32 %v42_v24, %v41_v20  ;;  %v50_v30 = vadd.f32 %v49_v25, %v48_v21  ;;  %v4615_v54 = vld [vmem:[%s6969_s2 + $0x64] ss:$8 sps:$4 sm:$0xff]   ;;  %v4617_v58 = vld [vmem:[%s6969_s2 + $0x60] ss:$8 sps:$4 sm:$0xff]   ;;  %v4621_v60 = vld [vmem:[%s6969_s2 + $0x74] ss:$8 sps:$4 sm:$0xff]  }
   0xd   :  { %v4590_v62 = vld [vmem:[%s6969_s2 + $0x114] ss:$8 sps:$4 sm:$0xff]   ;;  %v4588_v63 = vld [vmem:[%s6969_s2 + $0x110] ss:$8 sps:$4 sm:$0xff]   ;;  %v4627_v1 = vld [vmem:[%s6969_s2 + $0x84] ss:$8 sps:$4 sm:$0xff]  }
   0xe   :  { %v44_v33 = vrot.slane %v43_v29, 2  ;;  %v51_v34 = vrot.slane %v50_v30, 2  ;;  %633 = vmatpush1.bf16.msra.mxu1 %v4593_v27  ;;  %v4623_v0 = vld [vmem:[%s6969_s2 + $0x70] ss:$8 sps:$4 sm:$0xff]   ;;  %v4596_v2 = vld [vmem:[%s6969_s2 + $0x124] ss:$8 sps:$4 sm:$0xff]  }
   0xf   :  { %183 = vmatpush1.bf16.msra.mxu0 %v4566_v8  ;;  %634 = vmatprep.subr.bf16.mxu1 %v4597_v32  ;;  %v4594_v3 = vld [vmem:[%s6969_s2 + $0x120] ss:$8 sps:$4 sm:$0xff]   ;;  %v5302_v5 = vmov 1983009808   ;;  %v4633_v8 = vld [vmem:[%s6969_s2 + $0x94] ss:$8 sps:$4 sm:$0xff]  }
  0x10   :  { %184 = vmatprep.subr.bf16.mxu0 %v4567_v9  ;;  %v45_v37 = vadd.f32 %v44_v33, %v43_v29  ;;  %v52_v38 = vadd.f32 %v51_v34, %v50_v30  ;;  %v221_v6 = vunpack.c.l.s4 %v5302_v5  ;;  %v4629_v7 = vld [vmem:[%s6969_s2 + $0x80] ss:$8 sps:$4 sm:$0xff]   ;;  %v4602_v9 = vld [vmem:[%s6969_s2 + $0x134] ss:$8 sps:$4 sm:$0xff]   ;;  %v4600_v10 = vld [vmem:[%s6969_s2 + $0x130] ss:$8 sps:$4 sm:$0xff]  }
  0x11   :  { %v5488_v11 = vshrl.u32 %v78_v4, 7  ;;  %v4635_v13 = vld [vmem:[%s6969_s2 + $0x90] ss:$8 sps:$4 sm:$0xff]   ;;  %v4608_v15 = vld [vmem:[%s6969_s2 + $0x144] ss:$8 sps:$4 sm:$0xff]  }
  0x12   :  { %v46_v41 = vrot.slane %v45_v37, 1  ;;  %v53_v42 = vrot.slane %v52_v38, 1  ;;  %635 = vmatpush1.bf16.msra.mxu1 %v4599_v36  ;;  %v222_v12 = vunpack.c.0.s8 %v221_v6  ;;  %v4606_v16 = vld [vmem:[%s6969_s2 + $0x140] ss:$8 sps:$4 sm:$0xff]   ;;  %v4645_v19 = vld [vmem:[%s6969_s2 + $0xb4] ss:$8 sps:$4 sm:$0xff]  }
  0x13   :  { %185 = vmatpush1.bf16.msra.mxu0 %v4569_v14  ;;  %636 = vmatprep.subr.bf16.mxu1 %v4603_v39  ;;  %v4639_v14 = vld [vmem:[%s6969_s2 + $0xa4] ss:$8 sps:$4 sm:$0xff]   ;;  %v4641_v18 = vld [vmem:[%s6969_s2 + $0xa0] ss:$8 sps:$4 sm:$0xff]   ;;  %v4614_v20 = vld [vmem:[%s6969_s2 + $0x154] ss:$8 sps:$4 sm:$0xff]  }
  0x14   :  { %186 = vmatprep.subr.bf16.mxu0 %v4570_v23  ;;  %v47_v45 = vadd.f32 %v46_v41, %v45_v37  ;;  %v54_v46 = vadd.f32 %v53_v42, %v52_v38  ;;  %v5503_v17 = vsub.s32 %v222_v12, %v5488_v11  ;;  %v217_v21 = vld [vmem:[%s6971_s8] sm:$0xff]  ;;  %v4612_v22 = vld [vmem:[%s6969_s2 + $0x150] ss:$8 sps:$4 sm:$0xff]   ;;  %v4657_v32 = vld [vmem:[%s6969_s2 + $0xd4] ss:$8 sps:$4 sm:$0xff]  }
  0x15   :  { %v219_v23 = vcombine.high %v217_v21, %v217_v21  ;;  %v4620_v25 = vld [vmem:[%s6969_s2 + $0x164] ss:$8 sps:$4 sm:$0xff]   ;;  %v4647_v26 = vld [vmem:[%s6969_s2 + $0xb0] ss:$8 sps:$4 sm:$0xff]   ;;  %v4653_v30 = vld [vmem:[%s6969_s2 + $0xc0] ss:$8 sps:$4 sm:$0xff]  }
  0x16   :  { %v56_v49 = vmul.f32 0.0625, %v47_v45  ;;  %v57_v50 = vmul.f32 0.0625, %v54_v46  ;;  %637 = vmatpush1.bf16.msra.mxu1 %v4605_v44  ;;  %v226_v24 = vrot.slane %v217_v21, %v5503_v17  ;;  %v4651_v27 = vld [vmem:[%s6969_s2 + $0xc4] ss:$8 sps:$4 sm:$0xff]   ;;  %v4659_v37 = vld [vmem:[%s6969_s2 + $0xd0] ss:$8 sps:$4 sm:$0xff]  }
  0x17   :  { %187 = vmatpush1.bf16.msra.mxu0 %v4572_v28  ;;  %638 = vmatprep.subr.bf16.mxu1 %v4609_v47  ;;  %v5531_v29 = vrot.slane %v219_v23, %v5503_v17  ;;  %v4624_v38 = vld [vmem:[%s6969_s2 + $0x170] ss:$8 sps:$4 sm:$0xff]   ;;  %v4663_v39 = vld [vmem:[%s6969_s2 + $0xe4] ss:$8 sps:$4 sm:$0xff]   ;;  %v4665_v41 = vld [vmem:[%s6969_s2 + $0xe0] ss:$8 sps:$4 sm:$0xff]  }
  0x18   :  { %188 = vmatprep.subr.bf16.mxu0 %v4573_v31  ;;  %v58_v52 = vpack.c.bf16 %v56_v49, %v56_v49  ;;  %v59_v53 = vpack.c.bf16 %v57_v50, %v57_v50  ;;  %v234_v28 = vcombine.high %v226_v24, %v226_v24  ;;  %v4618_v31 = vld [vmem:[%s6969_s2 + $0x160] ss:$8 sps:$4 sm:$0xff]   ;;  %v4638_v44 = vld [vmem:[%s6969_s2 + $0x194] ss:$8 sps:$4 sm:$0xff]   ;;  %v4671_v45 = vld [vmem:[%s6969_s2 + $0xf0] ss:$8 sps:$4 sm:$0xff]   ;;  %v240_v49 = vpack.c.bf16 %v226_v24, %v226_v24 }
  0x19   :  { %v235_v34 = vcombine.high %v5531_v29, %v5531_v29  ;;  %v4630_v42 = vld [vmem:[%s6969_s2 + $0x180] ss:$8 sps:$4 sm:$0xff]   ;;  %v4636_v46 = vld [vmem:[%s6969_s2 + $0x190] ss:$8 sps:$4 sm:$0xff]   ;;  %v4644_v47 = vld [vmem:[%s6969_s2 + $0x1a4] ss:$8 sps:$4 sm:$0xff]  }
  0x1a   :  { %v90_v55 = vunpack.c.l.b16 %v58_v52  ;;  %v91_v56 = vunpack.c.l.b16 %v59_v53  ;;  %639 = vmatpush1.bf16.msra.mxu1 %v4611_v51  ;;  %v241_v33 = vpack.c.bf16 %v234_v28, %v234_v28  ;;  %v4650_v50 = vld [vmem:[%s6969_s2 + $0x1b4] ss:$8 sps:$4 sm:$0xff]   ;;  %v4648_v51 = vld [vmem:[%s6969_s2 + $0x1b0] ss:$8 sps:$4 sm:$0xff]   ;;  %v4656_v52 = vld [vmem:[%s6969_s2 + $0x1c4] ss:$8 sps:$4 sm:$0xff]  }
  0x1b   :  { %189 = vmatpush1.bf16.msra.mxu0 %v4575_v35  ;;  %640 = vmatprep.subr.bf16.mxu1 %v4615_v54  ;;  %v4626_v35 = vld [vmem:[%s6969_s2 + $0x174] ss:$8 sps:$4 sm:$0xff]   ;;  %v243_v36 = vpack.c.bf16 %v235_v34, %v235_v34  ;;  %v4654_v53 = vld [vmem:[%s6969_s2 + $0x1c0] ss:$8 sps:$4 sm:$0xff]   ;;  %v4685_v4 = vld [vmem:[%s6972_s4 + $0x30] ss:$8 sps:$4 sm:$0xff]  }
  0x1c   :  { %190 = vmatprep.subr.bf16.mxu0 %v4576_v40  ;;  %v93_v59 = vsel %vm92_vm0, %v91_v56, %v90_v55  ;;  %660 = vmatprep.mubr.bf16.mxu1 %v241_v33  ;;  %v4632_v40 = vld [vmem:[%s6969_s2 + $0x184] ss:$8 sps:$4 sm:$0xff]   ;;  %v4662_v54 = vld [vmem:[%s6969_s2 + $0x1d4] ss:$8 sps:$4 sm:$0xff]   ;;  %v4660_v55 = vld [vmem:[%s6969_s2 + $0x1d0] ss:$8 sps:$4 sm:$0xff]  }
  0x1d   :  { %v94_v61 = vpack.c.b16 %v93_v59, %v93_v59  ;;  %v4668_v56 = vld [vmem:[%s6969_s2 + $0x1e4] ss:$8 sps:$4 sm:$0xff]   ;;  %v4673_v59 = vld [vmem:[%s6969_s2 + $0x1f0] ss:$8 sps:$4 sm:$0xff]   ;;  %v4688_v6 = vld [vmem:[%s6972_s4 + $0x40] ss:$8 sps:$4 sm:$0xff]  }
  0x1e   :  { %641 = vmatpush1.bf16.msra.mxu1 %v4617_v58  ;;  %v4675_v58 = vld [vmem:[%s6969_s2 + $0x1f4] ss:$8 sps:$4 sm:$0xff]   ;;  %v4690_v5 = vld [vmem:[%s6972_s4 + $0x44] ss:$8 sps:$4 sm:$0xff]   ;;  %v4712_v24 = vld [vmem:[%s6972_s4 + $0xc0] ss:$8 sps:$4 sm:$0xff]  }
  0x1f   :  { %191 = vmatpush1.bf16.msra.mxu0 %v4578_v43  ;;  %642 = vmatprep.subr.bf16.mxu1 %v4621_v60  ;;  %v4669_v43 = vld [vmem:[%s6969_s2 + $0xf4] ss:$8 sps:$4 sm:$0xff]   ;;  %v242_v60 = vpack.c.bf16 %v5531_v29, %v5531_v29  ;;  %v4714_v23 = vld [vmem:[%s6972_s4 + $0xc4] ss:$8 sps:$4 sm:$0xff]   ;;  %v4718_v28 = vld [vmem:[%s6972_s4 + $0xe0] ss:$8 sps:$4 sm:$0xff]  }
  0x20   :  { %669 = vmatprep.subr.bf16.mxu0 %v4584_v48  ;;  %v4642_v48 = vld [vmem:[%s6969_s2 + $0x1a0] ss:$8 sps:$4 sm:$0xff]   ;;  %v4699_v12 = vld [vmem:[%s6972_s4 + $0x74] ss:$8 sps:$4 sm:$0xff]  }
  0x21   :  { %v4711_v21 = vld [vmem:[%s6972_s4 + $0xb4] ss:$8 sps:$4 sm:$0xff]  }
  0x22   :  { %209 = vmatmul.mubr.bf16.vlgmr.msra.gmra.mrb[0].mxu0 %v94_v61  ;;  %643 = vmatpush1.bf16.msra.mxu1 %v4623_v0  ;;  %v4676_v61 = vld [vmem:[%s6972_s4] ss:$8 sps:$4 sm:$0xff]   ;;  %v4679_v0 = vld [vmem:[%s6972_s4 + $0x10] ss:$8 sps:$4 sm:$0xff]   ;;  %v4723_v29 = vld [vmem:[%s6972_s4 + $0xf4] ss:$8 sps:$4 sm:$0xff]  }
  0x23   :  { %670 = vmatpush1.bf16.msra.mxu0 %v4582_v57  ;;  %644 = vmatprep.subr.bf16.mxu1 %v4627_v1  ;;  %v4666_v57 = vld [vmem:[%s6969_s2 + $0x1e0] ss:$8 sps:$4 sm:$0xff]   ;;  %v4684_v1 = vld [vmem:[%s6972_s4 + $0x24] ss:$8 sps:$4 sm:$0xff]  }
  0x24   :  { %671 = vmatprep.subr.bf16.mxu0 %v4590_v62  ;;  %701 = vmatprep.mubr.bf16.mxu0 %v243_v36  ;;  %v4678_v62 = vld [vmem:[%s6972_s4 + $0x4] ss:$8 sps:$4 sm:$0xff]  }
  0x25   :  { %v4729_v33 = vld [vmem:[%s6973_s6 + $0xc] ss:$16 sps:$4 sm:$0xff]   ;;  %v4732_v34 = vld [vmem:[%s6973_s6 + $0x24] ss:$16 sps:$4 sm:$0xff]  }
  0x26   :  { %645 = vmatpush1.bf16.msra.mxu1 %v4629_v7  ;;  %v4693_v7 = vld [vmem:[%s6972_s4 + $0x54] ss:$8 sps:$4 sm:$0xff]  }
  0x27   :  { %672 = vmatpush1.bf16.msra.mxu0 %v4588_v63  ;;  %646 = vmatprep.subr.bf16.mxu1 %v4633_v8  ;;  %v4681_v63 = vld [vmem:[%s6972_s4 + $0x14] ss:$8 sps:$4 sm:$0xff]   ;;  %v4691_v8 = vld [vmem:[%s6972_s4 + $0x50] ss:$8 sps:$4 sm:$0xff]  }
  0x28   :  { %673 = vmatprep.subr.bf16.mxu0 %v4596_v2  ;;  %v4682_v2 = vld [vmem:[%s6972_s4 + $0x20] ss:$8 sps:$4 sm:$0xff]   ;;  %v4738_v36 = vld [vmem:[%s6973_s6 + $0x44] ss:$16 sps:$4 sm:$0xff]  }
  0x2a   :  { %647 = vmatpush1.bf16.msra.mxu1 %v4635_v13  ;;  %v4697_v13 = vld [vmem:[%s6972_s4 + $0x70] ss:$8 sps:$4 sm:$0xff]  }
  0x2b   :  { %674 = vmatpush1.bf16.msra.mxu0 %v4594_v3  ;;  %648 = vmatprep.subr.bf16.mxu1 %v4639_v14  ;;  %v4687_v3 = vld [vmem:[%s6972_s4 + $0x34] ss:$8 sps:$4 sm:$0xff]   ;;  %v4702_v14 = vld [vmem:[%s6972_s4 + $0x84] ss:$8 sps:$4 sm:$0xff]  }
  0x2c   :  { %675 = vmatprep.subr.bf16.mxu0 %v4602_v9  ;;  %v4696_v9 = vld [vmem:[%s6972_s4 + $0x64] ss:$8 sps:$4 sm:$0xff]  }
  0x2e   :  { %649 = vmatpush1.bf16.msra.mxu1 %v4641_v18  ;;  %v4703_v18 = vld [vmem:[%s6972_s4 + $0x90] ss:$8 sps:$4 sm:$0xff]  }
  0x2f   :  { %676 = vmatpush1.bf16.msra.mxu0 %v4600_v10  ;;  %650 = vmatprep.subr.bf16.mxu1 %v4645_v19  ;;  %v4694_v10 = vld [vmem:[%s6972_s4 + $0x60] ss:$8 sps:$4 sm:$0xff]   ;;  %v4708_v19 = vld [vmem:[%s6972_s4 + $0xa4] ss:$8 sps:$4 sm:$0xff]  }
  0x30   :  { %677 = vmatprep.subr.bf16.mxu0 %v4608_v15  ;;  %v4700_v15 = vld [vmem:[%s6972_s4 + $0x80] ss:$8 sps:$4 sm:$0xff]  }
  0x32   :  { %651 = vmatpush1.bf16.msra.mxu1 %v4647_v26  ;;  %v4715_v26 = vld [vmem:[%s6972_s4 + $0xd0] ss:$8 sps:$4 sm:$0xff]  }
  0x33   :  { %678 = vmatpush1.bf16.msra.mxu0 %v4606_v16  ;;  %652 = vmatprep.subr.bf16.mxu1 %v4651_v27  ;;  %v4705_v16 = vld [vmem:[%s6972_s4 + $0x94] ss:$8 sps:$4 sm:$0xff]   ;;  %v4720_v27 = vld [vmem:[%s6972_s4 + $0xe4] ss:$8 sps:$4 sm:$0xff]  }
  0x34   :  { %679 = vmatprep.subr.bf16.mxu0 %v4614_v20  ;;  %v4706_v20 = vld [vmem:[%s6972_s4 + $0xa0] ss:$8 sps:$4 sm:$0xff]  }
  0x36   :  { %653 = vmatpush1.bf16.msra.mxu1 %v4653_v30  ;;  %v4721_v30 = vld [vmem:[%s6972_s4 + $0xf0] ss:$8 sps:$4 sm:$0xff]  }
  0x37   :  { %680 = vmatpush1.bf16.msra.mxu0 %v4612_v22  ;;  %654 = vmatprep.subr.bf16.mxu1 %v4657_v32  ;;  %v4709_v22 = vld [vmem:[%s6972_s4 + $0xb0] ss:$8 sps:$4 sm:$0xff]   ;;  %v4726_v32 = vld [vmem:[%s6973_s6 + $0x4] ss:$16 sps:$4 sm:$0xff]  }
  0x38   :  { %681 = vmatprep.subr.bf16.mxu0 %v4620_v25  ;;  %v4717_v25 = vld [vmem:[%s6972_s4 + $0xd4] ss:$8 sps:$4 sm:$0xff]  }
  0x3a   :  { %655 = vmatpush1.bf16.msra.mxu1 %v4659_v37  ;;  %v4736_v37 = vld [vmem:[%s6973_s6 + $0x40] ss:$16 sps:$4 sm:$0xff]  }
  0x3b   :  { %682 = vmatpush1.bf16.msra.mxu0 %v4618_v31  ;;  %656 = vmatprep.subr.bf16.mxu1 %v4663_v39  ;;  %v4724_v31 = vld [vmem:[%s6973_s6] ss:$16 sps:$4 sm:$0xff]  }
  0x3c   :  { %683 = vmatprep.subr.bf16.mxu0 %v4626_v35  ;;  %v4730_v35 = vld [vmem:[%s6973_s6 + $0x20] ss:$16 sps:$4 sm:$0xff]  }
  0x3d   :  { %v4742_v39 = vld [vmem:[%s6973_s6 + $0x60] ss:$16 sps:$4 sm:$0xff]  }
  0x3e   :  { %657 = vmatpush1.bf16.msra.mxu1 %v4665_v41  ;;  %v4748_v41 = vld [vmem:[%s6973_s6 + $0x80] ss:$16 sps:$4 sm:$0xff]  }
  0x3f   :  { %684 = vmatpush1.bf16.msra.mxu0 %v4624_v38  ;;  %658 = vmatprep.subr.bf16.mxu1 %v4669_v43  ;;  %v4744_v38 = vld [vmem:[%s6973_s6 + $0x64] ss:$16 sps:$4 sm:$0xff]   ;;  %v4754_v43 = vld [vmem:[%s6973_s6 + $0xa0] ss:$16 sps:$4 sm:$0xff]  }
  0x40   :  { %685 = vmatprep.subr.bf16.mxu0 %v4632_v40  ;;  %v4750_v40 = vld [vmem:[%s6973_s6 + $0x84] ss:$16 sps:$4 sm:$0xff]  }
  0x42   :  { %659 = vmatpush1.bf16.msra.mxu1 %v4671_v45  ;;  %v4760_v45 = vld [vmem:[%s6973_s6 + $0xc0] ss:$16 sps:$4 sm:$0xff]  }
  0x43   :  { %686 = vmatpush1.bf16.msra.mxu0 %v4630_v42  ;;  %920 = vmatprep.subr.bf16.mxu1 %v4678_v62  ;;  %v4756_v42 = vld [vmem:[%s6973_s6 + $0xa4] ss:$16 sps:$4 sm:$0xff]  }
  0x44   :  { %687 = vmatprep.subr.bf16.mxu0 %v4638_v44  ;;  %v4762_v44 = vld [vmem:[%s6973_s6 + $0xc4] ss:$16 sps:$4 sm:$0xff]  }
  0x45   :  { %661 = vmatmul.mubr.bf16.vlgmr.msra.gmra.mrb[0].mxu1 %v240_v49  ;;  %v4772_v49 = vld [vmem:[%s6973_s6 + $0x100] ss:$16 sps:$4 sm:$0xff]  }
  0x46   :  { %921 = vmatpush1.bf16.msra.mxu1 %v4676_v61 }
  0x47   :  { %688 = vmatpush1.bf16.msra.mxu0 %v4636_v46  ;;  %922 = vmatprep.subr.bf16.mxu1 %v4681_v63  ;;  %v4768_v46 = vld [vmem:[%s6973_s6 + $0xe4] ss:$16 sps:$4 sm:$0xff]  }
  0x48   :  { %689 = vmatprep.subr.bf16.mxu0 %v4644_v47  ;;  %v4766_v47 = vld [vmem:[%s6973_s6 + $0xe0] ss:$16 sps:$4 sm:$0xff]  }
  0x4a   :  { %923 = vmatpush1.bf16.msra.mxu1 %v4679_v0 }
  0x4b   :  { %690 = vmatpush1.bf16.msra.mxu0 %v4642_v48  ;;  %924 = vmatprep.subr.bf16.mxu1 %v4684_v1  ;;  %v4774_v48 = vld [vmem:[%s6973_s6 + $0x104] ss:$16 sps:$4 sm:$0xff]  }
  0x4c   :  { %691 = vmatprep.subr.bf16.mxu0 %v4650_v50  ;;  %v4780_v50 = vld [vmem:[%s6973_s6 + $0x124] ss:$16 sps:$4 sm:$0xff]  }
  0x4e   :  { %925 = vmatpush1.bf16.msra.mxu1 %v4682_v2 }
  0x4f   :  { %692 = vmatpush1.bf16.msra.mxu0 %v4648_v51  ;;  %926 = vmatprep.subr.bf16.mxu1 %v4687_v3  ;;  %v4778_v51 = vld [vmem:[%s6973_s6 + $0x120] ss:$16 sps:$4 sm:$0xff]  }
  0x50   :  { %693 = vmatprep.subr.bf16.mxu0 %v4656_v52  ;;  %v4786_v52 = vld [vmem:[%s6973_s6 + $0x144] ss:$16 sps:$4 sm:$0xff]  }
  0x52   :  { %927 = vmatpush1.bf16.msra.mxu1 %v4685_v4  ;;  %v5799_v4 = vsub.s32 0, %v5488_v11 }
  0x53   :  { %694 = vmatpush1.bf16.msra.mxu0 %v4654_v53  ;;  %928 = vmatprep.subr.bf16.mxu1 %v4690_v5  ;;  %v4784_v53 = vld [vmem:[%s6973_s6 + $0x140] ss:$16 sps:$4 sm:$0xff]  }
  0x54   :  { %695 = vmatprep.subr.bf16.mxu0 %v4662_v54  ;;  %v4792_v54 = vld [vmem:[%s6973_s6 + $0x164] ss:$16 sps:$4 sm:$0xff]   ;;  %v76_v5 = vld [vmem:[%s6974_s3] sm:$0x3] }
  0x56   :  { %929 = vmatpush1.bf16.msra.mxu1 %v4688_v6  ;;  %v5805_v6 = vsub.s32 1, %v5488_v11 }
  0x57   :  { %696 = vmatpush1.bf16.msra.mxu0 %v4660_v55  ;;  %930 = vmatprep.subr.bf16.mxu1 %v4693_v7  ;;  %v4790_v55 = vld [vmem:[%s6973_s6 + $0x160] ss:$16 sps:$4 sm:$0xff]   ;;  %v81_v7 = vrot.slane %v76_v5, %v5799_v4 }
  0x58   :  { %697 = vmatprep.subr.bf16.mxu0 %v4668_v56  ;;  %v4798_v56 = vld [vmem:[%s6973_s6 + $0x184] ss:$16 sps:$4 sm:$0xff]  }
  0x5a   :  { %931 = vmatpush1.bf16.msra.mxu1 %v4691_v8  ;;  %v85_v8 = vrot.slane %v76_v5, %v5805_v6 }
  0x5b   :  { %698 = vmatpush1.bf16.msra.mxu0 %v4666_v57  ;;  %932 = vmatprep.subr.bf16.mxu1 %v4696_v9  ;;  %v4796_v57 = vld [vmem:[%s6973_s6 + $0x180] ss:$16 sps:$4 sm:$0xff]  }
  0x5c   :  { %699 = vmatprep.subr.bf16.mxu0 %v4675_v58  ;;  %v4804_v58 = vld [vmem:[%s6973_s6 + $0x1a4] ss:$16 sps:$4 sm:$0xff]  }
  0x5e   :  { %933 = vmatpush1.bf16.msra.mxu1 %v4694_v10 }
  0x5f   :  { %700 = vmatpush1.bf16.msra.mxu0 %v4673_v59  ;;  %934 = vmatprep.subr.bf16.mxu1 %v4699_v12  ;;  %v4802_v59 = vld [vmem:[%s6973_s6 + $0x1a0] ss:$16 sps:$4 sm:$0xff]  }
  0x60   :  { %1349 = vmatprep.subr.bf16.mxu0 %v4726_v32  ;;  %v4753_v32 = vld [vmem:[%s6973_s6 + $0x8c] ss:$16 sps:$4 sm:$0xff]  }
  0x62   :  { %702 = vmatmul.mubr.bf16.vlgmr.msra.gmra.mrb[4].mxu0 %v242_v60  ;;  %935 = vmatpush1.bf16.msra.mxu1 %v4697_v13 }
  0x63   :  { %936 = vmatprep.subr.bf16.mxu1 %v4702_v14  ;;  %1350 = vmatpush1.bf16.msra.mxu0 %v4724_v31  ;;  %v4745_v31 = vld [vmem:[%s6973_s6 + $0x68] ss:$16 sps:$4 sm:$0xff]  }
  0x64   :  { %1351 = vmatprep.subr.bf16.mxu0 %v4732_v34  ;;  %v4759_v34 = vld [vmem:[%s6973_s6 + $0xac] ss:$16 sps:$4 sm:$0xff]  }
  0x66   :  { %937 = vmatpush1.bf16.msra.mxu1 %v4700_v15 }
  0x67   :  { %938 = vmatprep.subr.bf16.mxu1 %v4705_v16  ;;  %1352 = vmatpush1.bf16.msra.mxu0 %v4730_v35  ;;  %v4757_v35 = vld [vmem:[%s6973_s6 + $0xa8] ss:$16 sps:$4 sm:$0xff]  }
  0x68   :  { %1353 = vmatprep.subr.bf16.mxu0 %v4738_v36  ;;  %v4765_v36 = vld [vmem:[%s6973_s6 + $0xcc] ss:$16 sps:$4 sm:$0xff]  }
  0x6a   :  { %939 = vmatpush1.bf16.msra.mxu1 %v4703_v18 }
  0x6b   :  { %940 = vmatprep.subr.bf16.mxu1 %v4708_v19  ;;  %1354 = vmatpush1.bf16.msra.mxu0 %v4736_v37  ;;  %v4763_v37 = vld [vmem:[%s6973_s6 + $0xc8] ss:$16 sps:$4 sm:$0xff]  }
  0x6c   :  { %1355 = vmatprep.subr.bf16.mxu0 %v4744_v38  ;;  %v4771_v38 = vld [vmem:[%s6973_s6 + $0xec] ss:$16 sps:$4 sm:$0xff]  }
  0x6e   :  { %941 = vmatpush1.bf16.msra.mxu1 %v4706_v20 }
  0x6f   :  { %942 = vmatprep.subr.bf16.mxu1 %v4711_v21  ;;  %1356 = vmatpush1.bf16.msra.mxu0 %v4742_v39  ;;  %v4769_v39 = vld [vmem:[%s6973_s6 + $0xe8] ss:$16 sps:$4 sm:$0xff]  }
  0x70   :  { %1357 = vmatprep.subr.bf16.mxu0 %v4750_v40  ;;  %v4777_v40 = vld [vmem:[%s6973_s6 + $0x10c] ss:$16 sps:$4 sm:$0xff]  }
  0x72   :  { %943 = vmatpush1.bf16.msra.mxu1 %v4709_v22 }
  0x73   :  { %944 = vmatprep.subr.bf16.mxu1 %v4714_v23  ;;  %1358 = vmatpush1.bf16.msra.mxu0 %v4748_v41  ;;  %v4775_v41 = vld [vmem:[%s6973_s6 + $0x108] ss:$16 sps:$4 sm:$0xff]  }
  0x74   :  { %1359 = vmatprep.subr.bf16.mxu0 %v4756_v42  ;;  %v4783_v42 = vld [vmem:[%s6973_s6 + $0x12c] ss:$16 sps:$4 sm:$0xff]  }
  0x76   :  { %945 = vmatpush1.bf16.msra.mxu1 %v4712_v24  ;;  %v4727_v24 = vld [vmem:[%s6973_s6 + $0x8] ss:$16 sps:$4 sm:$0xff]  }
  0x77   :  { %946 = vmatprep.subr.bf16.mxu1 %v4717_v25  ;;  %1360 = vmatpush1.bf16.msra.mxu0 %v4754_v43  ;;  %v4781_v43 = vld [vmem:[%s6973_s6 + $0x128] ss:$16 sps:$4 sm:$0xff]  }
  0x78   :  { %1361 = vmatprep.subr.bf16.mxu0 %v4762_v44  ;;  %v4789_v44 = vld [vmem:[%s6973_s6 + $0x14c] ss:$16 sps:$4 sm:$0xff]  }
  0x7a   :  { %947 = vmatpush1.bf16.msra.mxu1 %v4715_v26  ;;  %v4735_v26 = vld [vmem:[%s6973_s6 + $0x2c] ss:$16 sps:$4 sm:$0xff]  }
  0x7b   :  { %948 = vmatprep.subr.bf16.mxu1 %v4720_v27  ;;  %1362 = vmatpush1.bf16.msra.mxu0 %v4760_v45  ;;  %v4733_v27 = vld [vmem:[%s6973_s6 + $0x28] ss:$16 sps:$4 sm:$0xff]  }
  0x7c   :  { %1363 = vmatprep.subr.bf16.mxu0 %v4768_v46  ;;  %v4787_v45 = vld [vmem:[%s6973_s6 + $0x148] ss:$16 sps:$4 sm:$0xff]   ;;  %v4795_v46 = vld [vmem:[%s6973_s6 + $0x16c] ss:$16 sps:$4 sm:$0xff]  }
  0x7e   :  { %949 = vmatpush1.bf16.msra.mxu1 %v4718_v28  ;;  %v4741_v28 = vld [vmem:[%s6973_s6 + $0x4c] ss:$16 sps:$4 sm:$0xff]  }
  0x7f   :  { %950 = vmatprep.subr.bf16.mxu1 %v4723_v29  ;;  %1364 = vmatpush1.bf16.msra.mxu0 %v4766_v47  ;;  %v4739_v29 = vld [vmem:[%s6973_s6 + $0x48] ss:$16 sps:$4 sm:$0xff]  }
  0x80   :  { %1365 = vmatprep.subr.bf16.mxu0 %v4774_v48  ;;  %v4793_v47 = vld [vmem:[%s6973_s6 + $0x168] ss:$16 sps:$4 sm:$0xff]   ;;  %v4801_v48 = vld [vmem:[%s6973_s6 + $0x18c] ss:$16 sps:$4 sm:$0xff]  }
  0x82   :  { %951 = vmatpush1.bf16.msra.mxu1 %v4721_v30  ;;  %v4747_v30 = vld [vmem:[%s6973_s6 + $0x6c] ss:$16 sps:$4 sm:$0xff]  }
  0x83   :  { %1390 = vmatprep.subr.bf16.mxu1 %v4729_v33  ;;  %1366 = vmatpush1.bf16.msra.mxu0 %v4772_v49  ;;  %v4751_v33 = vld [vmem:[%s6973_s6 + $0x88] ss:$16 sps:$4 sm:$0xff]  }
  0x84   :  { %1367 = vmatprep.subr.bf16.mxu0 %v4780_v50  ;;  %v4799_v49 = vld [vmem:[%s6973_s6 + $0x188] ss:$16 sps:$4 sm:$0xff]   ;;  %v4807_v50 = vld [vmem:[%s6973_s6 + $0x1ac] ss:$16 sps:$4 sm:$0xff]  }
  0x87   :  { %1368 = vmatpush1.bf16.msra.mxu0 %v4778_v51  ;;  %v4805_v51 = vld [vmem:[%s6973_s6 + $0x1a8] ss:$16 sps:$4 sm:$0xff]  }
  0x88   :  { %1369 = vmatprep.subr.bf16.mxu0 %v4786_v52  ;;  %v4810_v52 = vld [vmem:[%s6973_s6 + $0x1c4] ss:$16 sps:$4 sm:$0xff]  }
  0x8b   :  { %1370 = vmatpush1.bf16.msra.mxu0 %v4784_v53  ;;  %v4813_v53 = vld [vmem:[%s6973_s6 + $0x1cc] ss:$16 sps:$4 sm:$0xff]  }
  0x8c   :  { %1371 = vmatprep.subr.bf16.mxu0 %v4792_v54  ;;  %v4808_v54 = vld [vmem:[%s6973_s6 + $0x1c0] ss:$16 sps:$4 sm:$0xff]  }
  0x8f   :  { %1372 = vmatpush1.bf16.msra.mxu0 %v4790_v55  ;;  %v4811_v55 = vld [vmem:[%s6973_s6 + $0x1c8] ss:$16 sps:$4 sm:$0xff]  }
  0x90   :  { %1373 = vmatprep.subr.bf16.mxu0 %v4798_v56  ;;  %v4816_v56 = vld [vmem:[%s6973_s6 + $0x1e4] ss:$16 sps:$4 sm:$0xff]  }
  0x93   :  { %1374 = vmatpush1.bf16.msra.mxu0 %v4796_v57  ;;  %v4819_v57 = vld [vmem:[%s6973_s6 + $0x1ec] ss:$16 sps:$4 sm:$0xff]  }
  0x94   :  { %1375 = vmatprep.subr.bf16.mxu0 %v4804_v58  ;;  %v4814_v58 = vld [vmem:[%s6973_s6 + $0x1e0] ss:$16 sps:$4 sm:$0xff]  }
  0x97   :  { %1376 = vmatpush1.bf16.msra.mxu0 %v4802_v59  ;;  %v4817_v59 = vld [vmem:[%s6973_s6 + $0x1e8] ss:$16 sps:$4 sm:$0xff]  }
  0x98   :  { %1377 = vmatprep.subr.bf16.mxu0 %v4810_v52  ;;  %v4879_v52 = vld [vmem:[%s6969_s2 + $0x194] ss:$8 sps:$4 sm:$0xff]  }
  0x9b   :  { %1378 = vmatpush1.bf16.msra.mxu0 %v4808_v54  ;;  %v4877_v54 = vld [vmem:[%s6969_s2 + $0x190] ss:$8 sps:$4 sm:$0xff]  }
  0x9c   :  { %1379 = vmatprep.subr.bf16.mxu0 %v4816_v56  ;;  %v4885_v56 = vld [vmem:[%s6969_s2 + $0x1a4] ss:$8 sps:$4 sm:$0xff]  }
  0x9f   :  { %1380 = vmatpush1.bf16.msra.mxu0 %v4814_v58  ;;  %v4883_v58 = vld [vmem:[%s6969_s2 + $0x1a0] ss:$8 sps:$4 sm:$0xff]  }
  0xf5   :  { %v210_v60 = vpop.f32.mrb[0].mxu0 }
  0xf6   :  { %v212_v61 = vpop.f32.mrb[1].mxu0  ;;  %v5809_v10 = vadd.f32 %v210_v60, %v81_v7  ;;  %v4822_v60 = vld [vmem:[%s6969_s2 + $0x4] ss:$8 sps:$4 sm:$0xff]  }
  0xf7   :  { %v214_v62 = vpop.f32.mrb[2].mxu0  ;;  %v5811_v14 = vadd.f32 %v212_v61, %v85_v8  ;;  %v4825_v61 = vld [vmem:[%s6969_s2 + $0x104] ss:$8 sps:$4 sm:$0xff]   ;;  %1902 = vmatprep.subr.bf16.mxu0 %v4822_v60  ;;  %v4886_v60 = vld [vmem:[%s6969_s2 + $0xb0] ss:$8 sps:$4 sm:$0xff]  }
  0xf8   :  { %v215_v63 = vpop.f32.mrb[3].mxu0  ;;  %v748_v62 = vld [vmem:[%s6975_s5] sm:$0x3] }
  0xf9   :  { %v753_v63 = vrot.slane %v748_v62, %v5799_v4 }
 0x118   :  { %v662_v0 = vpop.f32.mrb[0].mxu1 }
 0x119   :  { %v664_v1 = vpop.f32.mrb[1].mxu1 }
 0x11a   :  { %v666_v2 = vpop.f32.mrb[2].mxu1 }
 0x11b   :  { %v667_v3 = vpop.f32.mrb[3].mxu1 }
 0x135   :  { %v703_v9 = vpop.f32.mrb[4].mxu0 }
 0x136   :  { %v704_v12 = vadd.f32 %v703_v9, %v662_v0  ;;  %v705_v13 = vpop.f32.mrb[5].mxu0  ;;  %v757_v0 = vrot.slane %v748_v62, %v5805_v6  ;;  %v4889_v62 = vld [vmem:[%s6969_s2 + $0x1b0] ss:$8 sps:$4 sm:$0xff]  }
 0x137   :  { %v706_v15 = vadd.f32 %v705_v13, %v664_v1  ;;  %v707_v16 = vpop.f32.mrb[6].mxu0 }
 0x138   :  { %v710_v18 = vadd.f32 %v704_v12, %v5809_v10  ;;  %v708_v19 = vpop.f32.mrb[7].mxu0  ;;  %v4823_v16 = vld [vmem:[%s6969_s2 + $0x100] ss:$8 sps:$4 sm:$0xff]  }
 0x139   :  { %v711_v20 = vadd.f32 %v706_v15, %v5811_v14  ;;  %v4820_v15 = vld [vmem:[%s6969_s2] ss:$8 sps:$4 sm:$0xff]   ;;  %v4828_v19 = vld [vmem:[%s6969_s2 + $0x14] ss:$8 sps:$4 sm:$0xff]  }
 0x13a   :  { %v712_v21 = vmax.f32 %v710_v18, 0.0 }
 0x13b   :  { %v713_v22 = vmax.f32 %v711_v20, 0.0  ;;  %v4831_v20 = vld [vmem:[%s6969_s2 + $0x114] ss:$8 sps:$4 sm:$0xff]  }
 0x13c   :  { %v714_v25 = vpack.c.bf16 %v712_v21, %v712_v21  ;;  %v4826_v21 = vld [vmem:[%s6969_s2 + $0x10] ss:$8 sps:$4 sm:$0xff]  }
 0x13d   :  { %v715_v23 = vpack.c.bf16 %v713_v22, %v713_v22  ;;  %v4829_v22 = vld [vmem:[%s6969_s2 + $0x110] ss:$8 sps:$4 sm:$0xff]  }
 0x13f   :  { %952 = vmatprep.mubr.bf16.mxu1 %v715_v23  ;;  %v4834_v23 = vld [vmem:[%s6969_s2 + $0x24] ss:$8 sps:$4 sm:$0xff]  }
 0x140   :  { %953 = vmatmul.mubr.bf16.vlgmr.msra.gmra.mrb[4].mxu1 %v714_v25  ;;  %v4832_v25 = vld [vmem:[%s6969_s2 + $0x20] ss:$8 sps:$4 sm:$0xff]  }
 0x141   :  { %1391 = vmatpush1.bf16.msra.mxu1 %v4727_v24  ;;  %v4837_v24 = vld [vmem:[%s6969_s2 + $0x124] ss:$8 sps:$4 sm:$0xff]  }
 0x142   :  { %1392 = vmatprep.subr.bf16.mxu1 %v4735_v26  ;;  %v4835_v26 = vld [vmem:[%s6969_s2 + $0x120] ss:$8 sps:$4 sm:$0xff]  }
 0x145   :  { %1393 = vmatpush1.bf16.msra.mxu1 %v4733_v27  ;;  %v4840_v27 = vld [vmem:[%s6969_s2 + $0x34] ss:$8 sps:$4 sm:$0xff]  }
 0x146   :  { %1394 = vmatprep.subr.bf16.mxu1 %v4741_v28  ;;  %v4843_v28 = vld [vmem:[%s6969_s2 + $0x134] ss:$8 sps:$4 sm:$0xff]  }
 0x149   :  { %1395 = vmatpush1.bf16.msra.mxu1 %v4739_v29  ;;  %v4838_v29 = vld [vmem:[%s6969_s2 + $0x30] ss:$8 sps:$4 sm:$0xff]  }
 0x14a   :  { %1396 = vmatprep.subr.bf16.mxu1 %v4747_v30  ;;  %v4841_v30 = vld [vmem:[%s6969_s2 + $0x130] ss:$8 sps:$4 sm:$0xff]  }
 0x14d   :  { %1397 = vmatpush1.bf16.msra.mxu1 %v4745_v31  ;;  %v4846_v31 = vld [vmem:[%s6969_s2 + $0x44] ss:$8 sps:$4 sm:$0xff]  }
 0x14e   :  { %1398 = vmatprep.subr.bf16.mxu1 %v4753_v32  ;;  %v4849_v32 = vld [vmem:[%s6969_s2 + $0x144] ss:$8 sps:$4 sm:$0xff]  }
 0x151   :  { %1399 = vmatpush1.bf16.msra.mxu1 %v4751_v33  ;;  %v4844_v33 = vld [vmem:[%s6969_s2 + $0x40] ss:$8 sps:$4 sm:$0xff]  }
 0x152   :  { %1400 = vmatprep.subr.bf16.mxu1 %v4759_v34  ;;  %v4847_v34 = vld [vmem:[%s6969_s2 + $0x140] ss:$8 sps:$4 sm:$0xff]  }
 0x155   :  { %1401 = vmatpush1.bf16.msra.mxu1 %v4757_v35  ;;  %v4852_v35 = vld [vmem:[%s6969_s2 + $0x54] ss:$8 sps:$4 sm:$0xff]  }
 0x156   :  { %1402 = vmatprep.subr.bf16.mxu1 %v4765_v36  ;;  %v4855_v36 = vld [vmem:[%s6969_s2 + $0x154] ss:$8 sps:$4 sm:$0xff]  }
 0x159   :  { %1403 = vmatpush1.bf16.msra.mxu1 %v4763_v37  ;;  %v4850_v37 = vld [vmem:[%s6969_s2 + $0x50] ss:$8 sps:$4 sm:$0xff]  }
 0x15a   :  { %1404 = vmatprep.subr.bf16.mxu1 %v4771_v38  ;;  %v4853_v38 = vld [vmem:[%s6969_s2 + $0x150] ss:$8 sps:$4 sm:$0xff]  }
 0x15d   :  { %1405 = vmatpush1.bf16.msra.mxu1 %v4769_v39  ;;  %v4858_v39 = vld [vmem:[%s6969_s2 + $0x64] ss:$8 sps:$4 sm:$0xff]  }
 0x15e   :  { %1406 = vmatprep.subr.bf16.mxu1 %v4777_v40  ;;  %v4861_v40 = vld [vmem:[%s6969_s2 + $0x164] ss:$8 sps:$4 sm:$0xff]  }
 0x161   :  { %1407 = vmatpush1.bf16.msra.mxu1 %v4775_v41  ;;  %v4856_v41 = vld [vmem:[%s6969_s2 + $0x60] ss:$8 sps:$4 sm:$0xff]  }
 0x162   :  { %1408 = vmatprep.subr.bf16.mxu1 %v4783_v42  ;;  %v4859_v42 = vld [vmem:[%s6969_s2 + $0x160] ss:$8 sps:$4 sm:$0xff]  }
 0x165   :  { %1409 = vmatpush1.bf16.msra.mxu1 %v4781_v43  ;;  %v4864_v43 = vld [vmem:[%s6969_s2 + $0x74] ss:$8 sps:$4 sm:$0xff]  }
 0x166   :  { %1410 = vmatprep.subr.bf16.mxu1 %v4789_v44  ;;  %v4867_v44 = vld [vmem:[%s6969_s2 + $0x174] ss:$8 sps:$4 sm:$0xff]  }
 0x169   :  { %1411 = vmatpush1.bf16.msra.mxu1 %v4787_v45  ;;  %v4862_v45 = vld [vmem:[%s6969_s2 + $0x70] ss:$8 sps:$4 sm:$0xff]  }
 0x16a   :  { %1412 = vmatprep.subr.bf16.mxu1 %v4795_v46  ;;  %v4865_v46 = vld [vmem:[%s6969_s2 + $0x170] ss:$8 sps:$4 sm:$0xff]  }
 0x16d   :  { %1413 = vmatpush1.bf16.msra.mxu1 %v4793_v47  ;;  %v4870_v47 = vld [vmem:[%s6969_s2 + $0x84] ss:$8 sps:$4 sm:$0xff]  }
 0x16e   :  { %1414 = vmatprep.subr.bf16.mxu1 %v4801_v48  ;;  %v4873_v48 = vld [vmem:[%s6969_s2 + $0x184] ss:$8 sps:$4 sm:$0xff]  }
 0x171   :  { %1415 = vmatpush1.bf16.msra.mxu1 %v4799_v49  ;;  %v4868_v49 = vld [vmem:[%s6969_s2 + $0x80] ss:$8 sps:$4 sm:$0xff]  }
 0x172   :  { %1416 = vmatprep.subr.bf16.mxu1 %v4807_v50  ;;  %v4871_v50 = vld [vmem:[%s6969_s2 + $0x180] ss:$8 sps:$4 sm:$0xff]  }
 0x175   :  { %1417 = vmatpush1.bf16.msra.mxu1 %v4805_v51  ;;  %v4876_v51 = vld [vmem:[%s6969_s2 + $0x94] ss:$8 sps:$4 sm:$0xff]  }
 0x176   :  { %1418 = vmatprep.subr.bf16.mxu1 %v4813_v53  ;;  %v4874_v53 = vld [vmem:[%s6969_s2 + $0x90] ss:$8 sps:$4 sm:$0xff]  }
 0x179   :  { %1419 = vmatpush1.bf16.msra.mxu1 %v4811_v55  ;;  %v4882_v55 = vld [vmem:[%s6969_s2 + $0xa4] ss:$8 sps:$4 sm:$0xff]  }
 0x17a   :  { %1420 = vmatprep.subr.bf16.mxu1 %v4819_v57  ;;  %v4880_v57 = vld [vmem:[%s6969_s2 + $0xa0] ss:$8 sps:$4 sm:$0xff]  }
 0x17d   :  { %1421 = vmatpush1.bf16.msra.mxu1 %v4817_v59  ;;  %v4888_v59 = vld [vmem:[%s6969_s2 + $0xb4] ss:$8 sps:$4 sm:$0xff]  }
 0x17e   :  { %1943 = vmatprep.subr.bf16.mxu1 %v4825_v61  ;;  %v4891_v61 = vld [vmem:[%s6969_s2 + $0x1b4] ss:$8 sps:$4 sm:$0xff]  }
 0x213   :  { %v954_v1 = vpop.f32.mrb[4].mxu1 }
 0x214   :  { %v955_v2 = vadd.f32 %v954_v1, %v753_v63  ;;  %v956_v3 = vpop.f32.mrb[5].mxu1  ;;  %v4894_v63 = vld [vmem:[%s6969_s2 + $0xc4] ss:$8 sps:$4 sm:$0xff]  }
 0x215   :  { %v957_v5 = vadd.f32 %v956_v3, %v757_v0  ;;  %v958_v7 = vpop.f32.mrb[6].mxu1  ;;  %v4892_v0 = vld [vmem:[%s6969_s2 + $0xc0] ss:$8 sps:$4 sm:$0xff]   ;;  %v4897_v1 = vld [vmem:[%s6969_s2 + $0x1c4] ss:$8 sps:$4 sm:$0xff]  }
 0x216   :  { %v961_v8 = vmax.f32 %v955_v2, 0.0  ;;  %v959_v9 = vpop.f32.mrb[7].mxu1  ;;  %v4895_v2 = vld [vmem:[%s6969_s2 + $0x1c0] ss:$8 sps:$4 sm:$0xff]   ;;  %v4900_v3 = vld [vmem:[%s6969_s2 + $0xd4] ss:$8 sps:$4 sm:$0xff]  }
 0x217   :  { %v962_v12 = vmax.f32 %v957_v5, 0.0  ;;  %v4898_v5 = vld [vmem:[%s6969_s2 + $0xd0] ss:$8 sps:$4 sm:$0xff]   ;;  %v4903_v7 = vld [vmem:[%s6969_s2 + $0x1d4] ss:$8 sps:$4 sm:$0xff]  }
 0x218   :  { %v963_v18 = vpack.c.bf16 %v961_v8, %v961_v8  ;;  %v4901_v8 = vld [vmem:[%s6969_s2 + $0x1d0] ss:$8 sps:$4 sm:$0xff]   ;;  %v4906_v9 = vld [vmem:[%s6969_s2 + $0xe4] ss:$8 sps:$4 sm:$0xff]  }
 0x219   :  { %v964_v13 = vpack.c.bf16 %v962_v12, %v962_v12  ;;  %v4904_v12 = vld [vmem:[%s6969_s2 + $0xe0] ss:$8 sps:$4 sm:$0xff]  }
 0x21b   :  { %1381 = vmatprep.mubr.bf16.mxu0 %v964_v13  ;;  %1422 = vmatprep.mubr.bf16.mxu1 %v964_v13  ;;  %v4907_v13 = vld [vmem:[%s6969_s2 + $0x1e0] ss:$8 sps:$4 sm:$0xff]  }
 0x21c   :  { %1382 = vmatmul.mubr.bf16.vlgmr.msra.gmra.mrb[8].mxu0 %v963_v18  ;;  %1423 = vmatmul.mubr.bf16.vlgmr.msra.gmra.mrb[8].mxu1 %v963_v18  ;;  %v4910_v18 = vld [vmem:[%s6969_s2 + $0xf0] ss:$8 sps:$4 sm:$0xff]  }
 0x21d   :  { %1903 = vmatpush1.bf16.msra.mxu0 %v4820_v15  ;;  %1944 = vmatpush1.bf16.msra.mxu1 %v4823_v16  ;;  %v4909_v15 = vld [vmem:[%s6969_s2 + $0x1e4] ss:$8 sps:$4 sm:$0xff]   ;;  %v4912_v16 = vld [vmem:[%s6969_s2 + $0xf4] ss:$8 sps:$4 sm:$0xff]  }
 0x21e   :  { %1904 = vmatprep.subr.bf16.mxu0 %v4828_v19  ;;  %1945 = vmatprep.subr.bf16.mxu1 %v4831_v20  ;;  %v4915_v19 = vld [vmem:[%s6969_s2 + $0x1f4] ss:$8 sps:$4 sm:$0xff]   ;;  %v4913_v20 = vld [vmem:[%s6969_s2 + $0x1f0] ss:$8 sps:$4 sm:$0xff]  }
 0x221   :  { %1905 = vmatpush1.bf16.msra.mxu0 %v4826_v21  ;;  %1946 = vmatpush1.bf16.msra.mxu1 %v4829_v22  ;;  %v4918_v21 = vld [vmem:[%s6972_s4 + $0x4] ss:$8 sps:$4 sm:$0xff]   ;;  %v6121_v22 = vsub.s32 2, %v5488_v11 }
 0x222   :  { %1906 = vmatprep.subr.bf16.mxu0 %v4834_v23  ;;  %1947 = vmatprep.subr.bf16.mxu1 %v4837_v24  ;;  %v6124_v23 = vsub.s32 3, %v5488_v11  ;;  %v1454_v24 = vld [vmem:[%s6976_s7] sm:$0xf] }
 0x225   :  { %1907 = vmatpush1.bf16.msra.mxu0 %v4832_v25  ;;  %1948 = vmatpush1.bf16.msra.mxu1 %v4835_v26  ;;  %v1459_v25 = vrot.slane %v1454_v24, %v5799_v4  ;;  %v1463_v26 = vrot.slane %v1454_v24, %v5805_v6 }
 0x226   :  { %1908 = vmatprep.subr.bf16.mxu0 %v4840_v27  ;;  %1949 = vmatprep.subr.bf16.mxu1 %v4843_v28  ;;  %v1467_v27 = vrot.slane %v1454_v24, %v6121_v22  ;;  %v1471_v28 = vrot.slane %v1454_v24, %v6124_v23  ;;  %v4949_v24 = vld [vmem:[%s6972_s4 + $0xb0] ss:$8 sps:$4 sm:$0xff]  }
 0x229   :  { %1909 = vmatpush1.bf16.msra.mxu0 %v4838_v29  ;;  %1950 = vmatpush1.bf16.msra.mxu1 %v4841_v30  ;;  %v1472_v29 = vcombine.low %v1459_v25, %v1463_v26  ;;  %v1473_v30 = vcombine.low %v1467_v27, %v1471_v28  ;;  %v4954_v25 = vld [vmem:[%s6972_s4 + $0xc4] ss:$8 sps:$4 sm:$0xff]   ;;  %v4952_v26 = vld [vmem:[%s6972_s4 + $0xc0] ss:$8 sps:$4 sm:$0xff]   ;;  %v4957_v27 = vld [vmem:[%s6972_s4 + $0xd4] ss:$8 sps:$4 sm:$0xff]  }
 0x22a   :  { %1910 = vmatprep.subr.bf16.mxu0 %v4846_v31  ;;  %1951 = vmatprep.subr.bf16.mxu1 %v4849_v32  ;;  %v4955_v28 = vld [vmem:[%s6972_s4 + $0xd0] ss:$8 sps:$4 sm:$0xff]  }
 0x22d   :  { %1911 = vmatpush1.bf16.msra.mxu0 %v4844_v33  ;;  %1952 = vmatpush1.bf16.msra.mxu1 %v4847_v34 }
 0x22e   :  { %1912 = vmatprep.subr.bf16.mxu0 %v4852_v35  ;;  %1953 = vmatprep.subr.bf16.mxu1 %v4855_v36  ;;  %v1480_v36 = vrot.slane %v1472_v29, %v5503_v17  ;;  %v4960_v29 = vld [vmem:[%s6972_s4 + $0xe4] ss:$8 sps:$4 sm:$0xff]  }
 0x231   :  { %1913 = vmatpush1.bf16.msra.mxu0 %v4850_v37  ;;  %1954 = vmatpush1.bf16.msra.mxu1 %v4853_v38  ;;  %v1487_v37 = vrot.slane %v1473_v30, %v5503_v17  ;;  %v4958_v30 = vld [vmem:[%s6972_s4 + $0xe0] ss:$8 sps:$4 sm:$0xff]  }
 0x232   :  { %1914 = vmatprep.subr.bf16.mxu0 %v4858_v39  ;;  %1955 = vmatprep.subr.bf16.mxu1 %v4861_v40 }
 0x235   :  { %1915 = vmatpush1.bf16.msra.mxu0 %v4856_v41  ;;  %1956 = vmatpush1.bf16.msra.mxu1 %v4859_v42 }
 0x236   :  { %1916 = vmatprep.subr.bf16.mxu0 %v4864_v43  ;;  %1957 = vmatprep.subr.bf16.mxu1 %v4867_v44 }
 0x239   :  { %1917 = vmatpush1.bf16.msra.mxu0 %v4862_v45  ;;  %1958 = vmatpush1.bf16.msra.mxu1 %v4865_v46  ;;  %v1488_v45 = vcombine.low %v1480_v36, %v1487_v37  ;;  %v5300_v46 = vld [vmem:[%s6971_s8] sm:$0xff] }
 0x23a   :  { %1918 = vmatprep.subr.bf16.mxu0 %v4870_v47  ;;  %1959 = vmatprep.subr.bf16.mxu1 %v4873_v48  ;;  %v4970_v36 = vld [vmem:[%s6973_s6 + $0x20] ss:$16 sps:$4 sm:$0xff]   ;;  %v4978_v37 = vld [vmem:[%s6973_s6 + $0x44] ss:$16 sps:$4 sm:$0xff]  }
 0x23d   :  { %1919 = vmatpush1.bf16.msra.mxu0 %v4868_v49  ;;  %1960 = vmatpush1.bf16.msra.mxu1 %v4871_v50 }
 0x23e   :  { %1920 = vmatprep.subr.bf16.mxu0 %v4876_v51  ;;  %1961 = vmatprep.subr.bf16.mxu1 %v4879_v52 }
 0x241   :  { %1921 = vmatpush1.bf16.msra.mxu0 %v4874_v53  ;;  %1962 = vmatpush1.bf16.msra.mxu1 %v4877_v54 }
 0x242   :  { %1922 = vmatprep.subr.bf16.mxu0 %v4882_v55  ;;  %1963 = vmatprep.subr.bf16.mxu1 %v4885_v56  ;;  %v4916_v55 = vld [vmem:[%s6972_s4] ss:$8 sps:$4 sm:$0xff]  }
 0x245   :  { %1923 = vmatpush1.bf16.msra.mxu0 %v4880_v57  ;;  %1964 = vmatpush1.bf16.msra.mxu1 %v4883_v58  ;;  %v4921_v57 = vld [vmem:[%s6972_s4 + $0x14] ss:$8 sps:$4 sm:$0xff]  }
 0x246   :  { %1924 = vmatprep.subr.bf16.mxu0 %v4888_v59  ;;  %1965 = vmatprep.subr.bf16.mxu1 %v4891_v61  ;;  %v4924_v61 = vld [vmem:[%s6972_s4 + $0x24] ss:$8 sps:$4 sm:$0xff]  }
 0x249   :  { %1925 = vmatpush1.bf16.msra.mxu0 %v4886_v60  ;;  %1966 = vmatpush1.bf16.msra.mxu1 %v4889_v62  ;;  %v4919_v60 = vld [vmem:[%s6972_s4 + $0x10] ss:$8 sps:$4 sm:$0xff]   ;;  %v4922_v62 = vld [vmem:[%s6972_s4 + $0x20] ss:$8 sps:$4 sm:$0xff]  }
 0x24a   :  { %1926 = vmatprep.subr.bf16.mxu0 %v4894_v63  ;;  %1967 = vmatprep.subr.bf16.mxu1 %v4897_v1  ;;  %v4927_v63 = vld [vmem:[%s6972_s4 + $0x34] ss:$8 sps:$4 sm:$0xff]   ;;  %v4930_v1 = vld [vmem:[%s6972_s4 + $0x44] ss:$8 sps:$4 sm:$0xff]  }
 0x24d   :  { %1927 = vmatpush1.bf16.msra.mxu0 %v4892_v0  ;;  %1968 = vmatpush1.bf16.msra.mxu1 %v4895_v2  ;;  %v4925_v0 = vld [vmem:[%s6972_s4 + $0x30] ss:$8 sps:$4 sm:$0xff]   ;;  %v4928_v2 = vld [vmem:[%s6972_s4 + $0x40] ss:$8 sps:$4 sm:$0xff]  }
 0x24e   :  { %1928 = vmatprep.subr.bf16.mxu0 %v4900_v3  ;;  %1969 = vmatprep.subr.bf16.mxu1 %v4903_v7  ;;  %v4933_v3 = vld [vmem:[%s6972_s4 + $0x54] ss:$8 sps:$4 sm:$0xff]   ;;  %v4936_v7 = vld [vmem:[%s6972_s4 + $0x64] ss:$8 sps:$4 sm:$0xff]  }
 0x251   :  { %1929 = vmatpush1.bf16.msra.mxu0 %v4898_v5  ;;  %1970 = vmatpush1.bf16.msra.mxu1 %v4901_v8  ;;  %v4931_v5 = vld [vmem:[%s6972_s4 + $0x50] ss:$8 sps:$4 sm:$0xff]   ;;  %v4934_v8 = vld [vmem:[%s6972_s4 + $0x60] ss:$8 sps:$4 sm:$0xff]  }
 0x252   :  { %1930 = vmatprep.subr.bf16.mxu0 %v4906_v9  ;;  %1971 = vmatprep.subr.bf16.mxu1 %v4909_v15  ;;  %v4939_v9 = vld [vmem:[%s6972_s4 + $0x74] ss:$8 sps:$4 sm:$0xff]   ;;  %v4940_v15 = vld [vmem:[%s6972_s4 + $0x80] ss:$8 sps:$4 sm:$0xff]  }
 0x255   :  { %1931 = vmatpush1.bf16.msra.mxu0 %v4904_v12  ;;  %1972 = vmatpush1.bf16.msra.mxu1 %v4907_v13  ;;  %v4937_v12 = vld [vmem:[%s6972_s4 + $0x70] ss:$8 sps:$4 sm:$0xff]   ;;  %v4942_v13 = vld [vmem:[%s6972_s4 + $0x84] ss:$8 sps:$4 sm:$0xff]  }
 0x256   :  { %1932 = vmatprep.subr.bf16.mxu0 %v4912_v16  ;;  %1973 = vmatprep.subr.bf16.mxu1 %v4915_v19  ;;  %v4945_v16 = vld [vmem:[%s6972_s4 + $0x94] ss:$8 sps:$4 sm:$0xff]   ;;  %v4948_v19 = vld [vmem:[%s6972_s4 + $0xa4] ss:$8 sps:$4 sm:$0xff]  }
 0x259   :  { %1933 = vmatpush1.bf16.msra.mxu0 %v4910_v18  ;;  %1974 = vmatpush1.bf16.msra.mxu1 %v4913_v20  ;;  %v4943_v18 = vld [vmem:[%s6972_s4 + $0x90] ss:$8 sps:$4 sm:$0xff]   ;;  %v4946_v20 = vld [vmem:[%s6972_s4 + $0xa0] ss:$8 sps:$4 sm:$0xff]  }
 0x25a   :  { %2194 = vmatprep.subr.bf16.mxu0 %v4918_v21  ;;  %v4951_v21 = vld [vmem:[%s6972_s4 + $0xb4] ss:$8 sps:$4 sm:$0xff]  }
 0x2ef   :  { %v1383_v31 = vpop.f32.mrb[8].mxu0  ;;  %v1424_v32 = vpop.f32.mrb[8].mxu1 }
 0x2f0   :  { %v1385_v33 = vpop.f32.mrb[9].mxu0  ;;  %v1426_v34 = vpop.f32.mrb[9].mxu1 }
 0x2f1   :  { %v1435_v11 = vcombine.low %v1383_v31, %v1385_v33  ;;  %v1436_v35 = vcombine.low %v1424_v32, %v1426_v34  ;;  %v1387_v38 = vpop.f32.mrb[10].mxu0  ;;  %v1428_v39 = vpop.f32.mrb[10].mxu1  ;;  %v4963_v31 = vld [vmem:[%s6972_s4 + $0xf4] ss:$8 sps:$4 sm:$0xff]   ;;  %v4961_v32 = vld [vmem:[%s6972_s4 + $0xf0] ss:$8 sps:$4 sm:$0xff]  }
 0x2f2   :  { %v1388_v40 = vpop.f32.mrb[11].mxu0  ;;  %v1429_v41 = vpop.f32.mrb[11].mxu1  ;;  %v4964_v33 = vld [vmem:[%s6973_s6] ss:$16 sps:$4 sm:$0xff]   ;;  %v4966_v34 = vld [vmem:[%s6973_s6 + $0x4] ss:$16 sps:$4 sm:$0xff]  }
 0x2f3   :  { %v1443_v42 = vrot.slane %v1435_v11, %v5503_v17  ;;  %v1450_v43 = vrot.slane %v1436_v35, %v5503_v17  ;;  %v4969_v11 = vld [vmem:[%s6973_s6 + $0xc] ss:$16 sps:$4 sm:$0xff]   ;;  %v4972_v35 = vld [vmem:[%s6973_s6 + $0x24] ss:$16 sps:$4 sm:$0xff]   ;;  %2623 = vmatprep.subr.bf16.mxu1 %v4966_v34  ;;  %v4976_v38 = vld [vmem:[%s6973_s6 + $0x40] ss:$16 sps:$4 sm:$0xff]  }
 0x2f4   :  { %v4984_v39 = vld [vmem:[%s6973_s6 + $0x64] ss:$16 sps:$4 sm:$0xff]   ;;  %v4982_v40 = vld [vmem:[%s6973_s6 + $0x60] ss:$16 sps:$4 sm:$0xff]   ;;  %v5003_v34 = vld [vmem:[%s6973_s6 + $0xc8] ss:$16 sps:$4 sm:$0xff]  }
 0x2f5   :  { %v1451_v44 = vcombine.low %v1443_v42, %v1450_v43  ;;  %v4990_v41 = vld [vmem:[%s6973_s6 + $0x84] ss:$16 sps:$4 sm:$0xff]   ;;  %v4988_v42 = vld [vmem:[%s6973_s6 + $0x80] ss:$16 sps:$4 sm:$0xff]  }
 0x2f6   :  { %v4996_v43 = vld [vmem:[%s6973_s6 + $0xa4] ss:$16 sps:$4 sm:$0xff]  }
 0x2f7   :  { %v1453_v47 = vadd.f32 %v5300_v46, %v1451_v44  ;;  %v4994_v44 = vld [vmem:[%s6973_s6 + $0xa0] ss:$16 sps:$4 sm:$0xff]  }
 0x2f8   :  { %v5000_v46 = vld [vmem:[%s6973_s6 + $0xc0] ss:$16 sps:$4 sm:$0xff]  }
 0x2f9   :  { %v6140_v48 = vadd.f32 %v1488_v45, %v1453_v47  ;;  %v5002_v45 = vld [vmem:[%s6973_s6 + $0xc4] ss:$16 sps:$4 sm:$0xff]  }
 0x2fa   :  { %v5008_v47 = vld [vmem:[%s6973_s6 + $0xe4] ss:$16 sps:$4 sm:$0xff]  }
 0x2fb   :  { %v1500_v49 = vrot.slane %v6140_v48, %v5503_v17  ;;  %v1493_v50 = vcombine.high %v6140_v48, %v6140_v48  ;;  %1491 = vst [vmem:[%s6977_s9] sm:$0xff] %v6140_v48 }
 0x2fd   :  { %v1508_v51 = vcombine.high %v1500_v49, %v1500_v49  ;;  %v1507_v52 = vrot.slane %v1493_v50, %v5503_v17  ;;  %v1514_v56 = vpack.c.bf16 %v1500_v49, %v1500_v49  ;;  %v5006_v49 = vld [vmem:[%s6973_s6 + $0xe0] ss:$16 sps:$4 sm:$0xff]   ;;  %v5014_v50 = vld [vmem:[%s6973_s6 + $0x104] ss:$16 sps:$4 sm:$0xff]  }
 0x2ff   :  { %v1515_v53 = vpack.c.bf16 %v1508_v51, %v1508_v51  ;;  %v1509_v54 = vcombine.high %v1507_v52, %v1507_v52  ;;  %v1516_v59 = vpack.c.bf16 %v1507_v52, %v1507_v52  ;;  %v5012_v51 = vld [vmem:[%s6973_s6 + $0x100] ss:$16 sps:$4 sm:$0xff]   ;;  %v5020_v52 = vld [vmem:[%s6973_s6 + $0x124] ss:$16 sps:$4 sm:$0xff]  }
 0x301   :  { %1934 = vmatprep.mubr.bf16.mxu0 %v1515_v53  ;;  %v1517_v58 = vpack.c.bf16 %v1509_v54, %v1509_v54  ;;  %v5018_v53 = vld [vmem:[%s6973_s6 + $0x120] ss:$16 sps:$4 sm:$0xff]   ;;  %v5026_v54 = vld [vmem:[%s6973_s6 + $0x144] ss:$16 sps:$4 sm:$0xff]  }
 0x302   :  { %1935 = vmatmul.mubr.bf16.vlgmr.msra.gmra.mrb[12].mxu0 %v1514_v56  ;;  %v5032_v56 = vld [vmem:[%s6973_s6 + $0x164] ss:$16 sps:$4 sm:$0xff]  }
 0x303   :  { %1975 = vmatprep.mubr.bf16.mxu1 %v1517_v58  ;;  %2195 = vmatpush1.bf16.msra.mxu0 %v4916_v55  ;;  %v5024_v55 = vld [vmem:[%s6973_s6 + $0x140] ss:$16 sps:$4 sm:$0xff]   ;;  %v5038_v58 = vld [vmem:[%s6973_s6 + $0x184] ss:$16 sps:$4 sm:$0xff]  }
 0x304   :  { %1976 = vmatmul.mubr.bf16.vlgmr.msra.gmra.mrb[12].mxu1 %v1516_v59  ;;  %2196 = vmatprep.subr.bf16.mxu0 %v4921_v57  ;;  %v5030_v57 = vld [vmem:[%s6973_s6 + $0x160] ss:$16 sps:$4 sm:$0xff]  }
 0x305   :  { %2624 = vmatpush1.bf16.msra.mxu1 %v4964_v33  ;;  %v5036_v59 = vld [vmem:[%s6973_s6 + $0x180] ss:$16 sps:$4 sm:$0xff]   ;;  %v5005_v33 = vld [vmem:[%s6973_s6 + $0xcc] ss:$16 sps:$4 sm:$0xff]  }
 0x306   :  { %2625 = vmatprep.subr.bf16.mxu1 %v4972_v35  ;;  %v5009_v35 = vld [vmem:[%s6973_s6 + $0xe8] ss:$16 sps:$4 sm:$0xff]  }
 0x307   :  { %2197 = vmatpush1.bf16.msra.mxu0 %v4919_v60  ;;  %v5044_v60 = vld [vmem:[%s6973_s6 + $0x1a4] ss:$16 sps:$4 sm:$0xff]  }
 0x308   :  { %2198 = vmatprep.subr.bf16.mxu0 %v4924_v61  ;;  %v5042_v61 = vld [vmem:[%s6973_s6 + $0x1a0] ss:$16 sps:$4 sm:$0xff]  }
 0x309   :  { %2626 = vmatpush1.bf16.msra.mxu1 %v4970_v36  ;;  %v5017_v36 = vld [vmem:[%s6973_s6 + $0x10c] ss:$16 sps:$4 sm:$0xff]  }
 0x30a   :  { %2627 = vmatprep.subr.bf16.mxu1 %v4978_v37  ;;  %v5015_v37 = vld [vmem:[%s6973_s6 + $0x108] ss:$16 sps:$4 sm:$0xff]  }
 0x30b   :  { %2199 = vmatpush1.bf16.msra.mxu0 %v4922_v62 }
 0x30c   :  { %2200 = vmatprep.subr.bf16.mxu0 %v4927_v63 }
 0x30d   :  { %2628 = vmatpush1.bf16.msra.mxu1 %v4976_v38  ;;  %v5023_v38 = vld [vmem:[%s6973_s6 + $0x12c] ss:$16 sps:$4 sm:$0xff]  }
 0x30e   :  { %2629 = vmatprep.subr.bf16.mxu1 %v4984_v39  ;;  %v5021_v39 = vld [vmem:[%s6973_s6 + $0x128] ss:$16 sps:$4 sm:$0xff]  }
 0x30f   :  { %2201 = vmatpush1.bf16.msra.mxu0 %v4925_v0 }
 0x310   :  { %2202 = vmatprep.subr.bf16.mxu0 %v4930_v1 }
 0x311   :  { %2630 = vmatpush1.bf16.msra.mxu1 %v4982_v40  ;;  %v5029_v40 = vld [vmem:[%s6973_s6 + $0x14c] ss:$16 sps:$4 sm:$0xff]  }
 0x312   :  { %2631 = vmatprep.subr.bf16.mxu1 %v4990_v41  ;;  %v5027_v41 = vld [vmem:[%s6973_s6 + $0x148] ss:$16 sps:$4 sm:$0xff]  }
 0x313   :  { %2203 = vmatpush1.bf16.msra.mxu0 %v4928_v2 }
 0x314   :  { %2204 = vmatprep.subr.bf16.mxu0 %v4933_v3 }
 0x315   :  { %2632 = vmatpush1.bf16.msra.mxu1 %v4988_v42  ;;  %v5035_v42 = vld [vmem:[%s6973_s6 + $0x16c] ss:$16 sps:$4 sm:$0xff]  }
 0x316   :  { %2633 = vmatprep.subr.bf16.mxu1 %v4996_v43  ;;  %v5033_v43 = vld [vmem:[%s6973_s6 + $0x168] ss:$16 sps:$4 sm:$0xff]  }
 0x317   :  { %2205 = vmatpush1.bf16.msra.mxu0 %v4931_v5 }
 0x318   :  { %2206 = vmatprep.subr.bf16.mxu0 %v4936_v7 }
 0x319   :  { %2634 = vmatpush1.bf16.msra.mxu1 %v4994_v44  ;;  %v5041_v44 = vld [vmem:[%s6973_s6 + $0x18c] ss:$16 sps:$4 sm:$0xff]  }
 0x31a   :  { %2635 = vmatprep.subr.bf16.mxu1 %v5002_v45  ;;  %v5039_v45 = vld [vmem:[%s6973_s6 + $0x188] ss:$16 sps:$4 sm:$0xff]  }
 0x31b   :  { %2207 = vmatpush1.bf16.msra.mxu0 %v4934_v8 }
 0x31c   :  { %2208 = vmatprep.subr.bf16.mxu0 %v4939_v9 }
 0x31d   :  { %2636 = vmatpush1.bf16.msra.mxu1 %v5000_v46  ;;  %v5047_v46 = vld [vmem:[%s6973_s6 + $0x1ac] ss:$16 sps:$4 sm:$0xff]  }
 0x31e   :  { %2637 = vmatprep.subr.bf16.mxu1 %v5008_v47  ;;  %v5045_v47 = vld [vmem:[%s6973_s6 + $0x1a8] ss:$16 sps:$4 sm:$0xff]  }
 0x31f   :  { %2209 = vmatpush1.bf16.msra.mxu0 %v4937_v12 }
 0x320   :  { %2210 = vmatprep.subr.bf16.mxu0 %v4942_v13 }
 0x321   :  { %2638 = vmatpush1.bf16.msra.mxu1 %v5006_v49  ;;  %v5050_v49 = vld [vmem:[%s6973_s6 + $0x1c4] ss:$16 sps:$4 sm:$0xff]  }
 0x322   :  { %2639 = vmatprep.subr.bf16.mxu1 %v5014_v50  ;;  %v5053_v50 = vld [vmem:[%s6973_s6 + $0x1cc] ss:$16 sps:$4 sm:$0xff]  }
 0x323   :  { %2211 = vmatpush1.bf16.msra.mxu0 %v4940_v15 }
 0x324   :  { %2212 = vmatprep.subr.bf16.mxu0 %v4945_v16 }
 0x325   :  { %2640 = vmatpush1.bf16.msra.mxu1 %v5012_v51  ;;  %v5048_v51 = vld [vmem:[%s6973_s6 + $0x1c0] ss:$16 sps:$4 sm:$0xff]  }
 0x326   :  { %2641 = vmatprep.subr.bf16.mxu1 %v5020_v52  ;;  %v5051_v52 = vld [vmem:[%s6973_s6 + $0x1c8] ss:$16 sps:$4 sm:$0xff]  }
 0x327   :  { %2213 = vmatpush1.bf16.msra.mxu0 %v4943_v18 }
 0x328   :  { %2214 = vmatprep.subr.bf16.mxu0 %v4948_v19  ;;  %v4967_v19 = vld [vmem:[%s6973_s6 + $0x8] ss:$16 sps:$4 sm:$0xff]  }
 0x329   :  { %2642 = vmatpush1.bf16.msra.mxu1 %v5018_v53  ;;  %v5056_v53 = vld [vmem:[%s6973_s6 + $0x1e4] ss:$16 sps:$4 sm:$0xff]  }
 0x32a   :  { %2643 = vmatprep.subr.bf16.mxu1 %v5026_v54  ;;  %v5059_v54 = vld [vmem:[%s6973_s6 + $0x1ec] ss:$16 sps:$4 sm:$0xff]  }
 0x32b   :  { %2215 = vmatpush1.bf16.msra.mxu0 %v4946_v20 }
 0x32c   :  { %2216 = vmatprep.subr.bf16.mxu0 %v4951_v21  ;;  %v4975_v21 = vld [vmem:[%s6973_s6 + $0x2c] ss:$16 sps:$4 sm:$0xff]  }
 0x32d   :  { %2644 = vmatpush1.bf16.msra.mxu1 %v5024_v55  ;;  %v5054_v55 = vld [vmem:[%s6973_s6 + $0x1e0] ss:$16 sps:$4 sm:$0xff]  }
 0x32e   :  { %2645 = vmatprep.subr.bf16.mxu1 %v5032_v56  ;;  %v5057_v56 = vld [vmem:[%s6973_s6 + $0x1e8] ss:$16 sps:$4 sm:$0xff]  }
 0x32f   :  { %2217 = vmatpush1.bf16.msra.mxu0 %v4949_v24  ;;  %v4973_v24 = vld [vmem:[%s6973_s6 + $0x28] ss:$16 sps:$4 sm:$0xff]  }
 0x330   :  { %2218 = vmatprep.subr.bf16.mxu0 %v4954_v25  ;;  %v4981_v25 = vld [vmem:[%s6973_s6 + $0x4c] ss:$16 sps:$4 sm:$0xff]  }
 0x331   :  { %2646 = vmatpush1.bf16.msra.mxu1 %v5030_v57  ;;  %v5062_v57 = vld [vmem:[%s6969_s2 + $0x4] ss:$8 sps:$4 sm:$0xff]  }
 0x332   :  { %2647 = vmatprep.subr.bf16.mxu1 %v5038_v58  ;;  %v5065_v58 = vld [vmem:[%s6969_s2 + $0x104] ss:$8 sps:$4 sm:$0xff]  }
 0x333   :  { %2219 = vmatpush1.bf16.msra.mxu0 %v4952_v26  ;;  %v4979_v26 = vld [vmem:[%s6973_s6 + $0x48] ss:$16 sps:$4 sm:$0xff]  }
 0x334   :  { %2220 = vmatprep.subr.bf16.mxu0 %v4957_v27  ;;  %v4987_v27 = vld [vmem:[%s6973_s6 + $0x6c] ss:$16 sps:$4 sm:$0xff]  }
 0x335   :  { %2648 = vmatpush1.bf16.msra.mxu1 %v5036_v59  ;;  %v2022_v59 = vld [vmem:[%s6975_s5] sm:$0x3] }
 0x336   :  { %2649 = vmatprep.subr.bf16.mxu1 %v5044_v60  ;;  %v2027_v60 = vrot.slane %v2022_v59, %v5799_v4 }
 0x337   :  { %2221 = vmatpush1.bf16.msra.mxu0 %v4955_v28  ;;  %v4985_v28 = vld [vmem:[%s6973_s6 + $0x68] ss:$16 sps:$4 sm:$0xff]  }
 0x338   :  { %2222 = vmatprep.subr.bf16.mxu0 %v4960_v29  ;;  %v4993_v29 = vld [vmem:[%s6973_s6 + $0x8c] ss:$16 sps:$4 sm:$0xff]  }
 0x339   :  { %2650 = vmatpush1.bf16.msra.mxu1 %v5042_v61  ;;  %v2031_v61 = vrot.slane %v2022_v59, %v5805_v6  ;;  %v5126_v59 = vld [vmem:[%s6969_s2 + $0xb0] ss:$8 sps:$4 sm:$0xff]  }
 0x33a   :  { %2651 = vmatprep.subr.bf16.mxu1 %v5050_v49  ;;  %v5111_v49 = vld [vmem:[%s6969_s2 + $0x180] ss:$8 sps:$4 sm:$0xff]  }
 0x33b   :  { %2223 = vmatpush1.bf16.msra.mxu0 %v4958_v30  ;;  %v4991_v30 = vld [vmem:[%s6973_s6 + $0x88] ss:$16 sps:$4 sm:$0xff]  }
 0x33c   :  { %2224 = vmatprep.subr.bf16.mxu0 %v4963_v31  ;;  %v4999_v31 = vld [vmem:[%s6973_s6 + $0xac] ss:$16 sps:$4 sm:$0xff]  }
 0x33d   :  { %2652 = vmatpush1.bf16.msra.mxu1 %v5048_v51  ;;  %v5119_v51 = vld [vmem:[%s6969_s2 + $0x194] ss:$8 sps:$4 sm:$0xff]  }
 0x33e   :  { %2653 = vmatprep.subr.bf16.mxu1 %v5056_v53  ;;  %v5117_v53 = vld [vmem:[%s6969_s2 + $0x190] ss:$8 sps:$4 sm:$0xff]  }
 0x33f   :  { %2225 = vmatpush1.bf16.msra.mxu0 %v4961_v32  ;;  %v4997_v32 = vld [vmem:[%s6973_s6 + $0xa8] ss:$16 sps:$4 sm:$0xff]  }
 0x340   :  { %2664 = vmatprep.subr.bf16.mxu0 %v4969_v11  ;;  %v5011_v11 = vld [vmem:[%s6973_s6 + $0xec] ss:$16 sps:$4 sm:$0xff]  }
 0x341   :  { %2654 = vmatpush1.bf16.msra.mxu1 %v5054_v55  ;;  %v5125_v55 = vld [vmem:[%s6969_s2 + $0x1a4] ss:$8 sps:$4 sm:$0xff]  }
 0x342   :  { %3177 = vmatprep.subr.bf16.mxu1 %v5062_v57  ;;  %v5123_v57 = vld [vmem:[%s6969_s2 + $0x1a0] ss:$8 sps:$4 sm:$0xff]  }
 0x3d5   :  { %v1936_v62 = vpop.f32.mrb[12].mxu0 }
 0x3d6   :  { %v1938_v63 = vpop.f32.mrb[13].mxu0 }
 0x3d7   :  { %v1940_v0 = vpop.f32.mrb[14].mxu0  ;;  %v1977_v1 = vpop.f32.mrb[12].mxu1 }
 0x3d8   :  { %v1978_v2 = vadd.f32 %v1977_v1, %v1936_v62  ;;  %v1941_v3 = vpop.f32.mrb[15].mxu0  ;;  %v1979_v5 = vpop.f32.mrb[13].mxu1 }
 0x3d9   :  { %v1980_v7 = vadd.f32 %v1979_v5, %v1938_v63  ;;  %v1981_v8 = vpop.f32.mrb[14].mxu1 }
 0x3da   :  { %v1984_v9 = vadd.f32 %v1978_v2, %v5809_v10  ;;  %v1982_v12 = vpop.f32.mrb[15].mxu1 }
 0x3db   :  { %v1985_v13 = vadd.f32 %v1980_v7, %v5811_v14  ;;  %v5063_v12 = vld [vmem:[%s6969_s2 + $0x100] ss:$8 sps:$4 sm:$0xff]  }
 0x3dc   :  { %v1986_v15 = vmax.f32 %v1984_v9, 0.0  ;;  %v5060_v9 = vld [vmem:[%s6969_s2] ss:$8 sps:$4 sm:$0xff]  }
 0x3dd   :  { %v1987_v16 = vmax.f32 %v1985_v13, 0.0 }
 0x3de   :  { %v1988_v20 = vpack.c.bf16 %v1986_v15, %v1986_v15  ;;  %v5068_v15 = vld [vmem:[%s6969_s2 + $0x14] ss:$8 sps:$4 sm:$0xff]  }
 0x3df   :  { %v1989_v18 = vpack.c.bf16 %v1987_v16, %v1987_v16  ;;  %v5071_v16 = vld [vmem:[%s6969_s2 + $0x114] ss:$8 sps:$4 sm:$0xff]  }
 0x3e1   :  { %2226 = vmatprep.mubr.bf16.mxu0 %v1989_v18  ;;  %v5066_v18 = vld [vmem:[%s6969_s2 + $0x10] ss:$8 sps:$4 sm:$0xff]  }
 0x3e2   :  { %2227 = vmatmul.mubr.bf16.vlgmr.msra.gmra.mrb[16].mxu0 %v1988_v20  ;;  %v5074_v20 = vld [vmem:[%s6969_s2 + $0x24] ss:$8 sps:$4 sm:$0xff]  }
 0x3e3   :  { %2665 = vmatpush1.bf16.msra.mxu0 %v4967_v19  ;;  %v5069_v19 = vld [vmem:[%s6969_s2 + $0x110] ss:$8 sps:$4 sm:$0xff]  }
 0x3e4   :  { %2666 = vmatprep.subr.bf16.mxu0 %v4975_v21  ;;  %v5077_v21 = vld [vmem:[%s6969_s2 + $0x124] ss:$8 sps:$4 sm:$0xff]  }
 0x3e7   :  { %2667 = vmatpush1.bf16.msra.mxu0 %v4973_v24  ;;  %v5072_v24 = vld [vmem:[%s6969_s2 + $0x20] ss:$8 sps:$4 sm:$0xff]  }
 0x3e8   :  { %2668 = vmatprep.subr.bf16.mxu0 %v4981_v25  ;;  %v5075_v25 = vld [vmem:[%s6969_s2 + $0x120] ss:$8 sps:$4 sm:$0xff]  }
 0x3eb   :  { %2669 = vmatpush1.bf16.msra.mxu0 %v4979_v26  ;;  %v5080_v26 = vld [vmem:[%s6969_s2 + $0x34] ss:$8 sps:$4 sm:$0xff]  }
 0x3ec   :  { %2670 = vmatprep.subr.bf16.mxu0 %v4987_v27  ;;  %v5083_v27 = vld [vmem:[%s6969_s2 + $0x134] ss:$8 sps:$4 sm:$0xff]  }
 0x3ef   :  { %2671 = vmatpush1.bf16.msra.mxu0 %v4985_v28  ;;  %v5078_v28 = vld [vmem:[%s6969_s2 + $0x30] ss:$8 sps:$4 sm:$0xff]  }
 0x3f0   :  { %2672 = vmatprep.subr.bf16.mxu0 %v4993_v29  ;;  %v5081_v29 = vld [vmem:[%s6969_s2 + $0x130] ss:$8 sps:$4 sm:$0xff]  }
 0x3f3   :  { %2673 = vmatpush1.bf16.msra.mxu0 %v4991_v30  ;;  %v5086_v30 = vld [vmem:[%s6969_s2 + $0x44] ss:$8 sps:$4 sm:$0xff]  }
 0x3f4   :  { %2674 = vmatprep.subr.bf16.mxu0 %v4999_v31  ;;  %v5089_v31 = vld [vmem:[%s6969_s2 + $0x144] ss:$8 sps:$4 sm:$0xff]  }
 0x3f7   :  { %2675 = vmatpush1.bf16.msra.mxu0 %v4997_v32  ;;  %v5084_v32 = vld [vmem:[%s6969_s2 + $0x40] ss:$8 sps:$4 sm:$0xff]  }
 0x3f8   :  { %2676 = vmatprep.subr.bf16.mxu0 %v5005_v33  ;;  %v5087_v33 = vld [vmem:[%s6969_s2 + $0x140] ss:$8 sps:$4 sm:$0xff]  }
 0x3fb   :  { %2677 = vmatpush1.bf16.msra.mxu0 %v5003_v34  ;;  %v5092_v34 = vld [vmem:[%s6969_s2 + $0x54] ss:$8 sps:$4 sm:$0xff]  }
 0x3fc   :  { %2678 = vmatprep.subr.bf16.mxu0 %v5011_v11  ;;  %v5095_v11 = vld [vmem:[%s6969_s2 + $0x154] ss:$8 sps:$4 sm:$0xff]  }
 0x3ff   :  { %2679 = vmatpush1.bf16.msra.mxu0 %v5009_v35  ;;  %v5090_v35 = vld [vmem:[%s6969_s2 + $0x50] ss:$8 sps:$4 sm:$0xff]  }
 0x400   :  { %2680 = vmatprep.subr.bf16.mxu0 %v5017_v36  ;;  %v5093_v36 = vld [vmem:[%s6969_s2 + $0x150] ss:$8 sps:$4 sm:$0xff]  }
 0x403   :  { %2681 = vmatpush1.bf16.msra.mxu0 %v5015_v37  ;;  %v5098_v37 = vld [vmem:[%s6969_s2 + $0x64] ss:$8 sps:$4 sm:$0xff]  }
 0x404   :  { %2682 = vmatprep.subr.bf16.mxu0 %v5023_v38  ;;  %v5101_v38 = vld [vmem:[%s6969_s2 + $0x164] ss:$8 sps:$4 sm:$0xff]  }
 0x407   :  { %2683 = vmatpush1.bf16.msra.mxu0 %v5021_v39  ;;  %v5096_v39 = vld [vmem:[%s6969_s2 + $0x60] ss:$8 sps:$4 sm:$0xff]  }
 0x408   :  { %2684 = vmatprep.subr.bf16.mxu0 %v5029_v40  ;;  %v5099_v40 = vld [vmem:[%s6969_s2 + $0x160] ss:$8 sps:$4 sm:$0xff]  }
 0x40b   :  { %2685 = vmatpush1.bf16.msra.mxu0 %v5027_v41  ;;  %v5104_v41 = vld [vmem:[%s6969_s2 + $0x74] ss:$8 sps:$4 sm:$0xff]  }
 0x40c   :  { %2686 = vmatprep.subr.bf16.mxu0 %v5035_v42  ;;  %v5107_v42 = vld [vmem:[%s6969_s2 + $0x174] ss:$8 sps:$4 sm:$0xff]  }
 0x40f   :  { %2687 = vmatpush1.bf16.msra.mxu0 %v5033_v43  ;;  %v5102_v43 = vld [vmem:[%s6969_s2 + $0x70] ss:$8 sps:$4 sm:$0xff]  }
 0x410   :  { %2688 = vmatprep.subr.bf16.mxu0 %v5041_v44  ;;  %v5105_v44 = vld [vmem:[%s6969_s2 + $0x170] ss:$8 sps:$4 sm:$0xff]  }
 0x413   :  { %2689 = vmatpush1.bf16.msra.mxu0 %v5039_v45  ;;  %v5110_v45 = vld [vmem:[%s6969_s2 + $0x84] ss:$8 sps:$4 sm:$0xff]  }
 0x414   :  { %2690 = vmatprep.subr.bf16.mxu0 %v5047_v46  ;;  %v5113_v46 = vld [vmem:[%s6969_s2 + $0x184] ss:$8 sps:$4 sm:$0xff]  }
 0x417   :  { %2691 = vmatpush1.bf16.msra.mxu0 %v5045_v47  ;;  %v5108_v47 = vld [vmem:[%s6969_s2 + $0x80] ss:$8 sps:$4 sm:$0xff]  }
 0x418   :  { %2692 = vmatprep.subr.bf16.mxu0 %v5053_v50  ;;  %v5116_v50 = vld [vmem:[%s6969_s2 + $0x94] ss:$8 sps:$4 sm:$0xff]  }
 0x41b   :  { %2693 = vmatpush1.bf16.msra.mxu0 %v5051_v52  ;;  %v5114_v52 = vld [vmem:[%s6969_s2 + $0x90] ss:$8 sps:$4 sm:$0xff]  }
 0x41c   :  { %2694 = vmatprep.subr.bf16.mxu0 %v5059_v54  ;;  %v5122_v54 = vld [vmem:[%s6969_s2 + $0xa4] ss:$8 sps:$4 sm:$0xff]  }
 0x41f   :  { %2695 = vmatpush1.bf16.msra.mxu0 %v5057_v56  ;;  %v5120_v56 = vld [vmem:[%s6969_s2 + $0xa0] ss:$8 sps:$4 sm:$0xff]  }
 0x420   :  { %3218 = vmatprep.subr.bf16.mxu0 %v5065_v58  ;;  %v5128_v58 = vld [vmem:[%s6969_s2 + $0xb4] ss:$8 sps:$4 sm:$0xff]  }
 0x4b5   :  { %v2228_v62 = vpop.f32.mrb[16].mxu0 }
 0x4b6   :  { %v2229_v63 = vadd.f32 %v2228_v62, %v2027_v60  ;;  %v2230_v0 = vpop.f32.mrb[17].mxu0  ;;  %v5131_v60 = vld [vmem:[%s6969_s2 + $0x1b4] ss:$8 sps:$4 sm:$0xff]   ;;  %v5134_v62 = vld [vmem:[%s6969_s2 + $0xc4] ss:$8 sps:$4 sm:$0xff]  }
 0x4b7   :  { %v2231_v1 = vadd.f32 %v2230_v0, %v2031_v61  ;;  %v2232_v2 = vpop.f32.mrb[18].mxu0  ;;  %v5129_v61 = vld [vmem:[%s6969_s2 + $0x1b0] ss:$8 sps:$4 sm:$0xff]   ;;  %v5137_v0 = vld [vmem:[%s6969_s2 + $0x1c4] ss:$8 sps:$4 sm:$0xff]  }
 0x4b8   :  { %v2235_v3 = vmax.f32 %v2229_v63, 0.0  ;;  %v2233_v5 = vpop.f32.mrb[19].mxu0  ;;  %v5132_v63 = vld [vmem:[%s6969_s2 + $0xc0] ss:$8 sps:$4 sm:$0xff]   ;;  %v5140_v2 = vld [vmem:[%s6969_s2 + $0xd4] ss:$8 sps:$4 sm:$0xff]  }
 0x4b9   :  { %v2236_v7 = vmax.f32 %v2231_v1, 0.0  ;;  %v5135_v1 = vld [vmem:[%s6969_s2 + $0x1c0] ss:$8 sps:$4 sm:$0xff]   ;;  %v5143_v5 = vld [vmem:[%s6969_s2 + $0x1d4] ss:$8 sps:$4 sm:$0xff]  }
 0x4ba   :  { %v2237_v13 = vpack.c.bf16 %v2235_v3, %v2235_v3  ;;  %v5138_v3 = vld [vmem:[%s6969_s2 + $0xd0] ss:$8 sps:$4 sm:$0xff]  }
 0x4bb   :  { %v2238_v8 = vpack.c.bf16 %v2236_v7, %v2236_v7  ;;  %v5141_v7 = vld [vmem:[%s6969_s2 + $0x1d0] ss:$8 sps:$4 sm:$0xff]  }
 0x4bd   :  { %2655 = vmatprep.mubr.bf16.mxu1 %v2238_v8  ;;  %2696 = vmatprep.mubr.bf16.mxu0 %v2238_v8  ;;  %v5146_v8 = vld [vmem:[%s6969_s2 + $0xe4] ss:$8 sps:$4 sm:$0xff]  }
 0x4be   :  { %2656 = vmatmul.mubr.bf16.vlgmr.msra.gmra.mrb[16].mxu1 %v2237_v13  ;;  %2697 = vmatmul.mubr.bf16.vlgmr.msra.gmra.mrb[20].mxu0 %v2237_v13  ;;  %v5149_v13 = vld [vmem:[%s6969_s2 + $0x1e4] ss:$8 sps:$4 sm:$0xff]  }
 0x4bf   :  { %3178 = vmatpush1.bf16.msra.mxu1 %v5060_v9  ;;  %3219 = vmatpush1.bf16.msra.mxu0 %v5063_v12  ;;  %v5144_v9 = vld [vmem:[%s6969_s2 + $0xe0] ss:$8 sps:$4 sm:$0xff]  }
 0x4c0   :  { %3179 = vmatprep.subr.bf16.mxu1 %v5068_v15  ;;  %3220 = vmatprep.subr.bf16.mxu0 %v5071_v16  ;;  %v5147_v12 = vld [vmem:[%s6969_s2 + $0x1e0] ss:$8 sps:$4 sm:$0xff]   ;;  %v5152_v15 = vld [vmem:[%s6969_s2 + $0xf4] ss:$8 sps:$4 sm:$0xff]   ;;  %v5150_v16 = vld [vmem:[%s6969_s2 + $0xf0] ss:$8 sps:$4 sm:$0xff]  }
 0x4c3   :  { %3180 = vmatpush1.bf16.msra.mxu1 %v5066_v18  ;;  %3221 = vmatpush1.bf16.msra.mxu0 %v5069_v19  ;;  %v5155_v18 = vld [vmem:[%s6969_s2 + $0x1f4] ss:$8 sps:$4 sm:$0xff]   ;;  %v5153_v19 = vld [vmem:[%s6969_s2 + $0x1f0] ss:$8 sps:$4 sm:$0xff]  }
 0x4c4   :  { %3181 = vmatprep.subr.bf16.mxu1 %v5074_v20  ;;  %3222 = vmatprep.subr.bf16.mxu0 %v5077_v21  ;;  %v5158_v20 = vld [vmem:[%s6972_s4 + $0x4] ss:$8 sps:$4 sm:$0xff]   ;;  %v2728_v21 = vld [vmem:[%s6976_s7] sm:$0xf] }
 0x4c7   :  { %3182 = vmatpush1.bf16.msra.mxu1 %v5072_v24  ;;  %3223 = vmatpush1.bf16.msra.mxu0 %v5075_v25  ;;  %v2733_v24 = vrot.slane %v2728_v21, %v5799_v4  ;;  %v2737_v25 = vrot.slane %v2728_v21, %v5805_v6 }
 0x4c8   :  { %3183 = vmatprep.subr.bf16.mxu1 %v5080_v26  ;;  %3224 = vmatprep.subr.bf16.mxu0 %v5083_v27  ;;  %v2741_v26 = vrot.slane %v2728_v21, %v6121_v22  ;;  %v2745_v27 = vrot.slane %v2728_v21, %v6124_v23  ;;  %v5194_v21 = vld [vmem:[%s6972_s4 + $0xc4] ss:$8 sps:$4 sm:$0xff]  }
 0x4cb   :  { %3184 = vmatpush1.bf16.msra.mxu1 %v5078_v28  ;;  %3225 = vmatpush1.bf16.msra.mxu0 %v5081_v29  ;;  %v2746_v28 = vcombine.low %v2733_v24, %v2737_v25  ;;  %v2747_v29 = vcombine.low %v2741_v26, %v2745_v27  ;;  %v5192_v24 = vld [vmem:[%s6972_s4 + $0xc0] ss:$8 sps:$4 sm:$0xff]   ;;  %v5197_v25 = vld [vmem:[%s6972_s4 + $0xd4] ss:$8 sps:$4 sm:$0xff]   ;;  %v5195_v26 = vld [vmem:[%s6972_s4 + $0xd0] ss:$8 sps:$4 sm:$0xff]  }
 0x4cc   :  { %3185 = vmatprep.subr.bf16.mxu1 %v5086_v30  ;;  %3226 = vmatprep.subr.bf16.mxu0 %v5089_v31  ;;  %v5200_v27 = vld [vmem:[%s6972_s4 + $0xe4] ss:$8 sps:$4 sm:$0xff]  }
 0x4cf   :  { %3186 = vmatpush1.bf16.msra.mxu1 %v5084_v32  ;;  %3227 = vmatpush1.bf16.msra.mxu0 %v5087_v33 }
 0x4d0   :  { %3187 = vmatprep.subr.bf16.mxu1 %v5092_v34  ;;  %3228 = vmatprep.subr.bf16.mxu0 %v5095_v11 }
 0x4d3   :  { %3188 = vmatpush1.bf16.msra.mxu1 %v5090_v35  ;;  %3229 = vmatpush1.bf16.msra.mxu0 %v5093_v36  ;;  %v2754_v35 = vrot.slane %v2746_v28, %v5503_v17  ;;  %v2761_v36 = vrot.slane %v2747_v29, %v5503_v17  ;;  %v5198_v28 = vld [vmem:[%s6972_s4 + $0xe0] ss:$8 sps:$4 sm:$0xff]   ;;  %v5203_v29 = vld [vmem:[%s6972_s4 + $0xf4] ss:$8 sps:$4 sm:$0xff]  }
 0x4d4   :  { %3189 = vmatprep.subr.bf16.mxu1 %v5098_v37  ;;  %3230 = vmatprep.subr.bf16.mxu0 %v5101_v38 }
 0x4d7   :  { %3190 = vmatpush1.bf16.msra.mxu1 %v5096_v39  ;;  %3231 = vmatpush1.bf16.msra.mxu0 %v5099_v40 }
 0x4d8   :  { %3191 = vmatprep.subr.bf16.mxu1 %v5104_v41  ;;  %3232 = vmatprep.subr.bf16.mxu0 %v5107_v42 }
 0x4db   :  { %3192 = vmatpush1.bf16.msra.mxu1 %v5102_v43  ;;  %3233 = vmatpush1.bf16.msra.mxu0 %v5105_v44  ;;  %v2762_v44 = vcombine.low %v2754_v35, %v2761_v36  ;;  %v5218_v35 = vld [vmem:[%s6973_s6 + $0x44] ss:$16 sps:$4 sm:$0xff]   ;;  %v5216_v36 = vld [vmem:[%s6973_s6 + $0x40] ss:$16 sps:$4 sm:$0xff]  }
 0x4dc   :  { %3193 = vmatprep.subr.bf16.mxu1 %v5110_v45  ;;  %3234 = vmatprep.subr.bf16.mxu0 %v5113_v46 }
 0x4df   :  { %3194 = vmatpush1.bf16.msra.mxu1 %v5108_v47  ;;  %3235 = vmatpush1.bf16.msra.mxu0 %v5111_v49 }
 0x4e0   :  { %3195 = vmatprep.subr.bf16.mxu1 %v5116_v50  ;;  %3236 = vmatprep.subr.bf16.mxu0 %v5119_v51 }
 0x4e3   :  { %3196 = vmatpush1.bf16.msra.mxu1 %v5114_v52  ;;  %3237 = vmatpush1.bf16.msra.mxu0 %v5117_v53 }
 0x4e4   :  { %3197 = vmatprep.subr.bf16.mxu1 %v5122_v54  ;;  %3238 = vmatprep.subr.bf16.mxu0 %v5125_v55  ;;  %v5161_v55 = vld [vmem:[%s6972_s4 + $0x14] ss:$8 sps:$4 sm:$0xff]  }
 0x4e7   :  { %3198 = vmatpush1.bf16.msra.mxu1 %v5120_v56  ;;  %3239 = vmatpush1.bf16.msra.mxu0 %v5123_v57 }
 0x4e8   :  { %3199 = vmatprep.subr.bf16.mxu1 %v5128_v58  ;;  %3240 = vmatprep.subr.bf16.mxu0 %v5131_v60  ;;  %v5159_v58 = vld [vmem:[%s6972_s4 + $0x10] ss:$8 sps:$4 sm:$0xff]   ;;  %v5162_v60 = vld [vmem:[%s6972_s4 + $0x20] ss:$8 sps:$4 sm:$0xff]  }
 0x4eb   :  { %3200 = vmatpush1.bf16.msra.mxu1 %v5126_v59  ;;  %3241 = vmatpush1.bf16.msra.mxu0 %v5129_v61  ;;  %v5164_v59 = vld [vmem:[%s6972_s4 + $0x24] ss:$8 sps:$4 sm:$0xff]   ;;  %v5167_v61 = vld [vmem:[%s6972_s4 + $0x34] ss:$8 sps:$4 sm:$0xff]  }
 0x4ec   :  { %3201 = vmatprep.subr.bf16.mxu1 %v5134_v62  ;;  %3242 = vmatprep.subr.bf16.mxu0 %v5137_v0  ;;  %v5165_v62 = vld [vmem:[%s6972_s4 + $0x30] ss:$8 sps:$4 sm:$0xff]   ;;  %v5168_v0 = vld [vmem:[%s6972_s4 + $0x40] ss:$8 sps:$4 sm:$0xff]  }
 0x4ef   :  { %3202 = vmatpush1.bf16.msra.mxu1 %v5132_v63  ;;  %3243 = vmatpush1.bf16.msra.mxu0 %v5135_v1  ;;  %v5170_v63 = vld [vmem:[%s6972_s4 + $0x44] ss:$8 sps:$4 sm:$0xff]   ;;  %v5173_v1 = vld [vmem:[%s6972_s4 + $0x54] ss:$8 sps:$4 sm:$0xff]  }
 0x4f0   :  { %3203 = vmatprep.subr.bf16.mxu1 %v5140_v2  ;;  %3244 = vmatprep.subr.bf16.mxu0 %v5143_v5  ;;  %v5171_v2 = vld [vmem:[%s6972_s4 + $0x50] ss:$8 sps:$4 sm:$0xff]   ;;  %v5174_v5 = vld [vmem:[%s6972_s4 + $0x60] ss:$8 sps:$4 sm:$0xff]  }
 0x4f3   :  { %3204 = vmatpush1.bf16.msra.mxu1 %v5138_v3  ;;  %3245 = vmatpush1.bf16.msra.mxu0 %v5141_v7  ;;  %v5176_v3 = vld [vmem:[%s6972_s4 + $0x64] ss:$8 sps:$4 sm:$0xff]   ;;  %v5179_v7 = vld [vmem:[%s6972_s4 + $0x74] ss:$8 sps:$4 sm:$0xff]  }
 0x4f4   :  { %3205 = vmatprep.subr.bf16.mxu1 %v5146_v8  ;;  %3246 = vmatprep.subr.bf16.mxu0 %v5149_v13  ;;  %v5177_v8 = vld [vmem:[%s6972_s4 + $0x70] ss:$8 sps:$4 sm:$0xff]   ;;  %v5185_v13 = vld [vmem:[%s6972_s4 + $0x94] ss:$8 sps:$4 sm:$0xff]  }
 0x4f7   :  { %3206 = vmatpush1.bf16.msra.mxu1 %v5144_v9  ;;  %3247 = vmatpush1.bf16.msra.mxu0 %v5147_v12  ;;  %v5182_v9 = vld [vmem:[%s6972_s4 + $0x84] ss:$8 sps:$4 sm:$0xff]   ;;  %v5180_v12 = vld [vmem:[%s6972_s4 + $0x80] ss:$8 sps:$4 sm:$0xff]  }
 0x4f8   :  { %3207 = vmatprep.subr.bf16.mxu1 %v5152_v15  ;;  %3248 = vmatprep.subr.bf16.mxu0 %v5155_v18  ;;  %v5183_v15 = vld [vmem:[%s6972_s4 + $0x90] ss:$8 sps:$4 sm:$0xff]   ;;  %v5186_v18 = vld [vmem:[%s6972_s4 + $0xa0] ss:$8 sps:$4 sm:$0xff]  }
 0x4fb   :  { %3208 = vmatpush1.bf16.msra.mxu1 %v5150_v16  ;;  %3249 = vmatpush1.bf16.msra.mxu0 %v5153_v19  ;;  %v5188_v16 = vld [vmem:[%s6972_s4 + $0xa4] ss:$8 sps:$4 sm:$0xff]   ;;  %v5191_v19 = vld [vmem:[%s6972_s4 + $0xb4] ss:$8 sps:$4 sm:$0xff]  }
 0x4fc   :  { %3469 = vmatprep.subr.bf16.mxu1 %v5158_v20  ;;  %v5189_v20 = vld [vmem:[%s6972_s4 + $0xb0] ss:$8 sps:$4 sm:$0xff]  }
 0x591   :  { %v2657_v30 = vpop.f32.mrb[16].mxu1  ;;  %v2698_v31 = vpop.f32.mrb[20].mxu0 }
 0x592   :  { %v2659_v32 = vpop.f32.mrb[17].mxu1  ;;  %v2700_v33 = vpop.f32.mrb[21].mxu0 }
 0x593   :  { %v2709_v34 = vcombine.low %v2657_v30, %v2659_v32  ;;  %v2710_v11 = vcombine.low %v2698_v31, %v2700_v33  ;;  %v2661_v37 = vpop.f32.mrb[18].mxu1  ;;  %v2702_v38 = vpop.f32.mrb[22].mxu0  ;;  %v5201_v30 = vld [vmem:[%s6972_s4 + $0xf0] ss:$8 sps:$4 sm:$0xff]   ;;  %v5206_v32 = vld [vmem:[%s6973_s6 + $0x4] ss:$16 sps:$4 sm:$0xff]  }
 0x594   :  { %v2662_v39 = vpop.f32.mrb[19].mxu1  ;;  %v2703_v40 = vpop.f32.mrb[23].mxu0  ;;  %v5204_v31 = vld [vmem:[%s6973_s6] ss:$16 sps:$4 sm:$0xff]   ;;  %v5209_v33 = vld [vmem:[%s6973_s6 + $0xc] ss:$16 sps:$4 sm:$0xff]   ;;  %3898 = vmatprep.subr.bf16.mxu0 %v5206_v32 }
 0x595   :  { %v2717_v41 = vrot.slane %v2709_v34, %v5503_v17  ;;  %v2724_v42 = vrot.slane %v2710_v11, %v5503_v17  ;;  %v5212_v34 = vld [vmem:[%s6973_s6 + $0x24] ss:$16 sps:$4 sm:$0xff]   ;;  %v5210_v11 = vld [vmem:[%s6973_s6 + $0x20] ss:$16 sps:$4 sm:$0xff]   ;;  %v5249_v32 = vld [vmem:[%s6973_s6 + $0xe8] ss:$16 sps:$4 sm:$0xff]  }
 0x596   :  { %v5224_v37 = vld [vmem:[%s6973_s6 + $0x64] ss:$16 sps:$4 sm:$0xff]   ;;  %v5222_v38 = vld [vmem:[%s6973_s6 + $0x60] ss:$16 sps:$4 sm:$0xff]  }
 0x597   :  { %v2725_v43 = vcombine.low %v2717_v41, %v2724_v42  ;;  %v5230_v39 = vld [vmem:[%s6973_s6 + $0x84] ss:$16 sps:$4 sm:$0xff]   ;;  %v5228_v40 = vld [vmem:[%s6973_s6 + $0x80] ss:$16 sps:$4 sm:$0xff]  }
 0x598   :  { %v5236_v41 = vld [vmem:[%s6973_s6 + $0xa4] ss:$16 sps:$4 sm:$0xff]   ;;  %v5234_v42 = vld [vmem:[%s6973_s6 + $0xa0] ss:$16 sps:$4 sm:$0xff]  }
 0x599   :  { %v2727_v45 = vadd.f32 %v2725_v43, %v6140_v48  ;;  %v5156_v48 = vld [vmem:[%s6972_s4] ss:$8 sps:$4 sm:$0xff]   ;;  %v5242_v43 = vld [vmem:[%s6973_s6 + $0xc4] ss:$16 sps:$4 sm:$0xff]  }
 0x59b   :  { %v6650_v46 = vadd.f32 %v2762_v44, %v2727_v45  ;;  %v5240_v44 = vld [vmem:[%s6973_s6 + $0xc0] ss:$16 sps:$4 sm:$0xff]   ;;  %v5248_v45 = vld [vmem:[%s6973_s6 + $0xe4] ss:$16 sps:$4 sm:$0xff]  }
 0x59d   :  { %v2775_v47 = vrot.slane %v6650_v46, %v5503_v17  ;;  %v2768_v49 = vcombine.high %v6650_v46, %v6650_v46  ;;  %4382 = vst [vmem:[%s6977_s9 + $0x8] sm:$0xff] %v6650_v46 }
 0x59f   :  { %v2783_v50 = vcombine.high %v2775_v47, %v2775_v47  ;;  %v2782_v51 = vrot.slane %v2768_v49, %v5503_v17  ;;  %v2789_v54 = vpack.c.bf16 %v2775_v47, %v2775_v47  ;;  %v5246_v47 = vld [vmem:[%s6973_s6 + $0xe0] ss:$16 sps:$4 sm:$0xff]   ;;  %v5254_v49 = vld [vmem:[%s6973_s6 + $0x104] ss:$16 sps:$4 sm:$0xff]  }
 0x5a1   :  { %v2790_v52 = vpack.c.bf16 %v2783_v50, %v2783_v50  ;;  %v2784_v53 = vcombine.high %v2782_v51, %v2782_v51  ;;  %v2791_v57 = vpack.c.bf16 %v2782_v51, %v2782_v51  ;;  %v5252_v50 = vld [vmem:[%s6973_s6 + $0x100] ss:$16 sps:$4 sm:$0xff]   ;;  %v5260_v51 = vld [vmem:[%s6973_s6 + $0x124] ss:$16 sps:$4 sm:$0xff]  }
 0x5a3   :  { %3209 = vmatprep.mubr.bf16.mxu1 %v2790_v52  ;;  %v2792_v56 = vpack.c.bf16 %v2784_v53, %v2784_v53  ;;  %v5258_v52 = vld [vmem:[%s6973_s6 + $0x120] ss:$16 sps:$4 sm:$0xff]   ;;  %v5266_v53 = vld [vmem:[%s6973_s6 + $0x144] ss:$16 sps:$4 sm:$0xff]  }
 0x5a4   :  { %3210 = vmatmul.mubr.bf16.vlgmr.msra.gmra.mrb[20].mxu1 %v2789_v54  ;;  %v5272_v54 = vld [vmem:[%s6973_s6 + $0x164] ss:$16 sps:$4 sm:$0xff]  }
 0x5a5   :  { %3250 = vmatprep.mubr.bf16.mxu0 %v2792_v56  ;;  %3470 = vmatpush1.bf16.msra.mxu1 %v5156_v48  ;;  %v5264_v48 = vld [vmem:[%s6973_s6 + $0x140] ss:$16 sps:$4 sm:$0xff]   ;;  %v5278_v56 = vld [vmem:[%s6973_s6 + $0x184] ss:$16 sps:$4 sm:$0xff]  }
 0x5a6   :  { %3251 = vmatmul.mubr.bf16.vlgmr.msra.gmra.mrb[24].mxu0 %v2791_v57  ;;  %3471 = vmatprep.subr.bf16.mxu1 %v5161_v55  ;;  %v5270_v55 = vld [vmem:[%s6973_s6 + $0x160] ss:$16 sps:$4 sm:$0xff]  }
 0x5a7   :  { %3899 = vmatpush1.bf16.msra.mxu0 %v5204_v31  ;;  %v5276_v57 = vld [vmem:[%s6973_s6 + $0x180] ss:$16 sps:$4 sm:$0xff]   ;;  %v5251_v31 = vld [vmem:[%s6973_s6 + $0xec] ss:$16 sps:$4 sm:$0xff]  }
 0x5a8   :  { %3900 = vmatprep.subr.bf16.mxu0 %v5212_v34  ;;  %v5255_v34 = vld [vmem:[%s6973_s6 + $0x108] ss:$16 sps:$4 sm:$0xff]  }
 0x5a9   :  { %3472 = vmatpush1.bf16.msra.mxu1 %v5159_v58  ;;  %v5284_v58 = vld [vmem:[%s6973_s6 + $0x1a4] ss:$16 sps:$4 sm:$0xff]  }
 0x5aa   :  { %3473 = vmatprep.subr.bf16.mxu1 %v5164_v59  ;;  %v5282_v59 = vld [vmem:[%s6973_s6 + $0x1a0] ss:$16 sps:$4 sm:$0xff]  }
 0x5ab   :  { %3901 = vmatpush1.bf16.msra.mxu0 %v5210_v11  ;;  %v5263_v11 = vld [vmem:[%s6973_s6 + $0x12c] ss:$16 sps:$4 sm:$0xff]  }
 0x5ac   :  { %3902 = vmatprep.subr.bf16.mxu0 %v5218_v35  ;;  %v5261_v35 = vld [vmem:[%s6973_s6 + $0x128] ss:$16 sps:$4 sm:$0xff]  }
 0x5ad   :  { %3474 = vmatpush1.bf16.msra.mxu1 %v5162_v60 }
 0x5ae   :  { %3475 = vmatprep.subr.bf16.mxu1 %v5167_v61 }
 0x5af   :  { %3903 = vmatpush1.bf16.msra.mxu0 %v5216_v36  ;;  %v5269_v36 = vld [vmem:[%s6973_s6 + $0x14c] ss:$16 sps:$4 sm:$0xff]  }
 0x5b0   :  { %3904 = vmatprep.subr.bf16.mxu0 %v5224_v37  ;;  %v5267_v37 = vld [vmem:[%s6973_s6 + $0x148] ss:$16 sps:$4 sm:$0xff]  }
 0x5b1   :  { %3476 = vmatpush1.bf16.msra.mxu1 %v5165_v62 }
 0x5b2   :  { %3477 = vmatprep.subr.bf16.mxu1 %v5170_v63 }
 0x5b3   :  { %3905 = vmatpush1.bf16.msra.mxu0 %v5222_v38  ;;  %v5275_v38 = vld [vmem:[%s6973_s6 + $0x16c] ss:$16 sps:$4 sm:$0xff]  }
 0x5b4   :  { %3906 = vmatprep.subr.bf16.mxu0 %v5230_v39  ;;  %v5273_v39 = vld [vmem:[%s6973_s6 + $0x168] ss:$16 sps:$4 sm:$0xff]  }
 0x5b5   :  { %3478 = vmatpush1.bf16.msra.mxu1 %v5168_v0 }
 0x5b6   :  { %3479 = vmatprep.subr.bf16.mxu1 %v5173_v1 }
 0x5b7   :  { %3907 = vmatpush1.bf16.msra.mxu0 %v5228_v40  ;;  %v5281_v40 = vld [vmem:[%s6973_s6 + $0x18c] ss:$16 sps:$4 sm:$0xff]  }
 0x5b8   :  { %3908 = vmatprep.subr.bf16.mxu0 %v5236_v41  ;;  %v5279_v41 = vld [vmem:[%s6973_s6 + $0x188] ss:$16 sps:$4 sm:$0xff]  }
 0x5b9   :  { %3480 = vmatpush1.bf16.msra.mxu1 %v5171_v2 }
 0x5ba   :  { %3481 = vmatprep.subr.bf16.mxu1 %v5176_v3 }
 0x5bb   :  { %3909 = vmatpush1.bf16.msra.mxu0 %v5234_v42  ;;  %v5287_v42 = vld [vmem:[%s6973_s6 + $0x1ac] ss:$16 sps:$4 sm:$0xff]  }
 0x5bc   :  { %3910 = vmatprep.subr.bf16.mxu0 %v5242_v43  ;;  %v5285_v43 = vld [vmem:[%s6973_s6 + $0x1a8] ss:$16 sps:$4 sm:$0xff]  }
 0x5bd   :  { %3482 = vmatpush1.bf16.msra.mxu1 %v5174_v5 }
 0x5be   :  { %3483 = vmatprep.subr.bf16.mxu1 %v5179_v7 }
 0x5bf   :  { %3911 = vmatpush1.bf16.msra.mxu0 %v5240_v44  ;;  %v5290_v44 = vld [vmem:[%s6973_s6 + $0x1c4] ss:$16 sps:$4 sm:$0xff]  }
 0x5c0   :  { %3912 = vmatprep.subr.bf16.mxu0 %v5248_v45  ;;  %v5293_v45 = vld [vmem:[%s6973_s6 + $0x1cc] ss:$16 sps:$4 sm:$0xff]  }
 0x5c1   :  { %3484 = vmatpush1.bf16.msra.mxu1 %v5177_v8 }
 0x5c2   :  { %3485 = vmatprep.subr.bf16.mxu1 %v5182_v9 }
 0x5c3   :  { %3913 = vmatpush1.bf16.msra.mxu0 %v5246_v47  ;;  %v5288_v47 = vld [vmem:[%s6973_s6 + $0x1c0] ss:$16 sps:$4 sm:$0xff]  }
 0x5c4   :  { %3914 = vmatprep.subr.bf16.mxu0 %v5254_v49  ;;  %v5291_v49 = vld [vmem:[%s6973_s6 + $0x1c8] ss:$16 sps:$4 sm:$0xff]  }
 0x5c5   :  { %3486 = vmatpush1.bf16.msra.mxu1 %v5180_v12 }
 0x5c6   :  { %3487 = vmatprep.subr.bf16.mxu1 %v5185_v13 }
 0x5c7   :  { %3915 = vmatpush1.bf16.msra.mxu0 %v5252_v50  ;;  %v5296_v50 = vld [vmem:[%s6973_s6 + $0x1e4] ss:$16 sps:$4 sm:$0xff]  }
 0x5c8   :  { %3916 = vmatprep.subr.bf16.mxu0 %v5260_v51  ;;  %v5299_v51 = vld [vmem:[%s6973_s6 + $0x1ec] ss:$16 sps:$4 sm:$0xff]  }
 0x5c9   :  { %3488 = vmatpush1.bf16.msra.mxu1 %v5183_v15 }
 0x5ca   :  { %3489 = vmatprep.subr.bf16.mxu1 %v5188_v16  ;;  %v5207_v16 = vld [vmem:[%s6973_s6 + $0x8] ss:$16 sps:$4 sm:$0xff]  }
 0x5cb   :  { %3917 = vmatpush1.bf16.msra.mxu0 %v5258_v52  ;;  %v5294_v52 = vld [vmem:[%s6973_s6 + $0x1e0] ss:$16 sps:$4 sm:$0xff]  }
 0x5cc   :  { %3918 = vmatprep.subr.bf16.mxu0 %v5266_v53  ;;  %v5297_v53 = vld [vmem:[%s6973_s6 + $0x1e8] ss:$16 sps:$4 sm:$0xff]  }
 0x5cd   :  { %3490 = vmatpush1.bf16.msra.mxu1 %v5186_v18 }
 0x5ce   :  { %3491 = vmatprep.subr.bf16.mxu1 %v5191_v19  ;;  %v5215_v19 = vld [vmem:[%s6973_s6 + $0x2c] ss:$16 sps:$4 sm:$0xff]  }
 0x5cf   :  { %3919 = vmatpush1.bf16.msra.mxu0 %v5264_v48  ;;  %v3297_v48 = vld [vmem:[%s6975_s5] sm:$0x3] }
 0x5d0   :  { %3920 = vmatprep.subr.bf16.mxu0 %v5272_v54  ;;  %v3302_v54 = vrot.slane %v3297_v48, %v5799_v4 }
 0x5d1   :  { %3492 = vmatpush1.bf16.msra.mxu1 %v5189_v20  ;;  %v5219_v20 = vld [vmem:[%s6973_s6 + $0x48] ss:$16 sps:$4 sm:$0xff]  }
 0x5d2   :  { %3493 = vmatprep.subr.bf16.mxu1 %v5194_v21  ;;  %v5227_v21 = vld [vmem:[%s6973_s6 + $0x6c] ss:$16 sps:$4 sm:$0xff]  }
 0x5d3   :  { %3921 = vmatpush1.bf16.msra.mxu0 %v5270_v55  ;;  %v3306_v55 = vrot.slane %v3297_v48, %v5805_v6 }
 0x5d4   :  { %3922 = vmatprep.subr.bf16.mxu0 %v5278_v56 }
 0x5d5   :  { %3494 = vmatpush1.bf16.msra.mxu1 %v5192_v24  ;;  %v5225_v24 = vld [vmem:[%s6973_s6 + $0x68] ss:$16 sps:$4 sm:$0xff]  }
 0x5d6   :  { %3495 = vmatprep.subr.bf16.mxu1 %v5197_v25  ;;  %v5233_v25 = vld [vmem:[%s6973_s6 + $0x8c] ss:$16 sps:$4 sm:$0xff]  }
 0x5d7   :  { %3923 = vmatpush1.bf16.msra.mxu0 %v5276_v57 }
 0x5d8   :  { %3924 = vmatprep.subr.bf16.mxu0 %v5284_v58 }
 0x5d9   :  { %3496 = vmatpush1.bf16.msra.mxu1 %v5195_v26  ;;  %v5231_v26 = vld [vmem:[%s6973_s6 + $0x88] ss:$16 sps:$4 sm:$0xff]  }
 0x5da   :  { %3497 = vmatprep.subr.bf16.mxu1 %v5200_v27  ;;  %v5239_v27 = vld [vmem:[%s6973_s6 + $0xac] ss:$16 sps:$4 sm:$0xff]  }
 0x5db   :  { %3925 = vmatpush1.bf16.msra.mxu0 %v5282_v59 }
 0x5dc   :  { %3926 = vmatprep.subr.bf16.mxu0 %v5290_v44 }
 0x5dd   :  { %3498 = vmatpush1.bf16.msra.mxu1 %v5198_v28  ;;  %v5237_v28 = vld [vmem:[%s6973_s6 + $0xa8] ss:$16 sps:$4 sm:$0xff]  }
 0x5de   :  { %3499 = vmatprep.subr.bf16.mxu1 %v5203_v29  ;;  %v5245_v29 = vld [vmem:[%s6973_s6 + $0xcc] ss:$16 sps:$4 sm:$0xff]  }
 0x5df   :  { %3927 = vmatpush1.bf16.msra.mxu0 %v5288_v47 }
 0x5e0   :  { %3928 = vmatprep.subr.bf16.mxu0 %v5296_v50 }
 0x5e1   :  { %3500 = vmatpush1.bf16.msra.mxu1 %v5201_v30  ;;  %v5243_v30 = vld [vmem:[%s6973_s6 + $0xc8] ss:$16 sps:$4 sm:$0xff]  }
 0x5e2   :  { %3939 = vmatprep.subr.bf16.mxu1 %v5209_v33  ;;  %v5257_v33 = vld [vmem:[%s6973_s6 + $0x10c] ss:$16 sps:$4 sm:$0xff]  }
 0x5e3   :  { %3929 = vmatpush1.bf16.msra.mxu0 %v5294_v52 }
 0x677   :  { %v3211_v60 = vpop.f32.mrb[20].mxu1 }
 0x678   :  { %v3213_v61 = vpop.f32.mrb[21].mxu1 }
 0x679   :  { %v3215_v62 = vpop.f32.mrb[22].mxu1  ;;  %v3252_v63 = vpop.f32.mrb[24].mxu0 }
 0x67a   :  { %v3253_v0 = vadd.f32 %v3252_v63, %v3211_v60  ;;  %v3216_v1 = vpop.f32.mrb[23].mxu1  ;;  %v3254_v2 = vpop.f32.mrb[25].mxu0 }
 0x67b   :  { %v3255_v3 = vadd.f32 %v3254_v2, %v3213_v61  ;;  %v3256_v5 = vpop.f32.mrb[26].mxu0  ;;  %v4003_v2 = vld [vmem:[%s6976_s7] sm:$0xf] }
 0x67c   :  { %v3259_v7 = vadd.f32 %v3253_v0, %v5809_v10  ;;  %v3257_v8 = vpop.f32.mrb[27].mxu0  ;;  %v5213_v10 = vld [vmem:[%s6973_s6 + $0x28] ss:$16 sps:$4 sm:$0xff]   ;;  %v4012_v5 = vrot.slane %v4003_v2, %v5805_v6 }
 0x67d   :  { %v3260_v9 = vadd.f32 %v3255_v3, %v5811_v14  ;;  %v5221_v14 = vld [vmem:[%s6973_s6 + $0x4c] ss:$16 sps:$4 sm:$0xff]   ;;  %v4008_v3 = vrot.slane %v4003_v2, %v5799_v4  ;;  %v4020_v8 = vrot.slane %v4003_v2, %v6124_v23 }
 0x67e   :  { %v3261_v12 = vmax.f32 %v3259_v7, 0.0  ;;  %v4016_v7 = vrot.slane %v4003_v2, %v6121_v22 }
 0x67f   :  { %v3262_v13 = vmax.f32 %v3260_v9, 0.0  ;;  %v4021_v9 = vcombine.low %v4008_v3, %v4012_v5 }
 0x680   :  { %v3263_v18 = vpack.c.bf16 %v3261_v12, %v3261_v12  ;;  %v4022_v12 = vcombine.low %v4016_v7, %v4020_v8 }
 0x681   :  { %v3264_v15 = vpack.c.bf16 %v3262_v13, %v3262_v13 }
 0x683   :  { %3501 = vmatprep.mubr.bf16.mxu1 %v3264_v15 }
 0x684   :  { %3502 = vmatmul.mubr.bf16.vlgmr.msra.gmra.mrb[24].mxu1 %v3263_v18 }
 0x685   :  { %3940 = vmatpush1.bf16.msra.mxu1 %v5207_v16 }
 0x686   :  { %3941 = vmatprep.subr.bf16.mxu1 %v5215_v19 }
 0x689   :  { %3942 = vmatpush1.bf16.msra.mxu1 %v5213_v10 }
 0x68a   :  { %3943 = vmatprep.subr.bf16.mxu1 %v5221_v14  ;;  %v4029_v14 = vrot.slane %v4021_v9, %v5503_v17 }
 0x68d   :  { %3944 = vmatpush1.bf16.msra.mxu1 %v5219_v20  ;;  %v4036_v20 = vrot.slane %v4022_v12, %v5503_v17 }
 0x68e   :  { %3945 = vmatprep.subr.bf16.mxu1 %v5227_v21 }
 0x691   :  { %3946 = vmatpush1.bf16.msra.mxu1 %v5225_v24 }
 0x692   :  { %3947 = vmatprep.subr.bf16.mxu1 %v5233_v25 }
 0x695   :  { %3948 = vmatpush1.bf16.msra.mxu1 %v5231_v26  ;;  %v4037_v26 = vcombine.low %v4029_v14, %v4036_v20 }
 0x696   :  { %3949 = vmatprep.subr.bf16.mxu1 %v5239_v27 }
 0x699   :  { %3950 = vmatpush1.bf16.msra.mxu1 %v5237_v28 }
 0x69a   :  { %3951 = vmatprep.subr.bf16.mxu1 %v5245_v29 }
 0x69d   :  { %3952 = vmatpush1.bf16.msra.mxu1 %v5243_v30 }
 0x69e   :  { %3953 = vmatprep.subr.bf16.mxu1 %v5251_v31 }
 0x6a1   :  { %3954 = vmatpush1.bf16.msra.mxu1 %v5249_v32 }
 0x6a2   :  { %3955 = vmatprep.subr.bf16.mxu1 %v5257_v33 }
 0x6a5   :  { %3956 = vmatpush1.bf16.msra.mxu1 %v5255_v34 }
 0x6a6   :  { %3957 = vmatprep.subr.bf16.mxu1 %v5263_v11 }
 0x6a9   :  { %3958 = vmatpush1.bf16.msra.mxu1 %v5261_v35 }
 0x6aa   :  { %3959 = vmatprep.subr.bf16.mxu1 %v5269_v36 }
 0x6ad   :  { %3960 = vmatpush1.bf16.msra.mxu1 %v5267_v37 }
 0x6ae   :  { %3961 = vmatprep.subr.bf16.mxu1 %v5275_v38 }
 0x6b1   :  { %3962 = vmatpush1.bf16.msra.mxu1 %v5273_v39 }
 0x6b2   :  { %3963 = vmatprep.subr.bf16.mxu1 %v5281_v40 }
 0x6b5   :  { %3964 = vmatpush1.bf16.msra.mxu1 %v5279_v41 }
 0x6b6   :  { %3965 = vmatprep.subr.bf16.mxu1 %v5287_v42 }
 0x6b9   :  { %3966 = vmatpush1.bf16.msra.mxu1 %v5285_v43 }
 0x6ba   :  { %3967 = vmatprep.subr.bf16.mxu1 %v5293_v45 }
 0x6bd   :  { %3968 = vmatpush1.bf16.msra.mxu1 %v5291_v49 }
 0x6be   :  { %3969 = vmatprep.subr.bf16.mxu1 %v5299_v51 }
 0x6c1   :  { %3970 = vmatpush1.bf16.msra.mxu1 %v5297_v53 }
 0x757   :  { %v3503_v56 = vpop.f32.mrb[24].mxu1 }
 0x758   :  { %v3504_v57 = vadd.f32 %v3503_v56, %v3302_v54  ;;  %v3505_v58 = vpop.f32.mrb[25].mxu1 }
 0x759   :  { %v3506_v59 = vadd.f32 %v3505_v58, %v3306_v55  ;;  %v3507_v60 = vpop.f32.mrb[26].mxu1 }
 0x75a   :  { %v3510_v61 = vmax.f32 %v3504_v57, 0.0  ;;  %v3508_v62 = vpop.f32.mrb[27].mxu1 }
 0x75b   :  { %v3511_v63 = vmax.f32 %v3506_v59, 0.0 }
 0x75c   :  { %v3512_v1 = vpack.c.bf16 %v3510_v61, %v3510_v61 }
 0x75d   :  { %v3513_v0 = vpack.c.bf16 %v3511_v63, %v3511_v63 }
 0x75f   :  { %3930 = vmatprep.mubr.bf16.mxu0 %v3513_v0  ;;  %3971 = vmatprep.mubr.bf16.mxu1 %v3513_v0 }
 0x760   :  { %3931 = vmatmul.mubr.bf16.vlgmr.msra.gmra.mrb[28].mxu0 %v3512_v1  ;;  %3972 = vmatmul.mubr.bf16.vlgmr.msra.gmra.mrb[28].mxu1 %v3512_v1 }
 0x833   :  { %v3932_v13 = vpop.f32.mrb[28].mxu0  ;;  %v3973_v15 = vpop.f32.mrb[28].mxu1 }
 0x834   :  { %v3934_v16 = vpop.f32.mrb[29].mxu0  ;;  %v3975_v18 = vpop.f32.mrb[29].mxu1 }
 0x835   :  { %v3984_v19 = vcombine.low %v3932_v13, %v3934_v16  ;;  %v3985_v10 = vcombine.low %v3973_v15, %v3975_v18  ;;  %v3936_v21 = vpop.f32.mrb[30].mxu0  ;;  %v3977_v4 = vpop.f32.mrb[30].mxu1 }
 0x836   :  { %v3937_v24 = vpop.f32.mrb[31].mxu0  ;;  %v3978_v6 = vpop.f32.mrb[31].mxu1 }
 0x837   :  { %v3992_v22 = vrot.slane %v3984_v19, %v5503_v17  ;;  %v3999_v23 = vrot.slane %v3985_v10, %v5503_v17 }
 0x839   :  { %v4000_v25 = vcombine.low %v3992_v22, %v3999_v23 }
 0x83b   :  { %v4002_v27 = vadd.f32 %v4000_v25, %v6650_v46 }
 0x83d   :  { %v4039_v28 = vadd.f32 %v4037_v26, %v4002_v27 }
 0x83f   :  { %4543 = vst [vmem:[%s6977_s9 + $0x10] sm:$0xff] %v4039_v28 }

</bundles_post_ra>
